<compile_context>
chip_gen: v6e
topology: v6e:2x2x1
jax: 0.10.0
libtpu: 0.0.40
codegen_flags: <defaults>
</compile_context>

<pallas_src>
import functools

import jax
import jax.numpy as jnp
from jax.experimental import pallas as pl
from jax.experimental.pallas import tpu as pltpu

H = 3          # hidden size
D = 3          # input size
G = 4 * H      # per-direction gate width (12)
W2 = 2 * G     # fused (both-direction / padded) lane width (24)

# Packed-weight row offsets inside the single (PACK_ROWS, W2) operand.
ROW_B0 = 0        # (1)  layer-0 fused bias, 24-lane interleaved [fwd|bwd per gate]
ROW_WIXF0 = 1     # (D)  layer-0 fwd input-weight rows (x @ W form), interleaved fwd lanes
ROW_WIXB0 = 4     # (D)  layer-0 bwd input-weight rows, interleaved bwd lanes
ROW_WHH0 = 7      # (2H) layer-0 recurrent rows: k<H -> h_fwd cols, k>=H -> h_bwd cols
ROW_B1F = 13      # (1)  layer-1 fwd fused bias (plain [i f o g] in lanes 0:12, rest 0)
ROW_W1F = 14      # (2H) layer-1 fwd input rows (k<H from seq0f, k>=H from seq0b)
ROW_WHH1 = 20     # (H)  layer-1 fwd recurrent rows
ROW_B1B = 23      # (1)  layer-1 bwd fused bias
ROW_W1B = 24      # (2H) layer-1 bwd input rows
ROW_LIN = 30      # (1)  [0.5*w_lin (6) | 0.5*b_lin | zeros]
PACK_ROWS = 32


def bilstm_kernel(x_ref, w_ref, out_ref, *, T, B):
    # x_ref: (B, T*D) float32 (row b = [x[b,0,:], x[b,1,:], ...]); w_ref: (PACK_ROWS, W2).
    def wrow(r, n=None):
        v = w_ref[r:r + 1, :]                               # (1, W2)
        return v if n is None else jnp.broadcast_to(v, (n, W2))

    # ---- hoisted weight rows: one load + one broadcast each, reused across all steps.
    b0 = wrow(ROW_B0, B)
    wixf = [wrow(ROW_WIXF0 + k, B) for k in range(D)]
    wixb = [wrow(ROW_WIXB0 + k, B) for k in range(D)]
    whh0 = [wrow(ROW_WHH0 + k, B) for k in range(2 * H)]
    b1f = wrow(ROW_B1F, B)
    w1f = [wrow(ROW_W1F + k, B) for k in range(2 * H)]
    whh1 = [wrow(ROW_WHH1 + k, B) for k in range(H)]
    b1b = wrow(ROW_B1B, B)
    w1b = [wrow(ROW_W1B + k, B) for k in range(2 * H)]
    lin = wrow(ROW_LIN)                                     # (1, W2), used once

    xall = x_ref[...]                                       # (B, T*D)

    # Gate columns were pre-scaled by 0.5 for i/f/o at pack time, so one tanh over the
    # slab gives sigmoid(i/f/o) = 0.5*t + 0.5 and g = t.
    def act_fused(gates, c):      # gates (B, 24) interleaved; c (B, 2H) = [c_f | c_b]
        t = jnp.tanh(gates)
        sfo = 0.5 * t[:, :6 * H] + 0.5                      # [i_f i_b | f_f f_b | o_f o_b]
        g = t[:, 6 * H:]                                    # [g_f | g_b]
        c_new = sfo[:, 2 * H:4 * H] * c + sfo[:, :2 * H] * g
        h_new = sfo[:, 4 * H:6 * H] * jnp.tanh(c_new)       # [h_f | h_b]
        return h_new, c_new

    def act_single(gates, c):     # gates (B, 24) with lanes 12:24 == 0; c (B, H)
        t = jnp.tanh(gates)
        sfo = 0.5 * t[:, :3 * H] + 0.5                      # [i | f | o]
        g = t[:, 3 * H:4 * H]
        c_new = sfo[:, H:2 * H] * c + sfo[:, :H] * g
        h_new = sfo[:, 2 * H:3 * H] * jnp.tanh(c_new)
        return h_new, c_new

    # ---- layer 0: both directions advance as ONE (B, 24) slab per step
    #      (step s packs fwd @ time s and bwd @ time T-1-s); 2 EUP passes per step.
    c2 = jnp.zeros((B, 2 * H), jnp.float32)
    h2 = None
    fwd_h = [None] * T
    bwd_h = [None] * T
    for s in range(T):
        gates = b0
        for k in range(D):
            gates = gates + xall[:, s * D + k:s * D + k + 1] * wixf[k]
            cb = (T - 1 - s) * D + k
            gates = gates + xall[:, cb:cb + 1] * wixb[k]
        if s > 0:                      # zero initial state -> skip recurrence FMAs at s=0
            for k in range(2 * H):
                gates = gates + h2[:, k:k + 1] * whh0[k]
        h2, c2 = act_fused(gates, c2)
        fwd_h[s] = h2[:, :H]
        bwd_h[T - 1 - s] = h2[:, H:]

    # ---- layer-1 input projection: VPU FMAs straight from register-resident layer-0
    #      outputs (no VMEM scratch round-trip), biases folded.
    gx1 = []
    for t in range(T):
        acc = b1f
        for k in range(H):
            acc = acc + fwd_h[t][:, k:k + 1] * w1f[k]
            acc = acc + bwd_h[t][:, k:k + 1] * w1f[H + k]
        gx1.append(acc)

    # ---- layer 1, forward direction (only its final hidden state is needed).
    zeros_h = jnp.zeros((B, H), jnp.float32)
    h1, c1 = act_single(gx1[0], zeros_h)
    for t in range(1, T):
        gates = gx1[t]
        for k in range(H):
            gates = gates + h1[:, k:k + 1] * whh1[k]
        h1, c1 = act_single(gates, c1)

    # ---- layer 1, backward direction at t=T-1 is its first step from a zero state
    #      (no recurrence term); it runs concurrently with the layer-1 forward chain.
    accb = b1b
    for k in range(H):
        accb = accb + fwd_h[T - 1][:, k:k + 1] * w1b[k]
        accb = accb + bwd_h[T - 1][:, k:k + 1] * w1b[H + k]
    h1b, _ = act_single(accb, zeros_h)

    # ---- final Linear(6,1) + Sigmoid: lin row is pre-scaled by 0.5 so
    #      sigmoid(z) == 0.5*tanh(0.5*z) + 0.5 needs a single tanh.
    y = (jnp.sum(h1 * lin[:, :H], axis=-1, keepdims=True)
         + jnp.sum(h1b * lin[:, H:2 * H], axis=-1, keepdims=True)
         + lin[:, 2 * H:2 * H + 1])
    out_ref[...] = 0.5 * jnp.tanh(y) + 0.5


def model_forward(x, w_pack):
    """x: (B, T, 3) float32, w_pack: (PACK_ROWS, W2) -> (B,) sigmoid probabilities."""
    B, T, Din = x.shape
    xf = x.reshape(B, T * Din)          # contiguous reshape: no transpose fusion
    kernel = functools.partial(bilstm_kernel, T=T, B=B)
    out = pl.pallas_call(
        kernel,
        out_shape=jax.ShapeDtypeStruct((B, 1), jnp.float32),
        in_specs=[pl.BlockSpec(memory_space=pltpu.MemorySpace.VMEM),
                  pl.BlockSpec(memory_space=pltpu.MemorySpace.VMEM)],
        out_specs=pl.BlockSpec(memory_space=pltpu.MemorySpace.VMEM),
    )(xf, w_pack)
    return out.reshape(-1)


# ----------------------------- parameters (PyTorch layout) -----------------------------

def init_params(key):
    """Deterministic synthetic weights in PyTorch nn.LSTM / nn.Linear layout
    (gate order i, f, g, o; weight_ih: (4H, in); weight_hh: (4H, H))."""
    ks = jax.random.split(key, 18)

    def w(k, shape):
        return jax.random.normal(k, shape, jnp.float32) * 0.3

    return dict(
        w_ih_l0=w(ks[0], (G, D)), w_hh_l0=w(ks[1], (G, H)),
        b_ih_l0=w(ks[2], (G,)), b_hh_l0=w(ks[3], (G,)),
        w_ih_l0r=w(ks[4], (G, D)), w_hh_l0r=w(ks[5], (G, H)),
        b_ih_l0r=w(ks[6], (G,)), b_hh_l0r=w(ks[7], (G,)),
        w_ih_l1=w(ks[8], (G, 2 * H)), w_hh_l1=w(ks[9], (G, H)),
        b_ih_l1=w(ks[10], (G,)), b_hh_l1=w(ks[11], (G,)),
        w_ih_l1r=w(ks[12], (G, 2 * H)), w_hh_l1r=w(ks[13], (G, H)),
        b_ih_l1r=w(ks[14], (G,)), b_hh_l1r=w(ks[15], (G,)),
        w_lin=w(ks[16], (1, 2 * H)), b_lin=w(ks[17], (1,)),
    )


def _reorder_scale_cols(w_t):
    """x@W form (in, 4H), torch gate cols [i,f,g,o] -> kernel cols [i,f,o,g] with the
    i/f/o columns pre-scaled by 0.5 (so one tanh yields both sigmoids and tanh(g))."""
    i = w_t[:, 0:H] * 0.5
    f = w_t[:, H:2 * H] * 0.5
    g = w_t[:, 2 * H:3 * H]
    o = w_t[:, 3 * H:4 * H] * 0.5
    return jnp.concatenate([i, f, o, g], axis=1)


def _xw(w):
    """PyTorch (4H, in) weight -> (in, 4H) kernel form (reordered + pre-scaled)."""
    return _reorder_scale_cols(w.T)


def _fused_bias(b_ih, b_hh):
    """-> (4H,) kernel-form fused bias."""
    return _reorder_scale_cols((b_ih + b_hh)[None, :])[0]


def _ilv(row12, direction):
    """(12,) kernel-order gate row -> (24,) interleaved layout
    [i_f i_b | f_f f_b | o_f o_b | g_f g_b]; the other direction's lanes are zero."""
    r = row12.reshape(4, H)
    z = jnp.zeros_like(r)
    pair = jnp.stack([r, z], axis=1) if direction == 0 else jnp.stack([z, r], axis=1)
    return pair.reshape(W2)


def _pad24(v12):
    return jnp.concatenate([v12, jnp.zeros((G,), jnp.float32)])


def pack_params(p):
    """Pack every weight/bias into one (PACK_ROWS, W2) array in the kernel layout."""
    wf0 = _xw(p['w_ih_l0']); wb0 = _xw(p['w_ih_l0r'])        # (D, G)
    uf0 = _xw(p['w_hh_l0']); ub0 = _xw(p['w_hh_l0r'])        # (H, G)
    bf0 = _fused_bias(p['b_ih_l0'], p['b_hh_l0'])            # (G,)
    bb0 = _fused_bias(p['b_ih_l0r'], p['b_hh_l0r'])

    rows = [_ilv(bf0, 0) + _ilv(bb0, 1)]                     # ROW_B0
    rows += [_ilv(wf0[k], 0) for k in range(D)]              # ROW_WIXF0
    rows += [_ilv(wb0[k], 1) for k in range(D)]              # ROW_WIXB0
    rows += [_ilv(uf0[k], 0) for k in range(H)]              # ROW_WHH0 (h_fwd cols)
    rows += [_ilv(ub0[k], 1) for k in range(H)]              # ROW_WHH0 (h_bwd cols)

    w1f = _xw(p['w_ih_l1'])                                  # (2H, G)
    u1f = _xw(p['w_hh_l1'])                                  # (H, G)
    b1f = _fused_bias(p['b_ih_l1'], p['b_hh_l1'])
    w1b = _xw(p['w_ih_l1r'])
    b1b = _fused_bias(p['b_ih_l1r'], p['b_hh_l1r'])

    rows.append(_pad24(b1f))                                 # ROW_B1F
    rows += [_pad24(w1f[k]) for k in range(2 * H)]           # ROW_W1F
    rows += [_pad24(u1f[k]) for k in range(H)]               # ROW_WHH1
    rows.append(_pad24(b1b))                                 # ROW_B1B
    rows += [_pad24(w1b[k]) for k in range(2 * H)]           # ROW_W1B
    lin = jnp.zeros((W2,), jnp.float32)
    lin = lin.at[0:2 * H].set(0.5 * p['w_lin'][0]).at[2 * H].set(0.5 * p['b_lin'][0])
    rows.append(lin)                                         # ROW_LIN
    rows.append(jnp.zeros((W2,), jnp.float32))               # pad to PACK_ROWS
    packed = jnp.stack(rows, axis=0)
    assert packed.shape == (PACK_ROWS, W2)
    return packed


# ----------------------------- pure-JAX reference ---------------------------------------

def reference_forward(x, p):
    """Mirrors PyTorch bidirectional 2-layer LSTM semantics with PyTorch-layout weights;
    last = output[:, -1, :] = [fwd last step | bwd step at t=T-1]."""
    B, T, _ = x.shape

    def cell(xt, h, c, w_ih, w_hh, b_ih, b_hh):
        gates = xt @ w_ih.T + h @ w_hh.T + b_ih + b_hh
        i = jax.nn.sigmoid(gates[:, :H])
        f = jax.nn.sigmoid(gates[:, H:2 * H])
        g = jnp.tanh(gates[:, 2 * H:3 * H])
        o = jax.nn.sigmoid(gates[:, 3 * H:])
        c = f * c + i * g
        return o * jnp.tanh(c), c

    zeros = jnp.zeros((B, H), jnp.float32)

    def run_layer(inp, w_ih, w_hh, b_ih, b_hh, w_ihr, w_hhr, b_ihr, b_hhr):
        h, c = zeros, zeros
        fwd = []
        for t in range(T):
            h, c = cell(inp[:, t], h, c, w_ih, w_hh, b_ih, b_hh)
            fwd.append(h)
        h, c = zeros, zeros
        bwd = [None] * T
        for t in range(T - 1, -1, -1):
            h, c = cell(inp[:, t], h, c, w_ihr, w_hhr, b_ihr, b_hhr)
            bwd[t] = h
        return jnp.stack([jnp.concatenate([f_, b_], axis=-1)
                          for f_, b_ in zip(fwd, bwd)], axis=1)

    out0 = run_layer(x, p['w_ih_l0'], p['w_hh_l0'], p['b_ih_l0'], p['b_hh_l0'],
                     p['w_ih_l0r'], p['w_hh_l0r'], p['b_ih_l0r'], p['b_hh_l0r'])
    out1 = run_layer(out0, p['w_ih_l1'], p['w_hh_l1'], p['b_ih_l1'], p['b_hh_l1'],
                     p['w_ih_l1r'], p['w_hh_l1r'], p['b_ih_l1r'], p['b_hh_l1r'])
    last = out1[:, -1, :]
    y = jax.nn.sigmoid(last @ p['w_lin'].T + p['b_lin'])
    return y.reshape(-1)


if __name__ == "__main__":
    key = jax.random.PRNGKey(0)
    k_x, k_p = jax.random.split(key)
    B, T = 2, 8
    x = jax.random.normal(k_x, (B, T, D), jnp.float32)
    params = init_params(k_p)
    w_pack = pack_params(params)

    out = jax.jit(model_forward)(x, w_pack)
    out = jax.block_until_ready(out)

    ref = reference_forward(x, params)
    assert out.shape == (B,), out.shape
    assert jnp.allclose(out, ref, atol=1e-5), (out, ref)
    print("KERNEL_OK")
</pallas_src>

<mosaic_0001>
module attributes {stable_mosaic.version = 11 : i64} {
  func.func @bilstm_kernel(%arg0: memref<2x24xf32, #tpu.memory_space<vmem>>, %arg1: memref<32x24xf32, #tpu.memory_space<vmem>>, %arg2: memref<2x1xf32, #tpu.memory_space<vmem>>) attributes {dimension_semantics = [], scalar_prefetch = 0 : i64, scratch_operands = 0 : i64, tpu.core_type = #tpu.core_type<tc>} {
    %c0 = arith.constant 0 : index
    %c0_0 = arith.constant 0 : index
    %0 = vector.load %arg1[%c0, %c0_0] : memref<32x24xf32, #tpu.memory_space<vmem>>, vector<1x24xf32>
    %1 = vector.shape_cast %0 : vector<1x24xf32> to vector<1x24xf32>
    %2 = vector.broadcast %1 : vector<1x24xf32> to vector<2x24xf32>
    %c1 = arith.constant 1 : index
    %c0_1 = arith.constant 0 : index
    %3 = vector.load %arg1[%c1, %c0_1] : memref<32x24xf32, #tpu.memory_space<vmem>>, vector<1x24xf32>
    %4 = vector.shape_cast %3 : vector<1x24xf32> to vector<1x24xf32>
    %5 = vector.broadcast %4 : vector<1x24xf32> to vector<2x24xf32>
    %c2 = arith.constant 2 : index
    %c0_2 = arith.constant 0 : index
    %6 = vector.load %arg1[%c2, %c0_2] : memref<32x24xf32, #tpu.memory_space<vmem>>, vector<1x24xf32>
    %7 = vector.shape_cast %6 : vector<1x24xf32> to vector<1x24xf32>
    %8 = vector.broadcast %7 : vector<1x24xf32> to vector<2x24xf32>
    %c3 = arith.constant 3 : index
    %c0_3 = arith.constant 0 : index
    %9 = vector.load %arg1[%c3, %c0_3] : memref<32x24xf32, #tpu.memory_space<vmem>>, vector<1x24xf32>
    %10 = vector.shape_cast %9 : vector<1x24xf32> to vector<1x24xf32>
    %11 = vector.broadcast %10 : vector<1x24xf32> to vector<2x24xf32>
    %c4 = arith.constant 4 : index
    %c0_4 = arith.constant 0 : index
    %12 = vector.load %arg1[%c4, %c0_4] : memref<32x24xf32, #tpu.memory_space<vmem>>, vector<1x24xf32>
    %13 = vector.shape_cast %12 : vector<1x24xf32> to vector<1x24xf32>
    %14 = vector.broadcast %13 : vector<1x24xf32> to vector<2x24xf32>
    %c5 = arith.constant 5 : index
    %c0_5 = arith.constant 0 : index
    %15 = vector.load %arg1[%c5, %c0_5] : memref<32x24xf32, #tpu.memory_space<vmem>>, vector<1x24xf32>
    %16 = vector.shape_cast %15 : vector<1x24xf32> to vector<1x24xf32>
    %17 = vector.broadcast %16 : vector<1x24xf32> to vector<2x24xf32>
    %c6 = arith.constant 6 : index
    %c0_6 = arith.constant 0 : index
    %18 = vector.load %arg1[%c6, %c0_6] : memref<32x24xf32, #tpu.memory_space<vmem>>, vector<1x24xf32>
    %19 = vector.shape_cast %18 : vector<1x24xf32> to vector<1x24xf32>
    %20 = vector.broadcast %19 : vector<1x24xf32> to vector<2x24xf32>
    %c7 = arith.constant 7 : index
    %c0_7 = arith.constant 0 : index
    %21 = vector.load %arg1[%c7, %c0_7] : memref<32x24xf32, #tpu.memory_space<vmem>>, vector<1x24xf32>
    %22 = vector.shape_cast %21 : vector<1x24xf32> to vector<1x24xf32>
    %23 = vector.broadcast %22 : vector<1x24xf32> to vector<2x24xf32>
    %c8 = arith.constant 8 : index
    %c0_8 = arith.constant 0 : index
    %24 = vector.load %arg1[%c8, %c0_8] : memref<32x24xf32, #tpu.memory_space<vmem>>, vector<1x24xf32>
    %25 = vector.shape_cast %24 : vector<1x24xf32> to vector<1x24xf32>
    %26 = vector.broadcast %25 : vector<1x24xf32> to vector<2x24xf32>
    %c9 = arith.constant 9 : index
    %c0_9 = arith.constant 0 : index
    %27 = vector.load %arg1[%c9, %c0_9] : memref<32x24xf32, #tpu.memory_space<vmem>>, vector<1x24xf32>
    %28 = vector.shape_cast %27 : vector<1x24xf32> to vector<1x24xf32>
    %29 = vector.broadcast %28 : vector<1x24xf32> to vector<2x24xf32>
    %c10 = arith.constant 10 : index
    %c0_10 = arith.constant 0 : index
    %30 = vector.load %arg1[%c10, %c0_10] : memref<32x24xf32, #tpu.memory_space<vmem>>, vector<1x24xf32>
    %31 = vector.shape_cast %30 : vector<1x24xf32> to vector<1x24xf32>
    %32 = vector.broadcast %31 : vector<1x24xf32> to vector<2x24xf32>
    %c11 = arith.constant 11 : index
    %c0_11 = arith.constant 0 : index
    %33 = vector.load %arg1[%c11, %c0_11] : memref<32x24xf32, #tpu.memory_space<vmem>>, vector<1x24xf32>
    %34 = vector.shape_cast %33 : vector<1x24xf32> to vector<1x24xf32>
    %35 = vector.broadcast %34 : vector<1x24xf32> to vector<2x24xf32>
    %c12 = arith.constant 12 : index
    %c0_12 = arith.constant 0 : index
    %36 = vector.load %arg1[%c12, %c0_12] : memref<32x24xf32, #tpu.memory_space<vmem>>, vector<1x24xf32>
    %37 = vector.shape_cast %36 : vector<1x24xf32> to vector<1x24xf32>
    %38 = vector.broadcast %37 : vector<1x24xf32> to vector<2x24xf32>
    %c13 = arith.constant 13 : index
    %c0_13 = arith.constant 0 : index
    %39 = vector.load %arg1[%c13, %c0_13] : memref<32x24xf32, #tpu.memory_space<vmem>>, vector<1x24xf32>
    %40 = vector.shape_cast %39 : vector<1x24xf32> to vector<1x24xf32>
    %41 = vector.broadcast %40 : vector<1x24xf32> to vector<2x24xf32>
    %c14 = arith.constant 14 : index
    %c0_14 = arith.constant 0 : index
    %42 = vector.load %arg1[%c14, %c0_14] : memref<32x24xf32, #tpu.memory_space<vmem>>, vector<1x24xf32>
    %43 = vector.shape_cast %42 : vector<1x24xf32> to vector<1x24xf32>
    %44 = vector.broadcast %43 : vector<1x24xf32> to vector<2x24xf32>
    %c15 = arith.constant 15 : index
    %c0_15 = arith.constant 0 : index
    %45 = vector.load %arg1[%c15, %c0_15] : memref<32x24xf32, #tpu.memory_space<vmem>>, vector<1x24xf32>
    %46 = vector.shape_cast %45 : vector<1x24xf32> to vector<1x24xf32>
    %47 = vector.broadcast %46 : vector<1x24xf32> to vector<2x24xf32>
    %c16 = arith.constant 16 : index
    %c0_16 = arith.constant 0 : index
    %48 = vector.load %arg1[%c16, %c0_16] : memref<32x24xf32, #tpu.memory_space<vmem>>, vector<1x24xf32>
    %49 = vector.shape_cast %48 : vector<1x24xf32> to vector<1x24xf32>
    %50 = vector.broadcast %49 : vector<1x24xf32> to vector<2x24xf32>
    %c17 = arith.constant 17 : index
    %c0_17 = arith.constant 0 : index
    %51 = vector.load %arg1[%c17, %c0_17] : memref<32x24xf32, #tpu.memory_space<vmem>>, vector<1x24xf32>
    %52 = vector.shape_cast %51 : vector<1x24xf32> to vector<1x24xf32>
    %53 = vector.broadcast %52 : vector<1x24xf32> to vector<2x24xf32>
    %c18 = arith.constant 18 : index
    %c0_18 = arith.constant 0 : index
    %54 = vector.load %arg1[%c18, %c0_18] : memref<32x24xf32, #tpu.memory_space<vmem>>, vector<1x24xf32>
    %55 = vector.shape_cast %54 : vector<1x24xf32> to vector<1x24xf32>
    %56 = vector.broadcast %55 : vector<1x24xf32> to vector<2x24xf32>
    %c19 = arith.constant 19 : index
    %c0_19 = arith.constant 0 : index
    %57 = vector.load %arg1[%c19, %c0_19] : memref<32x24xf32, #tpu.memory_space<vmem>>, vector<1x24xf32>
    %58 = vector.shape_cast %57 : vector<1x24xf32> to vector<1x24xf32>
    %59 = vector.broadcast %58 : vector<1x24xf32> to vector<2x24xf32>
    %c20 = arith.constant 20 : index
    %c0_20 = arith.constant 0 : index
    %60 = vector.load %arg1[%c20, %c0_20] : memref<32x24xf32, #tpu.memory_space<vmem>>, vector<1x24xf32>
    %61 = vector.shape_cast %60 : vector<1x24xf32> to vector<1x24xf32>
    %62 = vector.broadcast %61 : vector<1x24xf32> to vector<2x24xf32>
    %c21 = arith.constant 21 : index
    %c0_21 = arith.constant 0 : index
    %63 = vector.load %arg1[%c21, %c0_21] : memref<32x24xf32, #tpu.memory_space<vmem>>, vector<1x24xf32>
    %64 = vector.shape_cast %63 : vector<1x24xf32> to vector<1x24xf32>
    %65 = vector.broadcast %64 : vector<1x24xf32> to vector<2x24xf32>
    %c22 = arith.constant 22 : index
    %c0_22 = arith.constant 0 : index
    %66 = vector.load %arg1[%c22, %c0_22] : memref<32x24xf32, #tpu.memory_space<vmem>>, vector<1x24xf32>
    %67 = vector.shape_cast %66 : vector<1x24xf32> to vector<1x24xf32>
    %68 = vector.broadcast %67 : vector<1x24xf32> to vector<2x24xf32>
    %c23 = arith.constant 23 : index
    %c0_23 = arith.constant 0 : index
    %69 = vector.load %arg1[%c23, %c0_23] : memref<32x24xf32, #tpu.memory_space<vmem>>, vector<1x24xf32>
    %70 = vector.shape_cast %69 : vector<1x24xf32> to vector<1x24xf32>
    %71 = vector.broadcast %70 : vector<1x24xf32> to vector<2x24xf32>
    %c24 = arith.constant 24 : index
    %c0_24 = arith.constant 0 : index
    %72 = vector.load %arg1[%c24, %c0_24] : memref<32x24xf32, #tpu.memory_space<vmem>>, vector<1x24xf32>
    %73 = vector.shape_cast %72 : vector<1x24xf32> to vector<1x24xf32>
    %74 = vector.broadcast %73 : vector<1x24xf32> to vector<2x24xf32>
    %c25 = arith.constant 25 : index
    %c0_25 = arith.constant 0 : index
    %75 = vector.load %arg1[%c25, %c0_25] : memref<32x24xf32, #tpu.memory_space<vmem>>, vector<1x24xf32>
    %76 = vector.shape_cast %75 : vector<1x24xf32> to vector<1x24xf32>
    %77 = vector.broadcast %76 : vector<1x24xf32> to vector<2x24xf32>
    %c26 = arith.constant 26 : index
    %c0_26 = arith.constant 0 : index
    %78 = vector.load %arg1[%c26, %c0_26] : memref<32x24xf32, #tpu.memory_space<vmem>>, vector<1x24xf32>
    %79 = vector.shape_cast %78 : vector<1x24xf32> to vector<1x24xf32>
    %80 = vector.broadcast %79 : vector<1x24xf32> to vector<2x24xf32>
    %c27 = arith.constant 27 : index
    %c0_27 = arith.constant 0 : index
    %81 = vector.load %arg1[%c27, %c0_27] : memref<32x24xf32, #tpu.memory_space<vmem>>, vector<1x24xf32>
    %82 = vector.shape_cast %81 : vector<1x24xf32> to vector<1x24xf32>
    %83 = vector.broadcast %82 : vector<1x24xf32> to vector<2x24xf32>
    %c28 = arith.constant 28 : index
    %c0_28 = arith.constant 0 : index
    %84 = vector.load %arg1[%c28, %c0_28] : memref<32x24xf32, #tpu.memory_space<vmem>>, vector<1x24xf32>
    %85 = vector.shape_cast %84 : vector<1x24xf32> to vector<1x24xf32>
    %86 = vector.broadcast %85 : vector<1x24xf32> to vector<2x24xf32>
    %c29 = arith.constant 29 : index
    %c0_29 = arith.constant 0 : index
    %87 = vector.load %arg1[%c29, %c0_29] : memref<32x24xf32, #tpu.memory_space<vmem>>, vector<1x24xf32>
    %88 = vector.shape_cast %87 : vector<1x24xf32> to vector<1x24xf32>
    %89 = vector.broadcast %88 : vector<1x24xf32> to vector<2x24xf32>
    %c30 = arith.constant 30 : index
    %c0_30 = arith.constant 0 : index
    %90 = vector.load %arg1[%c30, %c0_30] : memref<32x24xf32, #tpu.memory_space<vmem>>, vector<1x24xf32>
    %c0_31 = arith.constant 0 : index
    %c0_32 = arith.constant 0 : index
    %91 = vector.load %arg0[%c0_31, %c0_32] : memref<2x24xf32, #tpu.memory_space<vmem>>, vector<2x24xf32>
    %cst = arith.constant 0.000000e+00 : f32
    %92 = vector.broadcast %cst : f32 to vector<2x6xf32>
    %93 = vector.extract_strided_slice %91 {offsets = [0, 0], sizes = [2, 1], strides = [1, 1]} : vector<2x24xf32> to vector<2x1xf32>
    %94 = vector.broadcast %93 : vector<2x1xf32> to vector<2x24xf32>
    %95 = arith.mulf %94, %5 : vector<2x24xf32>
    %96 = arith.addf %2, %95 : vector<2x24xf32>
    %97 = vector.extract_strided_slice %91 {offsets = [0, 21], sizes = [2, 1], strides = [1, 1]} : vector<2x24xf32> to vector<2x1xf32>
    %98 = vector.broadcast %97 : vector<2x1xf32> to vector<2x24xf32>
    %99 = arith.mulf %98, %14 : vector<2x24xf32>
    %100 = arith.addf %96, %99 : vector<2x24xf32>
    %101 = vector.extract_strided_slice %91 {offsets = [0, 1], sizes = [2, 1], strides = [1, 1]} : vector<2x24xf32> to vector<2x1xf32>
    %102 = vector.broadcast %101 : vector<2x1xf32> to vector<2x24xf32>
    %103 = arith.mulf %102, %8 : vector<2x24xf32>
    %104 = arith.addf %100, %103 : vector<2x24xf32>
    %105 = vector.extract_strided_slice %91 {offsets = [0, 22], sizes = [2, 1], strides = [1, 1]} : vector<2x24xf32> to vector<2x1xf32>
    %106 = vector.broadcast %105 : vector<2x1xf32> to vector<2x24xf32>
    %107 = arith.mulf %106, %17 : vector<2x24xf32>
    %108 = arith.addf %104, %107 : vector<2x24xf32>
    %109 = vector.extract_strided_slice %91 {offsets = [0, 2], sizes = [2, 1], strides = [1, 1]} : vector<2x24xf32> to vector<2x1xf32>
    %110 = vector.broadcast %109 : vector<2x1xf32> to vector<2x24xf32>
    %111 = arith.mulf %110, %11 : vector<2x24xf32>
    %112 = arith.addf %108, %111 : vector<2x24xf32>
    %113 = vector.extract_strided_slice %91 {offsets = [0, 23], sizes = [2, 1], strides = [1, 1]} : vector<2x24xf32> to vector<2x1xf32>
    %114 = vector.broadcast %113 : vector<2x1xf32> to vector<2x24xf32>
    %115 = arith.mulf %114, %20 : vector<2x24xf32>
    %116 = arith.addf %112, %115 : vector<2x24xf32>
    %117 = math.tanh %116 : vector<2x24xf32>
    %118 = vector.extract_strided_slice %117 {offsets = [0, 0], sizes = [2, 18], strides = [1, 1]} : vector<2x24xf32> to vector<2x18xf32>
    %cst_33 = arith.constant 5.000000e-01 : f32
    %119 = vector.broadcast %cst_33 : f32 to vector<2x18xf32>
    %120 = arith.mulf %119, %118 : vector<2x18xf32>
    %cst_34 = arith.constant 5.000000e-01 : f32
    %121 = vector.broadcast %cst_34 : f32 to vector<2x18xf32>
    %122 = arith.addf %120, %121 : vector<2x18xf32>
    %123 = vector.extract_strided_slice %117 {offsets = [0, 18], sizes = [2, 6], strides = [1, 1]} : vector<2x24xf32> to vector<2x6xf32>
    %124 = vector.extract_strided_slice %122 {offsets = [0, 6], sizes = [2, 6], strides = [1, 1]} : vector<2x18xf32> to vector<2x6xf32>
    %125 = arith.mulf %124, %92 : vector<2x6xf32>
    %126 = vector.extract_strided_slice %122 {offsets = [0, 0], sizes = [2, 6], strides = [1, 1]} : vector<2x18xf32> to vector<2x6xf32>
    %127 = arith.mulf %126, %123 : vector<2x6xf32>
    %128 = arith.addf %125, %127 : vector<2x6xf32>
    %129 = vector.extract_strided_slice %122 {offsets = [0, 12], sizes = [2, 6], strides = [1, 1]} : vector<2x18xf32> to vector<2x6xf32>
    %130 = math.tanh %128 : vector<2x6xf32>
    %131 = arith.mulf %129, %130 : vector<2x6xf32>
    %132 = vector.extract_strided_slice %131 {offsets = [0, 0], sizes = [2, 3], strides = [1, 1]} : vector<2x6xf32> to vector<2x3xf32>
    %133 = vector.extract_strided_slice %131 {offsets = [0, 3], sizes = [2, 3], strides = [1, 1]} : vector<2x6xf32> to vector<2x3xf32>
    %134 = vector.extract_strided_slice %91 {offsets = [0, 3], sizes = [2, 1], strides = [1, 1]} : vector<2x24xf32> to vector<2x1xf32>
    %135 = vector.broadcast %134 : vector<2x1xf32> to vector<2x24xf32>
    %136 = arith.mulf %135, %5 : vector<2x24xf32>
    %137 = arith.addf %2, %136 : vector<2x24xf32>
    %138 = vector.extract_strided_slice %91 {offsets = [0, 18], sizes = [2, 1], strides = [1, 1]} : vector<2x24xf32> to vector<2x1xf32>
    %139 = vector.broadcast %138 : vector<2x1xf32> to vector<2x24xf32>
    %140 = arith.mulf %139, %14 : vector<2x24xf32>
    %141 = arith.addf %137, %140 : vector<2x24xf32>
    %142 = vector.extract_strided_slice %91 {offsets = [0, 4], sizes = [2, 1], strides = [1, 1]} : vector<2x24xf32> to vector<2x1xf32>
    %143 = vector.broadcast %142 : vector<2x1xf32> to vector<2x24xf32>
    %144 = arith.mulf %143, %8 : vector<2x24xf32>
    %145 = arith.addf %141, %144 : vector<2x24xf32>
    %146 = vector.extract_strided_slice %91 {offsets = [0, 19], sizes = [2, 1], strides = [1, 1]} : vector<2x24xf32> to vector<2x1xf32>
    %147 = vector.broadcast %146 : vector<2x1xf32> to vector<2x24xf32>
    %148 = arith.mulf %147, %17 : vector<2x24xf32>
    %149 = arith.addf %145, %148 : vector<2x24xf32>
    %150 = vector.extract_strided_slice %91 {offsets = [0, 5], sizes = [2, 1], strides = [1, 1]} : vector<2x24xf32> to vector<2x1xf32>
    %151 = vector.broadcast %150 : vector<2x1xf32> to vector<2x24xf32>
    %152 = arith.mulf %151, %11 : vector<2x24xf32>
    %153 = arith.addf %149, %152 : vector<2x24xf32>
    %154 = vector.extract_strided_slice %91 {offsets = [0, 20], sizes = [2, 1], strides = [1, 1]} : vector<2x24xf32> to vector<2x1xf32>
    %155 = vector.broadcast %154 : vector<2x1xf32> to vector<2x24xf32>
    %156 = arith.mulf %155, %20 : vector<2x24xf32>
    %157 = arith.addf %153, %156 : vector<2x24xf32>
    %158 = vector.extract_strided_slice %131 {offsets = [0, 0], sizes = [2, 1], strides = [1, 1]} : vector<2x6xf32> to vector<2x1xf32>
    %159 = vector.broadcast %158 : vector<2x1xf32> to vector<2x24xf32>
    %160 = arith.mulf %159, %23 : vector<2x24xf32>
    %161 = arith.addf %157, %160 : vector<2x24xf32>
    %162 = vector.extract_strided_slice %131 {offsets = [0, 1], sizes = [2, 1], strides = [1, 1]} : vector<2x6xf32> to vector<2x1xf32>
    %163 = vector.broadcast %162 : vector<2x1xf32> to vector<2x24xf32>
    %164 = arith.mulf %163, %26 : vector<2x24xf32>
    %165 = arith.addf %161, %164 : vector<2x24xf32>
    %166 = vector.extract_strided_slice %131 {offsets = [0, 2], sizes = [2, 1], strides = [1, 1]} : vector<2x6xf32> to vector<2x1xf32>
    %167 = vector.broadcast %166 : vector<2x1xf32> to vector<2x24xf32>
    %168 = arith.mulf %167, %29 : vector<2x24xf32>
    %169 = arith.addf %165, %168 : vector<2x24xf32>
    %170 = vector.extract_strided_slice %131 {offsets = [0, 3], sizes = [2, 1], strides = [1, 1]} : vector<2x6xf32> to vector<2x1xf32>
    %171 = vector.broadcast %170 : vector<2x1xf32> to vector<2x24xf32>
    %172 = arith.mulf %171, %32 : vector<2x24xf32>
    %173 = arith.addf %169, %172 : vector<2x24xf32>
    %174 = vector.extract_strided_slice %131 {offsets = [0, 4], sizes = [2, 1], strides = [1, 1]} : vector<2x6xf32> to vector<2x1xf32>
    %175 = vector.broadcast %174 : vector<2x1xf32> to vector<2x24xf32>
    %176 = arith.mulf %175, %35 : vector<2x24xf32>
    %177 = arith.addf %173, %176 : vector<2x24xf32>
    %178 = vector.extract_strided_slice %131 {offsets = [0, 5], sizes = [2, 1], strides = [1, 1]} : vector<2x6xf32> to vector<2x1xf32>
    %179 = vector.broadcast %178 : vector<2x1xf32> to vector<2x24xf32>
    %180 = arith.mulf %179, %38 : vector<2x24xf32>
    %181 = arith.addf %177, %180 : vector<2x24xf32>
    %182 = math.tanh %181 : vector<2x24xf32>
    %183 = vector.extract_strided_slice %182 {offsets = [0, 0], sizes = [2, 18], strides = [1, 1]} : vector<2x24xf32> to vector<2x18xf32>
    %cst_35 = arith.constant 5.000000e-01 : f32
    %184 = vector.broadcast %cst_35 : f32 to vector<2x18xf32>
    %185 = arith.mulf %184, %183 : vector<2x18xf32>
    %cst_36 = arith.constant 5.000000e-01 : f32
    %186 = vector.broadcast %cst_36 : f32 to vector<2x18xf32>
    %187 = arith.addf %185, %186 : vector<2x18xf32>
    %188 = vector.extract_strided_slice %182 {offsets = [0, 18], sizes = [2, 6], strides = [1, 1]} : vector<2x24xf32> to vector<2x6xf32>
    %189 = vector.extract_strided_slice %187 {offsets = [0, 6], sizes = [2, 6], strides = [1, 1]} : vector<2x18xf32> to vector<2x6xf32>
    %190 = arith.mulf %189, %128 : vector<2x6xf32>
    %191 = vector.extract_strided_slice %187 {offsets = [0, 0], sizes = [2, 6], strides = [1, 1]} : vector<2x18xf32> to vector<2x6xf32>
    %192 = arith.mulf %191, %188 : vector<2x6xf32>
    %193 = arith.addf %190, %192 : vector<2x6xf32>
    %194 = vector.extract_strided_slice %187 {offsets = [0, 12], sizes = [2, 6], strides = [1, 1]} : vector<2x18xf32> to vector<2x6xf32>
    %195 = math.tanh %193 : vector<2x6xf32>
    %196 = arith.mulf %194, %195 : vector<2x6xf32>
    %197 = vector.extract_strided_slice %196 {offsets = [0, 0], sizes = [2, 3], strides = [1, 1]} : vector<2x6xf32> to vector<2x3xf32>
    %198 = vector.extract_strided_slice %196 {offsets = [0, 3], sizes = [2, 3], strides = [1, 1]} : vector<2x6xf32> to vector<2x3xf32>
    %199 = vector.extract_strided_slice %91 {offsets = [0, 6], sizes = [2, 1], strides = [1, 1]} : vector<2x24xf32> to vector<2x1xf32>
    %200 = vector.broadcast %199 : vector<2x1xf32> to vector<2x24xf32>
    %201 = arith.mulf %200, %5 : vector<2x24xf32>
    %202 = arith.addf %2, %201 : vector<2x24xf32>
    %203 = vector.extract_strided_slice %91 {offsets = [0, 15], sizes = [2, 1], strides = [1, 1]} : vector<2x24xf32> to vector<2x1xf32>
    %204 = vector.broadcast %203 : vector<2x1xf32> to vector<2x24xf32>
    %205 = arith.mulf %204, %14 : vector<2x24xf32>
    %206 = arith.addf %202, %205 : vector<2x24xf32>
    %207 = vector.extract_strided_slice %91 {offsets = [0, 7], sizes = [2, 1], strides = [1, 1]} : vector<2x24xf32> to vector<2x1xf32>
    %208 = vector.broadcast %207 : vector<2x1xf32> to vector<2x24xf32>
    %209 = arith.mulf %208, %8 : vector<2x24xf32>
    %210 = arith.addf %206, %209 : vector<2x24xf32>
    %211 = vector.extract_strided_slice %91 {offsets = [0, 16], sizes = [2, 1], strides = [1, 1]} : vector<2x24xf32> to vector<2x1xf32>
    %212 = vector.broadcast %211 : vector<2x1xf32> to vector<2x24xf32>
    %213 = arith.mulf %212, %17 : vector<2x24xf32>
    %214 = arith.addf %210, %213 : vector<2x24xf32>
    %215 = vector.extract_strided_slice %91 {offsets = [0, 8], sizes = [2, 1], strides = [1, 1]} : vector<2x24xf32> to vector<2x1xf32>
    %216 = vector.broadcast %215 : vector<2x1xf32> to vector<2x24xf32>
    %217 = arith.mulf %216, %11 : vector<2x24xf32>
    %218 = arith.addf %214, %217 : vector<2x24xf32>
    %219 = vector.extract_strided_slice %91 {offsets = [0, 17], sizes = [2, 1], strides = [1, 1]} : vector<2x24xf32> to vector<2x1xf32>
    %220 = vector.broadcast %219 : vector<2x1xf32> to vector<2x24xf32>
    %221 = arith.mulf %220, %20 : vector<2x24xf32>
    %222 = arith.addf %218, %221 : vector<2x24xf32>
    %223 = vector.extract_strided_slice %196 {offsets = [0, 0], sizes = [2, 1], strides = [1, 1]} : vector<2x6xf32> to vector<2x1xf32>
    %224 = vector.broadcast %223 : vector<2x1xf32> to vector<2x24xf32>
    %225 = arith.mulf %224, %23 : vector<2x24xf32>
    %226 = arith.addf %222, %225 : vector<2x24xf32>
    %227 = vector.extract_strided_slice %196 {offsets = [0, 1], sizes = [2, 1], strides = [1, 1]} : vector<2x6xf32> to vector<2x1xf32>
    %228 = vector.broadcast %227 : vector<2x1xf32> to vector<2x24xf32>
    %229 = arith.mulf %228, %26 : vector<2x24xf32>
    %230 = arith.addf %226, %229 : vector<2x24xf32>
    %231 = vector.extract_strided_slice %196 {offsets = [0, 2], sizes = [2, 1], strides = [1, 1]} : vector<2x6xf32> to vector<2x1xf32>
    %232 = vector.broadcast %231 : vector<2x1xf32> to vector<2x24xf32>
    %233 = arith.mulf %232, %29 : vector<2x24xf32>
    %234 = arith.addf %230, %233 : vector<2x24xf32>
    %235 = vector.extract_strided_slice %196 {offsets = [0, 3], sizes = [2, 1], strides = [1, 1]} : vector<2x6xf32> to vector<2x1xf32>
    %236 = vector.broadcast %235 : vector<2x1xf32> to vector<2x24xf32>
    %237 = arith.mulf %236, %32 : vector<2x24xf32>
    %238 = arith.addf %234, %237 : vector<2x24xf32>
    %239 = vector.extract_strided_slice %196 {offsets = [0, 4], sizes = [2, 1], strides = [1, 1]} : vector<2x6xf32> to vector<2x1xf32>
    %240 = vector.broadcast %239 : vector<2x1xf32> to vector<2x24xf32>
    %241 = arith.mulf %240, %35 : vector<2x24xf32>
    %242 = arith.addf %238, %241 : vector<2x24xf32>
    %243 = vector.extract_strided_slice %196 {offsets = [0, 5], sizes = [2, 1], strides = [1, 1]} : vector<2x6xf32> to vector<2x1xf32>
    %244 = vector.broadcast %243 : vector<2x1xf32> to vector<2x24xf32>
    %245 = arith.mulf %244, %38 : vector<2x24xf32>
    %246 = arith.addf %242, %245 : vector<2x24xf32>
    %247 = math.tanh %246 : vector<2x24xf32>
    %248 = vector.extract_strided_slice %247 {offsets = [0, 0], sizes = [2, 18], strides = [1, 1]} : vector<2x24xf32> to vector<2x18xf32>
    %cst_37 = arith.constant 5.000000e-01 : f32
    %249 = vector.broadcast %cst_37 : f32 to vector<2x18xf32>
    %250 = arith.mulf %249, %248 : vector<2x18xf32>
    %cst_38 = arith.constant 5.000000e-01 : f32
    %251 = vector.broadcast %cst_38 : f32 to vector<2x18xf32>
    %252 = arith.addf %250, %251 : vector<2x18xf32>
    %253 = vector.extract_strided_slice %247 {offsets = [0, 18], sizes = [2, 6], strides = [1, 1]} : vector<2x24xf32> to vector<2x6xf32>
    %254 = vector.extract_strided_slice %252 {offsets = [0, 6], sizes = [2, 6], strides = [1, 1]} : vector<2x18xf32> to vector<2x6xf32>
    %255 = arith.mulf %254, %193 : vector<2x6xf32>
    %256 = vector.extract_strided_slice %252 {offsets = [0, 0], sizes = [2, 6], strides = [1, 1]} : vector<2x18xf32> to vector<2x6xf32>
    %257 = arith.mulf %256, %253 : vector<2x6xf32>
    %258 = arith.addf %255, %257 : vector<2x6xf32>
    %259 = vector.extract_strided_slice %252 {offsets = [0, 12], sizes = [2, 6], strides = [1, 1]} : vector<2x18xf32> to vector<2x6xf32>
    %260 = math.tanh %258 : vector<2x6xf32>
    %261 = arith.mulf %259, %260 : vector<2x6xf32>
    %262 = vector.extract_strided_slice %261 {offsets = [0, 0], sizes = [2, 3], strides = [1, 1]} : vector<2x6xf32> to vector<2x3xf32>
    %263 = vector.extract_strided_slice %261 {offsets = [0, 3], sizes = [2, 3], strides = [1, 1]} : vector<2x6xf32> to vector<2x3xf32>
    %264 = vector.extract_strided_slice %91 {offsets = [0, 9], sizes = [2, 1], strides = [1, 1]} : vector<2x24xf32> to vector<2x1xf32>
    %265 = vector.broadcast %264 : vector<2x1xf32> to vector<2x24xf32>
    %266 = arith.mulf %265, %5 : vector<2x24xf32>
    %267 = arith.addf %2, %266 : vector<2x24xf32>
    %268 = vector.extract_strided_slice %91 {offsets = [0, 12], sizes = [2, 1], strides = [1, 1]} : vector<2x24xf32> to vector<2x1xf32>
    %269 = vector.broadcast %268 : vector<2x1xf32> to vector<2x24xf32>
    %270 = arith.mulf %269, %14 : vector<2x24xf32>
    %271 = arith.addf %267, %270 : vector<2x24xf32>
    %272 = vector.extract_strided_slice %91 {offsets = [0, 10], sizes = [2, 1], strides = [1, 1]} : vector<2x24xf32> to vector<2x1xf32>
    %273 = vector.broadcast %272 : vector<2x1xf32> to vector<2x24xf32>
    %274 = arith.mulf %273, %8 : vector<2x24xf32>
    %275 = arith.addf %271, %274 : vector<2x24xf32>
    %276 = vector.extract_strided_slice %91 {offsets = [0, 13], sizes = [2, 1], strides = [1, 1]} : vector<2x24xf32> to vector<2x1xf32>
    %277 = vector.broadcast %276 : vector<2x1xf32> to vector<2x24xf32>
    %278 = arith.mulf %277, %17 : vector<2x24xf32>
    %279 = arith.addf %275, %278 : vector<2x24xf32>
    %280 = vector.extract_strided_slice %91 {offsets = [0, 11], sizes = [2, 1], strides = [1, 1]} : vector<2x24xf32> to vector<2x1xf32>
    %281 = vector.broadcast %280 : vector<2x1xf32> to vector<2x24xf32>
    %282 = arith.mulf %281, %11 : vector<2x24xf32>
    %283 = arith.addf %279, %282 : vector<2x24xf32>
    %284 = vector.extract_strided_slice %91 {offsets = [0, 14], sizes = [2, 1], strides = [1, 1]} : vector<2x24xf32> to vector<2x1xf32>
    %285 = vector.broadcast %284 : vector<2x1xf32> to vector<2x24xf32>
    %286 = arith.mulf %285, %20 : vector<2x24xf32>
    %287 = arith.addf %283, %286 : vector<2x24xf32>
    %288 = vector.extract_strided_slice %261 {offsets = [0, 0], sizes = [2, 1], strides = [1, 1]} : vector<2x6xf32> to vector<2x1xf32>
    %289 = vector.broadcast %288 : vector<2x1xf32> to vector<2x24xf32>
    %290 = arith.mulf %289, %23 : vector<2x24xf32>
    %291 = arith.addf %287, %290 : vector<2x24xf32>
    %292 = vector.extract_strided_slice %261 {offsets = [0, 1], sizes = [2, 1], strides = [1, 1]} : vector<2x6xf32> to vector<2x1xf32>
    %293 = vector.broadcast %292 : vector<2x1xf32> to vector<2x24xf32>
    %294 = arith.mulf %293, %26 : vector<2x24xf32>
    %295 = arith.addf %291, %294 : vector<2x24xf32>
    %296 = vector.extract_strided_slice %261 {offsets = [0, 2], sizes = [2, 1], strides = [1, 1]} : vector<2x6xf32> to vector<2x1xf32>
    %297 = vector.broadcast %296 : vector<2x1xf32> to vector<2x24xf32>
    %298 = arith.mulf %297, %29 : vector<2x24xf32>
    %299 = arith.addf %295, %298 : vector<2x24xf32>
    %300 = vector.extract_strided_slice %261 {offsets = [0, 3], sizes = [2, 1], strides = [1, 1]} : vector<2x6xf32> to vector<2x1xf32>
    %301 = vector.broadcast %300 : vector<2x1xf32> to vector<2x24xf32>
    %302 = arith.mulf %301, %32 : vector<2x24xf32>
    %303 = arith.addf %299, %302 : vector<2x24xf32>
    %304 = vector.extract_strided_slice %261 {offsets = [0, 4], sizes = [2, 1], strides = [1, 1]} : vector<2x6xf32> to vector<2x1xf32>
    %305 = vector.broadcast %304 : vector<2x1xf32> to vector<2x24xf32>
    %306 = arith.mulf %305, %35 : vector<2x24xf32>
    %307 = arith.addf %303, %306 : vector<2x24xf32>
    %308 = vector.extract_strided_slice %261 {offsets = [0, 5], sizes = [2, 1], strides = [1, 1]} : vector<2x6xf32> to vector<2x1xf32>
    %309 = vector.broadcast %308 : vector<2x1xf32> to vector<2x24xf32>
    %310 = arith.mulf %309, %38 : vector<2x24xf32>
    %311 = arith.addf %307, %310 : vector<2x24xf32>
    %312 = math.tanh %311 : vector<2x24xf32>
    %313 = vector.extract_strided_slice %312 {offsets = [0, 0], sizes = [2, 18], strides = [1, 1]} : vector<2x24xf32> to vector<2x18xf32>
    %cst_39 = arith.constant 5.000000e-01 : f32
    %314 = vector.broadcast %cst_39 : f32 to vector<2x18xf32>
    %315 = arith.mulf %314, %313 : vector<2x18xf32>
    %cst_40 = arith.constant 5.000000e-01 : f32
    %316 = vector.broadcast %cst_40 : f32 to vector<2x18xf32>
    %317 = arith.addf %315, %316 : vector<2x18xf32>
    %318 = vector.extract_strided_slice %312 {offsets = [0, 18], sizes = [2, 6], strides = [1, 1]} : vector<2x24xf32> to vector<2x6xf32>
    %319 = vector.extract_strided_slice %317 {offsets = [0, 6], sizes = [2, 6], strides = [1, 1]} : vector<2x18xf32> to vector<2x6xf32>
    %320 = arith.mulf %319, %258 : vector<2x6xf32>
    %321 = vector.extract_strided_slice %317 {offsets = [0, 0], sizes = [2, 6], strides = [1, 1]} : vector<2x18xf32> to vector<2x6xf32>
    %322 = arith.mulf %321, %318 : vector<2x6xf32>
    %323 = arith.addf %320, %322 : vector<2x6xf32>
    %324 = vector.extract_strided_slice %317 {offsets = [0, 12], sizes = [2, 6], strides = [1, 1]} : vector<2x18xf32> to vector<2x6xf32>
    %325 = math.tanh %323 : vector<2x6xf32>
    %326 = arith.mulf %324, %325 : vector<2x6xf32>
    %327 = vector.extract_strided_slice %326 {offsets = [0, 0], sizes = [2, 3], strides = [1, 1]} : vector<2x6xf32> to vector<2x3xf32>
    %328 = vector.extract_strided_slice %326 {offsets = [0, 3], sizes = [2, 3], strides = [1, 1]} : vector<2x6xf32> to vector<2x3xf32>
    %329 = vector.extract_strided_slice %91 {offsets = [0, 12], sizes = [2, 1], strides = [1, 1]} : vector<2x24xf32> to vector<2x1xf32>
    %330 = vector.broadcast %329 : vector<2x1xf32> to vector<2x24xf32>
    %331 = arith.mulf %330, %5 : vector<2x24xf32>
    %332 = arith.addf %2, %331 : vector<2x24xf32>
    %333 = vector.extract_strided_slice %91 {offsets = [0, 9], sizes = [2, 1], strides = [1, 1]} : vector<2x24xf32> to vector<2x1xf32>
    %334 = vector.broadcast %333 : vector<2x1xf32> to vector<2x24xf32>
    %335 = arith.mulf %334, %14 : vector<2x24xf32>
    %336 = arith.addf %332, %335 : vector<2x24xf32>
    %337 = vector.extract_strided_slice %91 {offsets = [0, 13], sizes = [2, 1], strides = [1, 1]} : vector<2x24xf32> to vector<2x1xf32>
    %338 = vector.broadcast %337 : vector<2x1xf32> to vector<2x24xf32>
    %339 = arith.mulf %338, %8 : vector<2x24xf32>
    %340 = arith.addf %336, %339 : vector<2x24xf32>
    %341 = vector.extract_strided_slice %91 {offsets = [0, 10], sizes = [2, 1], strides = [1, 1]} : vector<2x24xf32> to vector<2x1xf32>
    %342 = vector.broadcast %341 : vector<2x1xf32> to vector<2x24xf32>
    %343 = arith.mulf %342, %17 : vector<2x24xf32>
    %344 = arith.addf %340, %343 : vector<2x24xf32>
    %345 = vector.extract_strided_slice %91 {offsets = [0, 14], sizes = [2, 1], strides = [1, 1]} : vector<2x24xf32> to vector<2x1xf32>
    %346 = vector.broadcast %345 : vector<2x1xf32> to vector<2x24xf32>
    %347 = arith.mulf %346, %11 : vector<2x24xf32>
    %348 = arith.addf %344, %347 : vector<2x24xf32>
    %349 = vector.extract_strided_slice %91 {offsets = [0, 11], sizes = [2, 1], strides = [1, 1]} : vector<2x24xf32> to vector<2x1xf32>
    %350 = vector.broadcast %349 : vector<2x1xf32> to vector<2x24xf32>
    %351 = arith.mulf %350, %20 : vector<2x24xf32>
    %352 = arith.addf %348, %351 : vector<2x24xf32>
    %353 = vector.extract_strided_slice %326 {offsets = [0, 0], sizes = [2, 1], strides = [1, 1]} : vector<2x6xf32> to vector<2x1xf32>
    %354 = vector.broadcast %353 : vector<2x1xf32> to vector<2x24xf32>
    %355 = arith.mulf %354, %23 : vector<2x24xf32>
    %356 = arith.addf %352, %355 : vector<2x24xf32>
    %357 = vector.extract_strided_slice %326 {offsets = [0, 1], sizes = [2, 1], strides = [1, 1]} : vector<2x6xf32> to vector<2x1xf32>
    %358 = vector.broadcast %357 : vector<2x1xf32> to vector<2x24xf32>
    %359 = arith.mulf %358, %26 : vector<2x24xf32>
    %360 = arith.addf %356, %359 : vector<2x24xf32>
    %361 = vector.extract_strided_slice %326 {offsets = [0, 2], sizes = [2, 1], strides = [1, 1]} : vector<2x6xf32> to vector<2x1xf32>
    %362 = vector.broadcast %361 : vector<2x1xf32> to vector<2x24xf32>
    %363 = arith.mulf %362, %29 : vector<2x24xf32>
    %364 = arith.addf %360, %363 : vector<2x24xf32>
    %365 = vector.extract_strided_slice %326 {offsets = [0, 3], sizes = [2, 1], strides = [1, 1]} : vector<2x6xf32> to vector<2x1xf32>
    %366 = vector.broadcast %365 : vector<2x1xf32> to vector<2x24xf32>
    %367 = arith.mulf %366, %32 : vector<2x24xf32>
    %368 = arith.addf %364, %367 : vector<2x24xf32>
    %369 = vector.extract_strided_slice %326 {offsets = [0, 4], sizes = [2, 1], strides = [1, 1]} : vector<2x6xf32> to vector<2x1xf32>
    %370 = vector.broadcast %369 : vector<2x1xf32> to vector<2x24xf32>
    %371 = arith.mulf %370, %35 : vector<2x24xf32>
    %372 = arith.addf %368, %371 : vector<2x24xf32>
    %373 = vector.extract_strided_slice %326 {offsets = [0, 5], sizes = [2, 1], strides = [1, 1]} : vector<2x6xf32> to vector<2x1xf32>
    %374 = vector.broadcast %373 : vector<2x1xf32> to vector<2x24xf32>
    %375 = arith.mulf %374, %38 : vector<2x24xf32>
    %376 = arith.addf %372, %375 : vector<2x24xf32>
    %377 = math.tanh %376 : vector<2x24xf32>
    %378 = vector.extract_strided_slice %377 {offsets = [0, 0], sizes = [2, 18], strides = [1, 1]} : vector<2x24xf32> to vector<2x18xf32>
    %cst_41 = arith.constant 5.000000e-01 : f32
    %379 = vector.broadcast %cst_41 : f32 to vector<2x18xf32>
    %380 = arith.mulf %379, %378 : vector<2x18xf32>
    %cst_42 = arith.constant 5.000000e-01 : f32
    %381 = vector.broadcast %cst_42 : f32 to vector<2x18xf32>
    %382 = arith.addf %380, %381 : vector<2x18xf32>
    %383 = vector.extract_strided_slice %377 {offsets = [0, 18], sizes = [2, 6], strides = [1, 1]} : vector<2x24xf32> to vector<2x6xf32>
    %384 = vector.extract_strided_slice %382 {offsets = [0, 6], sizes = [2, 6], strides = [1, 1]} : vector<2x18xf32> to vector<2x6xf32>
    %385 = arith.mulf %384, %323 : vector<2x6xf32>
    %386 = vector.extract_strided_slice %382 {offsets = [0, 0], sizes = [2, 6], strides = [1, 1]} : vector<2x18xf32> to vector<2x6xf32>
    %387 = arith.mulf %386, %383 : vector<2x6xf32>
    %388 = arith.addf %385, %387 : vector<2x6xf32>
    %389 = vector.extract_strided_slice %382 {offsets = [0, 12], sizes = [2, 6], strides = [1, 1]} : vector<2x18xf32> to vector<2x6xf32>
    %390 = math.tanh %388 : vector<2x6xf32>
    %391 = arith.mulf %389, %390 : vector<2x6xf32>
    %392 = vector.extract_strided_slice %391 {offsets = [0, 0], sizes = [2, 3], strides = [1, 1]} : vector<2x6xf32> to vector<2x3xf32>
    %393 = vector.extract_strided_slice %391 {offsets = [0, 3], sizes = [2, 3], strides = [1, 1]} : vector<2x6xf32> to vector<2x3xf32>
    %394 = vector.extract_strided_slice %91 {offsets = [0, 15], sizes = [2, 1], strides = [1, 1]} : vector<2x24xf32> to vector<2x1xf32>
    %395 = vector.broadcast %394 : vector<2x1xf32> to vector<2x24xf32>
    %396 = arith.mulf %395, %5 : vector<2x24xf32>
    %397 = arith.addf %2, %396 : vector<2x24xf32>
    %398 = vector.extract_strided_slice %91 {offsets = [0, 6], sizes = [2, 1], strides = [1, 1]} : vector<2x24xf32> to vector<2x1xf32>
    %399 = vector.broadcast %398 : vector<2x1xf32> to vector<2x24xf32>
    %400 = arith.mulf %399, %14 : vector<2x24xf32>
    %401 = arith.addf %397, %400 : vector<2x24xf32>
    %402 = vector.extract_strided_slice %91 {offsets = [0, 16], sizes = [2, 1], strides = [1, 1]} : vector<2x24xf32> to vector<2x1xf32>
    %403 = vector.broadcast %402 : vector<2x1xf32> to vector<2x24xf32>
    %404 = arith.mulf %403, %8 : vector<2x24xf32>
    %405 = arith.addf %401, %404 : vector<2x24xf32>
    %406 = vector.extract_strided_slice %91 {offsets = [0, 7], sizes = [2, 1], strides = [1, 1]} : vector<2x24xf32> to vector<2x1xf32>
    %407 = vector.broadcast %406 : vector<2x1xf32> to vector<2x24xf32>
    %408 = arith.mulf %407, %17 : vector<2x24xf32>
    %409 = arith.addf %405, %408 : vector<2x24xf32>
    %410 = vector.extract_strided_slice %91 {offsets = [0, 17], sizes = [2, 1], strides = [1, 1]} : vector<2x24xf32> to vector<2x1xf32>
    %411 = vector.broadcast %410 : vector<2x1xf32> to vector<2x24xf32>
    %412 = arith.mulf %411, %11 : vector<2x24xf32>
    %413 = arith.addf %409, %412 : vector<2x24xf32>
    %414 = vector.extract_strided_slice %91 {offsets = [0, 8], sizes = [2, 1], strides = [1, 1]} : vector<2x24xf32> to vector<2x1xf32>
    %415 = vector.broadcast %414 : vector<2x1xf32> to vector<2x24xf32>
    %416 = arith.mulf %415, %20 : vector<2x24xf32>
    %417 = arith.addf %413, %416 : vector<2x24xf32>
    %418 = vector.extract_strided_slice %391 {offsets = [0, 0], sizes = [2, 1], strides = [1, 1]} : vector<2x6xf32> to vector<2x1xf32>
    %419 = vector.broadcast %418 : vector<2x1xf32> to vector<2x24xf32>
    %420 = arith.mulf %419, %23 : vector<2x24xf32>
    %421 = arith.addf %417, %420 : vector<2x24xf32>
    %422 = vector.extract_strided_slice %391 {offsets = [0, 1], sizes = [2, 1], strides = [1, 1]} : vector<2x6xf32> to vector<2x1xf32>
    %423 = vector.broadcast %422 : vector<2x1xf32> to vector<2x24xf32>
    %424 = arith.mulf %423, %26 : vector<2x24xf32>
    %425 = arith.addf %421, %424 : vector<2x24xf32>
    %426 = vector.extract_strided_slice %391 {offsets = [0, 2], sizes = [2, 1], strides = [1, 1]} : vector<2x6xf32> to vector<2x1xf32>
    %427 = vector.broadcast %426 : vector<2x1xf32> to vector<2x24xf32>
    %428 = arith.mulf %427, %29 : vector<2x24xf32>
    %429 = arith.addf %425, %428 : vector<2x24xf32>
    %430 = vector.extract_strided_slice %391 {offsets = [0, 3], sizes = [2, 1], strides = [1, 1]} : vector<2x6xf32> to vector<2x1xf32>
    %431 = vector.broadcast %430 : vector<2x1xf32> to vector<2x24xf32>
    %432 = arith.mulf %431, %32 : vector<2x24xf32>
    %433 = arith.addf %429, %432 : vector<2x24xf32>
    %434 = vector.extract_strided_slice %391 {offsets = [0, 4], sizes = [2, 1], strides = [1, 1]} : vector<2x6xf32> to vector<2x1xf32>
    %435 = vector.broadcast %434 : vector<2x1xf32> to vector<2x24xf32>
    %436 = arith.mulf %435, %35 : vector<2x24xf32>
    %437 = arith.addf %433, %436 : vector<2x24xf32>
    %438 = vector.extract_strided_slice %391 {offsets = [0, 5], sizes = [2, 1], strides = [1, 1]} : vector<2x6xf32> to vector<2x1xf32>
    %439 = vector.broadcast %438 : vector<2x1xf32> to vector<2x24xf32>
    %440 = arith.mulf %439, %38 : vector<2x24xf32>
    %441 = arith.addf %437, %440 : vector<2x24xf32>
    %442 = math.tanh %441 : vector<2x24xf32>
    %443 = vector.extract_strided_slice %442 {offsets = [0, 0], sizes = [2, 18], strides = [1, 1]} : vector<2x24xf32> to vector<2x18xf32>
    %cst_43 = arith.constant 5.000000e-01 : f32
    %444 = vector.broadcast %cst_43 : f32 to vector<2x18xf32>
    %445 = arith.mulf %444, %443 : vector<2x18xf32>
    %cst_44 = arith.constant 5.000000e-01 : f32
    %446 = vector.broadcast %cst_44 : f32 to vector<2x18xf32>
    %447 = arith.addf %445, %446 : vector<2x18xf32>
    %448 = vector.extract_strided_slice %442 {offsets = [0, 18], sizes = [2, 6], strides = [1, 1]} : vector<2x24xf32> to vector<2x6xf32>
    %449 = vector.extract_strided_slice %447 {offsets = [0, 6], sizes = [2, 6], strides = [1, 1]} : vector<2x18xf32> to vector<2x6xf32>
    %450 = arith.mulf %449, %388 : vector<2x6xf32>
    %451 = vector.extract_strided_slice %447 {offsets = [0, 0], sizes = [2, 6], strides = [1, 1]} : vector<2x18xf32> to vector<2x6xf32>
    %452 = arith.mulf %451, %448 : vector<2x6xf32>
    %453 = arith.addf %450, %452 : vector<2x6xf32>
    %454 = vector.extract_strided_slice %447 {offsets = [0, 12], sizes = [2, 6], strides = [1, 1]} : vector<2x18xf32> to vector<2x6xf32>
    %455 = math.tanh %453 : vector<2x6xf32>
    %456 = arith.mulf %454, %455 : vector<2x6xf32>
    %457 = vector.extract_strided_slice %456 {offsets = [0, 0], sizes = [2, 3], strides = [1, 1]} : vector<2x6xf32> to vector<2x3xf32>
    %458 = vector.extract_strided_slice %456 {offsets = [0, 3], sizes = [2, 3], strides = [1, 1]} : vector<2x6xf32> to vector<2x3xf32>
    %459 = vector.extract_strided_slice %91 {offsets = [0, 18], sizes = [2, 1], strides = [1, 1]} : vector<2x24xf32> to vector<2x1xf32>
    %460 = vector.broadcast %459 : vector<2x1xf32> to vector<2x24xf32>
    %461 = arith.mulf %460, %5 : vector<2x24xf32>
    %462 = arith.addf %2, %461 : vector<2x24xf32>
    %463 = vector.extract_strided_slice %91 {offsets = [0, 3], sizes = [2, 1], strides = [1, 1]} : vector<2x24xf32> to vector<2x1xf32>
    %464 = vector.broadcast %463 : vector<2x1xf32> to vector<2x24xf32>
    %465 = arith.mulf %464, %14 : vector<2x24xf32>
    %466 = arith.addf %462, %465 : vector<2x24xf32>
    %467 = vector.extract_strided_slice %91 {offsets = [0, 19], sizes = [2, 1], strides = [1, 1]} : vector<2x24xf32> to vector<2x1xf32>
    %468 = vector.broadcast %467 : vector<2x1xf32> to vector<2x24xf32>
    %469 = arith.mulf %468, %8 : vector<2x24xf32>
    %470 = arith.addf %466, %469 : vector<2x24xf32>
    %471 = vector.extract_strided_slice %91 {offsets = [0, 4], sizes = [2, 1], strides = [1, 1]} : vector<2x24xf32> to vector<2x1xf32>
    %472 = vector.broadcast %471 : vector<2x1xf32> to vector<2x24xf32>
    %473 = arith.mulf %472, %17 : vector<2x24xf32>
    %474 = arith.addf %470, %473 : vector<2x24xf32>
    %475 = vector.extract_strided_slice %91 {offsets = [0, 20], sizes = [2, 1], strides = [1, 1]} : vector<2x24xf32> to vector<2x1xf32>
    %476 = vector.broadcast %475 : vector<2x1xf32> to vector<2x24xf32>
    %477 = arith.mulf %476, %11 : vector<2x24xf32>
    %478 = arith.addf %474, %477 : vector<2x24xf32>
    %479 = vector.extract_strided_slice %91 {offsets = [0, 5], sizes = [2, 1], strides = [1, 1]} : vector<2x24xf32> to vector<2x1xf32>
    %480 = vector.broadcast %479 : vector<2x1xf32> to vector<2x24xf32>
    %481 = arith.mulf %480, %20 : vector<2x24xf32>
    %482 = arith.addf %478, %481 : vector<2x24xf32>
    %483 = vector.extract_strided_slice %456 {offsets = [0, 0], sizes = [2, 1], strides = [1, 1]} : vector<2x6xf32> to vector<2x1xf32>
    %484 = vector.broadcast %483 : vector<2x1xf32> to vector<2x24xf32>
    %485 = arith.mulf %484, %23 : vector<2x24xf32>
    %486 = arith.addf %482, %485 : vector<2x24xf32>
    %487 = vector.extract_strided_slice %456 {offsets = [0, 1], sizes = [2, 1], strides = [1, 1]} : vector<2x6xf32> to vector<2x1xf32>
    %488 = vector.broadcast %487 : vector<2x1xf32> to vector<2x24xf32>
    %489 = arith.mulf %488, %26 : vector<2x24xf32>
    %490 = arith.addf %486, %489 : vector<2x24xf32>
    %491 = vector.extract_strided_slice %456 {offsets = [0, 2], sizes = [2, 1], strides = [1, 1]} : vector<2x6xf32> to vector<2x1xf32>
    %492 = vector.broadcast %491 : vector<2x1xf32> to vector<2x24xf32>
    %493 = arith.mulf %492, %29 : vector<2x24xf32>
    %494 = arith.addf %490, %493 : vector<2x24xf32>
    %495 = vector.extract_strided_slice %456 {offsets = [0, 3], sizes = [2, 1], strides = [1, 1]} : vector<2x6xf32> to vector<2x1xf32>
    %496 = vector.broadcast %495 : vector<2x1xf32> to vector<2x24xf32>
    %497 = arith.mulf %496, %32 : vector<2x24xf32>
    %498 = arith.addf %494, %497 : vector<2x24xf32>
    %499 = vector.extract_strided_slice %456 {offsets = [0, 4], sizes = [2, 1], strides = [1, 1]} : vector<2x6xf32> to vector<2x1xf32>
    %500 = vector.broadcast %499 : vector<2x1xf32> to vector<2x24xf32>
    %501 = arith.mulf %500, %35 : vector<2x24xf32>
    %502 = arith.addf %498, %501 : vector<2x24xf32>
    %503 = vector.extract_strided_slice %456 {offsets = [0, 5], sizes = [2, 1], strides = [1, 1]} : vector<2x6xf32> to vector<2x1xf32>
    %504 = vector.broadcast %503 : vector<2x1xf32> to vector<2x24xf32>
    %505 = arith.mulf %504, %38 : vector<2x24xf32>
    %506 = arith.addf %502, %505 : vector<2x24xf32>
    %507 = math.tanh %506 : vector<2x24xf32>
    %508 = vector.extract_strided_slice %507 {offsets = [0, 0], sizes = [2, 18], strides = [1, 1]} : vector<2x24xf32> to vector<2x18xf32>
    %cst_45 = arith.constant 5.000000e-01 : f32
    %509 = vector.broadcast %cst_45 : f32 to vector<2x18xf32>
    %510 = arith.mulf %509, %508 : vector<2x18xf32>
    %cst_46 = arith.constant 5.000000e-01 : f32
    %511 = vector.broadcast %cst_46 : f32 to vector<2x18xf32>
    %512 = arith.addf %510, %511 : vector<2x18xf32>
    %513 = vector.extract_strided_slice %507 {offsets = [0, 18], sizes = [2, 6], strides = [1, 1]} : vector<2x24xf32> to vector<2x6xf32>
    %514 = vector.extract_strided_slice %512 {offsets = [0, 6], sizes = [2, 6], strides = [1, 1]} : vector<2x18xf32> to vector<2x6xf32>
    %515 = arith.mulf %514, %453 : vector<2x6xf32>
    %516 = vector.extract_strided_slice %512 {offsets = [0, 0], sizes = [2, 6], strides = [1, 1]} : vector<2x18xf32> to vector<2x6xf32>
    %517 = arith.mulf %516, %513 : vector<2x6xf32>
    %518 = arith.addf %515, %517 : vector<2x6xf32>
    %519 = vector.extract_strided_slice %512 {offsets = [0, 12], sizes = [2, 6], strides = [1, 1]} : vector<2x18xf32> to vector<2x6xf32>
    %520 = math.tanh %518 : vector<2x6xf32>
    %521 = arith.mulf %519, %520 : vector<2x6xf32>
    %522 = vector.extract_strided_slice %521 {offsets = [0, 0], sizes = [2, 3], strides = [1, 1]} : vector<2x6xf32> to vector<2x3xf32>
    %523 = vector.extract_strided_slice %521 {offsets = [0, 3], sizes = [2, 3], strides = [1, 1]} : vector<2x6xf32> to vector<2x3xf32>
    %524 = vector.extract_strided_slice %91 {offsets = [0, 21], sizes = [2, 1], strides = [1, 1]} : vector<2x24xf32> to vector<2x1xf32>
    %525 = vector.broadcast %524 : vector<2x1xf32> to vector<2x24xf32>
    %526 = arith.mulf %525, %5 : vector<2x24xf32>
    %527 = arith.addf %2, %526 : vector<2x24xf32>
    %528 = vector.extract_strided_slice %91 {offsets = [0, 0], sizes = [2, 1], strides = [1, 1]} : vector<2x24xf32> to vector<2x1xf32>
    %529 = vector.broadcast %528 : vector<2x1xf32> to vector<2x24xf32>
    %530 = arith.mulf %529, %14 : vector<2x24xf32>
    %531 = arith.addf %527, %530 : vector<2x24xf32>
    %532 = vector.extract_strided_slice %91 {offsets = [0, 22], sizes = [2, 1], strides = [1, 1]} : vector<2x24xf32> to vector<2x1xf32>
    %533 = vector.broadcast %532 : vector<2x1xf32> to vector<2x24xf32>
    %534 = arith.mulf %533, %8 : vector<2x24xf32>
    %535 = arith.addf %531, %534 : vector<2x24xf32>
    %536 = vector.extract_strided_slice %91 {offsets = [0, 1], sizes = [2, 1], strides = [1, 1]} : vector<2x24xf32> to vector<2x1xf32>
    %537 = vector.broadcast %536 : vector<2x1xf32> to vector<2x24xf32>
    %538 = arith.mulf %537, %17 : vector<2x24xf32>
    %539 = arith.addf %535, %538 : vector<2x24xf32>
    %540 = vector.extract_strided_slice %91 {offsets = [0, 23], sizes = [2, 1], strides = [1, 1]} : vector<2x24xf32> to vector<2x1xf32>
    %541 = vector.broadcast %540 : vector<2x1xf32> to vector<2x24xf32>
    %542 = arith.mulf %541, %11 : vector<2x24xf32>
    %543 = arith.addf %539, %542 : vector<2x24xf32>
    %544 = vector.extract_strided_slice %91 {offsets = [0, 2], sizes = [2, 1], strides = [1, 1]} : vector<2x24xf32> to vector<2x1xf32>
    %545 = vector.broadcast %544 : vector<2x1xf32> to vector<2x24xf32>
    %546 = arith.mulf %545, %20 : vector<2x24xf32>
    %547 = arith.addf %543, %546 : vector<2x24xf32>
    %548 = vector.extract_strided_slice %521 {offsets = [0, 0], sizes = [2, 1], strides = [1, 1]} : vector<2x6xf32> to vector<2x1xf32>
    %549 = vector.broadcast %548 : vector<2x1xf32> to vector<2x24xf32>
    %550 = arith.mulf %549, %23 : vector<2x24xf32>
    %551 = arith.addf %547, %550 : vector<2x24xf32>
    %552 = vector.extract_strided_slice %521 {offsets = [0, 1], sizes = [2, 1], strides = [1, 1]} : vector<2x6xf32> to vector<2x1xf32>
    %553 = vector.broadcast %552 : vector<2x1xf32> to vector<2x24xf32>
    %554 = arith.mulf %553, %26 : vector<2x24xf32>
    %555 = arith.addf %551, %554 : vector<2x24xf32>
    %556 = vector.extract_strided_slice %521 {offsets = [0, 2], sizes = [2, 1], strides = [1, 1]} : vector<2x6xf32> to vector<2x1xf32>
    %557 = vector.broadcast %556 : vector<2x1xf32> to vector<2x24xf32>
    %558 = arith.mulf %557, %29 : vector<2x24xf32>
    %559 = arith.addf %555, %558 : vector<2x24xf32>
    %560 = vector.extract_strided_slice %521 {offsets = [0, 3], sizes = [2, 1], strides = [1, 1]} : vector<2x6xf32> to vector<2x1xf32>
    %561 = vector.broadcast %560 : vector<2x1xf32> to vector<2x24xf32>
    %562 = arith.mulf %561, %32 : vector<2x24xf32>
    %563 = arith.addf %559, %562 : vector<2x24xf32>
    %564 = vector.extract_strided_slice %521 {offsets = [0, 4], sizes = [2, 1], strides = [1, 1]} : vector<2x6xf32> to vector<2x1xf32>
    %565 = vector.broadcast %564 : vector<2x1xf32> to vector<2x24xf32>
    %566 = arith.mulf %565, %35 : vector<2x24xf32>
    %567 = arith.addf %563, %566 : vector<2x24xf32>
    %568 = vector.extract_strided_slice %521 {offsets = [0, 5], sizes = [2, 1], strides = [1, 1]} : vector<2x6xf32> to vector<2x1xf32>
    %569 = vector.broadcast %568 : vector<2x1xf32> to vector<2x24xf32>
    %570 = arith.mulf %569, %38 : vector<2x24xf32>
    %571 = arith.addf %567, %570 : vector<2x24xf32>
    %572 = math.tanh %571 : vector<2x24xf32>
    %573 = vector.extract_strided_slice %572 {offsets = [0, 0], sizes = [2, 18], strides = [1, 1]} : vector<2x24xf32> to vector<2x18xf32>
    %cst_47 = arith.constant 5.000000e-01 : f32
    %574 = vector.broadcast %cst_47 : f32 to vector<2x18xf32>
    %575 = arith.mulf %574, %573 : vector<2x18xf32>
    %cst_48 = arith.constant 5.000000e-01 : f32
    %576 = vector.broadcast %cst_48 : f32 to vector<2x18xf32>
    %577 = arith.addf %575, %576 : vector<2x18xf32>
    %578 = vector.extract_strided_slice %572 {offsets = [0, 18], sizes = [2, 6], strides = [1, 1]} : vector<2x24xf32> to vector<2x6xf32>
    %579 = vector.extract_strided_slice %577 {offsets = [0, 6], sizes = [2, 6], strides = [1, 1]} : vector<2x18xf32> to vector<2x6xf32>
    %580 = arith.mulf %579, %518 : vector<2x6xf32>
    %581 = vector.extract_strided_slice %577 {offsets = [0, 0], sizes = [2, 6], strides = [1, 1]} : vector<2x18xf32> to vector<2x6xf32>
    %582 = arith.mulf %581, %578 : vector<2x6xf32>
    %583 = arith.addf %580, %582 : vector<2x6xf32>
    %584 = vector.extract_strided_slice %577 {offsets = [0, 12], sizes = [2, 6], strides = [1, 1]} : vector<2x18xf32> to vector<2x6xf32>
    %585 = math.tanh %583 : vector<2x6xf32>
    %586 = arith.mulf %584, %585 : vector<2x6xf32>
    %587 = vector.extract_strided_slice %586 {offsets = [0, 0], sizes = [2, 3], strides = [1, 1]} : vector<2x6xf32> to vector<2x3xf32>
    %588 = vector.extract_strided_slice %586 {offsets = [0, 3], sizes = [2, 3], strides = [1, 1]} : vector<2x6xf32> to vector<2x3xf32>
    %589 = vector.extract_strided_slice %132 {offsets = [0, 0], sizes = [2, 1], strides = [1, 1]} : vector<2x3xf32> to vector<2x1xf32>
    %590 = vector.broadcast %589 : vector<2x1xf32> to vector<2x24xf32>
    %591 = arith.mulf %590, %44 : vector<2x24xf32>
    %592 = arith.addf %41, %591 : vector<2x24xf32>
    %593 = vector.extract_strided_slice %588 {offsets = [0, 0], sizes = [2, 1], strides = [1, 1]} : vector<2x3xf32> to vector<2x1xf32>
    %594 = vector.broadcast %593 : vector<2x1xf32> to vector<2x24xf32>
    %595 = arith.mulf %594, %53 : vector<2x24xf32>
    %596 = arith.addf %592, %595 : vector<2x24xf32>
    %597 = vector.extract_strided_slice %132 {offsets = [0, 1], sizes = [2, 1], strides = [1, 1]} : vector<2x3xf32> to vector<2x1xf32>
    %598 = vector.broadcast %597 : vector<2x1xf32> to vector<2x24xf32>
    %599 = arith.mulf %598, %47 : vector<2x24xf32>
    %600 = arith.addf %596, %599 : vector<2x24xf32>
    %601 = vector.extract_strided_slice %588 {offsets = [0, 1], sizes = [2, 1], strides = [1, 1]} : vector<2x3xf32> to vector<2x1xf32>
    %602 = vector.broadcast %601 : vector<2x1xf32> to vector<2x24xf32>
    %603 = arith.mulf %602, %56 : vector<2x24xf32>
    %604 = arith.addf %600, %603 : vector<2x24xf32>
    %605 = vector.extract_strided_slice %132 {offsets = [0, 2], sizes = [2, 1], strides = [1, 1]} : vector<2x3xf32> to vector<2x1xf32>
    %606 = vector.broadcast %605 : vector<2x1xf32> to vector<2x24xf32>
    %607 = arith.mulf %606, %50 : vector<2x24xf32>
    %608 = arith.addf %604, %607 : vector<2x24xf32>
    %609 = vector.extract_strided_slice %588 {offsets = [0, 2], sizes = [2, 1], strides = [1, 1]} : vector<2x3xf32> to vector<2x1xf32>
    %610 = vector.broadcast %609 : vector<2x1xf32> to vector<2x24xf32>
    %611 = arith.mulf %610, %59 : vector<2x24xf32>
    %612 = arith.addf %608, %611 : vector<2x24xf32>
    %613 = vector.extract_strided_slice %197 {offsets = [0, 0], sizes = [2, 1], strides = [1, 1]} : vector<2x3xf32> to vector<2x1xf32>
    %614 = vector.broadcast %613 : vector<2x1xf32> to vector<2x24xf32>
    %615 = arith.mulf %614, %44 : vector<2x24xf32>
    %616 = arith.addf %41, %615 : vector<2x24xf32>
    %617 = vector.extract_strided_slice %523 {offsets = [0, 0], sizes = [2, 1], strides = [1, 1]} : vector<2x3xf32> to vector<2x1xf32>
    %618 = vector.broadcast %617 : vector<2x1xf32> to vector<2x24xf32>
    %619 = arith.mulf %618, %53 : vector<2x24xf32>
    %620 = arith.addf %616, %619 : vector<2x24xf32>
    %621 = vector.extract_strided_slice %197 {offsets = [0, 1], sizes = [2, 1], strides = [1, 1]} : vector<2x3xf32> to vector<2x1xf32>
    %622 = vector.broadcast %621 : vector<2x1xf32> to vector<2x24xf32>
    %623 = arith.mulf %622, %47 : vector<2x24xf32>
    %624 = arith.addf %620, %623 : vector<2x24xf32>
    %625 = vector.extract_strided_slice %523 {offsets = [0, 1], sizes = [2, 1], strides = [1, 1]} : vector<2x3xf32> to vector<2x1xf32>
    %626 = vector.broadcast %625 : vector<2x1xf32> to vector<2x24xf32>
    %627 = arith.mulf %626, %56 : vector<2x24xf32>
    %628 = arith.addf %624, %627 : vector<2x24xf32>
    %629 = vector.extract_strided_slice %197 {offsets = [0, 2], sizes = [2, 1], strides = [1, 1]} : vector<2x3xf32> to vector<2x1xf32>
    %630 = vector.broadcast %629 : vector<2x1xf32> to vector<2x24xf32>
    %631 = arith.mulf %630, %50 : vector<2x24xf32>
    %632 = arith.addf %628, %631 : vector<2x24xf32>
    %633 = vector.extract_strided_slice %523 {offsets = [0, 2], sizes = [2, 1], strides = [1, 1]} : vector<2x3xf32> to vector<2x1xf32>
    %634 = vector.broadcast %633 : vector<2x1xf32> to vector<2x24xf32>
    %635 = arith.mulf %634, %59 : vector<2x24xf32>
    %636 = arith.addf %632, %635 : vector<2x24xf32>
    %637 = vector.extract_strided_slice %262 {offsets = [0, 0], sizes = [2, 1], strides = [1, 1]} : vector<2x3xf32> to vector<2x1xf32>
    %638 = vector.broadcast %637 : vector<2x1xf32> to vector<2x24xf32>
    %639 = arith.mulf %638, %44 : vector<2x24xf32>
    %640 = arith.addf %41, %639 : vector<2x24xf32>
    %641 = vector.extract_strided_slice %458 {offsets = [0, 0], sizes = [2, 1], strides = [1, 1]} : vector<2x3xf32> to vector<2x1xf32>
    %642 = vector.broadcast %641 : vector<2x1xf32> to vector<2x24xf32>
    %643 = arith.mulf %642, %53 : vector<2x24xf32>
    %644 = arith.addf %640, %643 : vector<2x24xf32>
    %645 = vector.extract_strided_slice %262 {offsets = [0, 1], sizes = [2, 1], strides = [1, 1]} : vector<2x3xf32> to vector<2x1xf32>
    %646 = vector.broadcast %645 : vector<2x1xf32> to vector<2x24xf32>
    %647 = arith.mulf %646, %47 : vector<2x24xf32>
    %648 = arith.addf %644, %647 : vector<2x24xf32>
    %649 = vector.extract_strided_slice %458 {offsets = [0, 1], sizes = [2, 1], strides = [1, 1]} : vector<2x3xf32> to vector<2x1xf32>
    %650 = vector.broadcast %649 : vector<2x1xf32> to vector<2x24xf32>
    %651 = arith.mulf %650, %56 : vector<2x24xf32>
    %652 = arith.addf %648, %651 : vector<2x24xf32>
    %653 = vector.extract_strided_slice %262 {offsets = [0, 2], sizes = [2, 1], strides = [1, 1]} : vector<2x3xf32> to vector<2x1xf32>
    %654 = vector.broadcast %653 : vector<2x1xf32> to vector<2x24xf32>
    %655 = arith.mulf %654, %50 : vector<2x24xf32>
    %656 = arith.addf %652, %655 : vector<2x24xf32>
    %657 = vector.extract_strided_slice %458 {offsets = [0, 2], sizes = [2, 1], strides = [1, 1]} : vector<2x3xf32> to vector<2x1xf32>
    %658 = vector.broadcast %657 : vector<2x1xf32> to vector<2x24xf32>
    %659 = arith.mulf %658, %59 : vector<2x24xf32>
    %660 = arith.addf %656, %659 : vector<2x24xf32>
    %661 = vector.extract_strided_slice %327 {offsets = [0, 0], sizes = [2, 1], strides = [1, 1]} : vector<2x3xf32> to vector<2x1xf32>
    %662 = vector.broadcast %661 : vector<2x1xf32> to vector<2x24xf32>
    %663 = arith.mulf %662, %44 : vector<2x24xf32>
    %664 = arith.addf %41, %663 : vector<2x24xf32>
    %665 = vector.extract_strided_slice %393 {offsets = [0, 0], sizes = [2, 1], strides = [1, 1]} : vector<2x3xf32> to vector<2x1xf32>
    %666 = vector.broadcast %665 : vector<2x1xf32> to vector<2x24xf32>
    %667 = arith.mulf %666, %53 : vector<2x24xf32>
    %668 = arith.addf %664, %667 : vector<2x24xf32>
    %669 = vector.extract_strided_slice %327 {offsets = [0, 1], sizes = [2, 1], strides = [1, 1]} : vector<2x3xf32> to vector<2x1xf32>
    %670 = vector.broadcast %669 : vector<2x1xf32> to vector<2x24xf32>
    %671 = arith.mulf %670, %47 : vector<2x24xf32>
    %672 = arith.addf %668, %671 : vector<2x24xf32>
    %673 = vector.extract_strided_slice %393 {offsets = [0, 1], sizes = [2, 1], strides = [1, 1]} : vector<2x3xf32> to vector<2x1xf32>
    %674 = vector.broadcast %673 : vector<2x1xf32> to vector<2x24xf32>
    %675 = arith.mulf %674, %56 : vector<2x24xf32>
    %676 = arith.addf %672, %675 : vector<2x24xf32>
    %677 = vector.extract_strided_slice %327 {offsets = [0, 2], sizes = [2, 1], strides = [1, 1]} : vector<2x3xf32> to vector<2x1xf32>
    %678 = vector.broadcast %677 : vector<2x1xf32> to vector<2x24xf32>
    %679 = arith.mulf %678, %50 : vector<2x24xf32>
    %680 = arith.addf %676, %679 : vector<2x24xf32>
    %681 = vector.extract_strided_slice %393 {offsets = [0, 2], sizes = [2, 1], strides = [1, 1]} : vector<2x3xf32> to vector<2x1xf32>
    %682 = vector.broadcast %681 : vector<2x1xf32> to vector<2x24xf32>
    %683 = arith.mulf %682, %59 : vector<2x24xf32>
    %684 = arith.addf %680, %683 : vector<2x24xf32>
    %685 = vector.extract_strided_slice %392 {offsets = [0, 0], sizes = [2, 1], strides = [1, 1]} : vector<2x3xf32> to vector<2x1xf32>
    %686 = vector.broadcast %685 : vector<2x1xf32> to vector<2x24xf32>
    %687 = arith.mulf %686, %44 : vector<2x24xf32>
    %688 = arith.addf %41, %687 : vector<2x24xf32>
    %689 = vector.extract_strided_slice %328 {offsets = [0, 0], sizes = [2, 1], strides = [1, 1]} : vector<2x3xf32> to vector<2x1xf32>
    %690 = vector.broadcast %689 : vector<2x1xf32> to vector<2x24xf32>
    %691 = arith.mulf %690, %53 : vector<2x24xf32>
    %692 = arith.addf %688, %691 : vector<2x24xf32>
    %693 = vector.extract_strided_slice %392 {offsets = [0, 1], sizes = [2, 1], strides = [1, 1]} : vector<2x3xf32> to vector<2x1xf32>
    %694 = vector.broadcast %693 : vector<2x1xf32> to vector<2x24xf32>
    %695 = arith.mulf %694, %47 : vector<2x24xf32>
    %696 = arith.addf %692, %695 : vector<2x24xf32>
    %697 = vector.extract_strided_slice %328 {offsets = [0, 1], sizes = [2, 1], strides = [1, 1]} : vector<2x3xf32> to vector<2x1xf32>
    %698 = vector.broadcast %697 : vector<2x1xf32> to vector<2x24xf32>
    %699 = arith.mulf %698, %56 : vector<2x24xf32>
    %700 = arith.addf %696, %699 : vector<2x24xf32>
    %701 = vector.extract_strided_slice %392 {offsets = [0, 2], sizes = [2, 1], strides = [1, 1]} : vector<2x3xf32> to vector<2x1xf32>
    %702 = vector.broadcast %701 : vector<2x1xf32> to vector<2x24xf32>
    %703 = arith.mulf %702, %50 : vector<2x24xf32>
    %704 = arith.addf %700, %703 : vector<2x24xf32>
    %705 = vector.extract_strided_slice %328 {offsets = [0, 2], sizes = [2, 1], strides = [1, 1]} : vector<2x3xf32> to vector<2x1xf32>
    %706 = vector.broadcast %705 : vector<2x1xf32> to vector<2x24xf32>
    %707 = arith.mulf %706, %59 : vector<2x24xf32>
    %708 = arith.addf %704, %707 : vector<2x24xf32>
    %709 = vector.extract_strided_slice %457 {offsets = [0, 0], sizes = [2, 1], strides = [1, 1]} : vector<2x3xf32> to vector<2x1xf32>
    %710 = vector.broadcast %709 : vector<2x1xf32> to vector<2x24xf32>
    %711 = arith.mulf %710, %44 : vector<2x24xf32>
    %712 = arith.addf %41, %711 : vector<2x24xf32>
    %713 = vector.extract_strided_slice %263 {offsets = [0, 0], sizes = [2, 1], strides = [1, 1]} : vector<2x3xf32> to vector<2x1xf32>
    %714 = vector.broadcast %713 : vector<2x1xf32> to vector<2x24xf32>
    %715 = arith.mulf %714, %53 : vector<2x24xf32>
    %716 = arith.addf %712, %715 : vector<2x24xf32>
    %717 = vector.extract_strided_slice %457 {offsets = [0, 1], sizes = [2, 1], strides = [1, 1]} : vector<2x3xf32> to vector<2x1xf32>
    %718 = vector.broadcast %717 : vector<2x1xf32> to vector<2x24xf32>
    %719 = arith.mulf %718, %47 : vector<2x24xf32>
    %720 = arith.addf %716, %719 : vector<2x24xf32>
    %721 = vector.extract_strided_slice %263 {offsets = [0, 1], sizes = [2, 1], strides = [1, 1]} : vector<2x3xf32> to vector<2x1xf32>
    %722 = vector.broadcast %721 : vector<2x1xf32> to vector<2x24xf32>
    %723 = arith.mulf %722, %56 : vector<2x24xf32>
    %724 = arith.addf %720, %723 : vector<2x24xf32>
    %725 = vector.extract_strided_slice %457 {offsets = [0, 2], sizes = [2, 1], strides = [1, 1]} : vector<2x3xf32> to vector<2x1xf32>
    %726 = vector.broadcast %725 : vector<2x1xf32> to vector<2x24xf32>
    %727 = arith.mulf %726, %50 : vector<2x24xf32>
    %728 = arith.addf %724, %727 : vector<2x24xf32>
    %729 = vector.extract_strided_slice %263 {offsets = [0, 2], sizes = [2, 1], strides = [1, 1]} : vector<2x3xf32> to vector<2x1xf32>
    %730 = vector.broadcast %729 : vector<2x1xf32> to vector<2x24xf32>
    %731 = arith.mulf %730, %59 : vector<2x24xf32>
    %732 = arith.addf %728, %731 : vector<2x24xf32>
    %733 = vector.extract_strided_slice %522 {offsets = [0, 0], sizes = [2, 1], strides = [1, 1]} : vector<2x3xf32> to vector<2x1xf32>
    %734 = vector.broadcast %733 : vector<2x1xf32> to vector<2x24xf32>
    %735 = arith.mulf %734, %44 : vector<2x24xf32>
    %736 = arith.addf %41, %735 : vector<2x24xf32>
    %737 = vector.extract_strided_slice %198 {offsets = [0, 0], sizes = [2, 1], strides = [1, 1]} : vector<2x3xf32> to vector<2x1xf32>
    %738 = vector.broadcast %737 : vector<2x1xf32> to vector<2x24xf32>
    %739 = arith.mulf %738, %53 : vector<2x24xf32>
    %740 = arith.addf %736, %739 : vector<2x24xf32>
    %741 = vector.extract_strided_slice %522 {offsets = [0, 1], sizes = [2, 1], strides = [1, 1]} : vector<2x3xf32> to vector<2x1xf32>
    %742 = vector.broadcast %741 : vector<2x1xf32> to vector<2x24xf32>
    %743 = arith.mulf %742, %47 : vector<2x24xf32>
    %744 = arith.addf %740, %743 : vector<2x24xf32>
    %745 = vector.extract_strided_slice %198 {offsets = [0, 1], sizes = [2, 1], strides = [1, 1]} : vector<2x3xf32> to vector<2x1xf32>
    %746 = vector.broadcast %745 : vector<2x1xf32> to vector<2x24xf32>
    %747 = arith.mulf %746, %56 : vector<2x24xf32>
    %748 = arith.addf %744, %747 : vector<2x24xf32>
    %749 = vector.extract_strided_slice %522 {offsets = [0, 2], sizes = [2, 1], strides = [1, 1]} : vector<2x3xf32> to vector<2x1xf32>
    %750 = vector.broadcast %749 : vector<2x1xf32> to vector<2x24xf32>
    %751 = arith.mulf %750, %50 : vector<2x24xf32>
    %752 = arith.addf %748, %751 : vector<2x24xf32>
    %753 = vector.extract_strided_slice %198 {offsets = [0, 2], sizes = [2, 1], strides = [1, 1]} : vector<2x3xf32> to vector<2x1xf32>
    %754 = vector.broadcast %753 : vector<2x1xf32> to vector<2x24xf32>
    %755 = arith.mulf %754, %59 : vector<2x24xf32>
    %756 = arith.addf %752, %755 : vector<2x24xf32>
    %757 = vector.extract_strided_slice %587 {offsets = [0, 0], sizes = [2, 1], strides = [1, 1]} : vector<2x3xf32> to vector<2x1xf32>
    %758 = vector.broadcast %757 : vector<2x1xf32> to vector<2x24xf32>
    %759 = arith.mulf %758, %44 : vector<2x24xf32>
    %760 = arith.addf %41, %759 : vector<2x24xf32>
    %761 = vector.extract_strided_slice %133 {offsets = [0, 0], sizes = [2, 1], strides = [1, 1]} : vector<2x3xf32> to vector<2x1xf32>
    %762 = vector.broadcast %761 : vector<2x1xf32> to vector<2x24xf32>
    %763 = arith.mulf %762, %53 : vector<2x24xf32>
    %764 = arith.addf %760, %763 : vector<2x24xf32>
    %765 = vector.extract_strided_slice %587 {offsets = [0, 1], sizes = [2, 1], strides = [1, 1]} : vector<2x3xf32> to vector<2x1xf32>
    %766 = vector.broadcast %765 : vector<2x1xf32> to vector<2x24xf32>
    %767 = arith.mulf %766, %47 : vector<2x24xf32>
    %768 = arith.addf %764, %767 : vector<2x24xf32>
    %769 = vector.extract_strided_slice %133 {offsets = [0, 1], sizes = [2, 1], strides = [1, 1]} : vector<2x3xf32> to vector<2x1xf32>
    %770 = vector.broadcast %769 : vector<2x1xf32> to vector<2x24xf32>
    %771 = arith.mulf %770, %56 : vector<2x24xf32>
    %772 = arith.addf %768, %771 : vector<2x24xf32>
    %773 = vector.extract_strided_slice %587 {offsets = [0, 2], sizes = [2, 1], strides = [1, 1]} : vector<2x3xf32> to vector<2x1xf32>
    %774 = vector.broadcast %773 : vector<2x1xf32> to vector<2x24xf32>
    %775 = arith.mulf %774, %50 : vector<2x24xf32>
    %776 = arith.addf %772, %775 : vector<2x24xf32>
    %777 = vector.extract_strided_slice %133 {offsets = [0, 2], sizes = [2, 1], strides = [1, 1]} : vector<2x3xf32> to vector<2x1xf32>
    %778 = vector.broadcast %777 : vector<2x1xf32> to vector<2x24xf32>
    %779 = arith.mulf %778, %59 : vector<2x24xf32>
    %780 = arith.addf %776, %779 : vector<2x24xf32>
    %cst_49 = arith.constant 0.000000e+00 : f32
    %781 = vector.broadcast %cst_49 : f32 to vector<2x3xf32>
    %782 = math.tanh %612 : vector<2x24xf32>
    %783 = vector.extract_strided_slice %782 {offsets = [0, 0], sizes = [2, 9], strides = [1, 1]} : vector<2x24xf32> to vector<2x9xf32>
    %cst_50 = arith.constant 5.000000e-01 : f32
    %784 = vector.broadcast %cst_50 : f32 to vector<2x9xf32>
    %785 = arith.mulf %784, %783 : vector<2x9xf32>
    %cst_51 = arith.constant 5.000000e-01 : f32
    %786 = vector.broadcast %cst_51 : f32 to vector<2x9xf32>
    %787 = arith.addf %785, %786 : vector<2x9xf32>
    %788 = vector.extract_strided_slice %782 {offsets = [0, 9], sizes = [2, 3], strides = [1, 1]} : vector<2x24xf32> to vector<2x3xf32>
    %789 = vector.extract_strided_slice %787 {offsets = [0, 3], sizes = [2, 3], strides = [1, 1]} : vector<2x9xf32> to vector<2x3xf32>
    %790 = arith.mulf %789, %781 : vector<2x3xf32>
    %791 = vector.extract_strided_slice %787 {offsets = [0, 0], sizes = [2, 3], strides = [1, 1]} : vector<2x9xf32> to vector<2x3xf32>
    %792 = arith.mulf %791, %788 : vector<2x3xf32>
    %793 = arith.addf %790, %792 : vector<2x3xf32>
    %794 = vector.extract_strided_slice %787 {offsets = [0, 6], sizes = [2, 3], strides = [1, 1]} : vector<2x9xf32> to vector<2x3xf32>
    %795 = math.tanh %793 : vector<2x3xf32>
    %796 = arith.mulf %794, %795 : vector<2x3xf32>
    %797 = vector.extract_strided_slice %796 {offsets = [0, 0], sizes = [2, 1], strides = [1, 1]} : vector<2x3xf32> to vector<2x1xf32>
    %798 = vector.broadcast %797 : vector<2x1xf32> to vector<2x24xf32>
    %799 = arith.mulf %798, %62 : vector<2x24xf32>
    %800 = arith.addf %636, %799 : vector<2x24xf32>
    %801 = vector.extract_strided_slice %796 {offsets = [0, 1], sizes = [2, 1], strides = [1, 1]} : vector<2x3xf32> to vector<2x1xf32>
    %802 = vector.broadcast %801 : vector<2x1xf32> to vector<2x24xf32>
    %803 = arith.mulf %802, %65 : vector<2x24xf32>
    %804 = arith.addf %800, %803 : vector<2x24xf32>
    %805 = vector.extract_strided_slice %796 {offsets = [0, 2], sizes = [2, 1], strides = [1, 1]} : vector<2x3xf32> to vector<2x1xf32>
    %806 = vector.broadcast %805 : vector<2x1xf32> to vector<2x24xf32>
    %807 = arith.mulf %806, %68 : vector<2x24xf32>
    %808 = arith.addf %804, %807 : vector<2x24xf32>
    %809 = math.tanh %808 : vector<2x24xf32>
    %810 = vector.extract_strided_slice %809 {offsets = [0, 0], sizes = [2, 9], strides = [1, 1]} : vector<2x24xf32> to vector<2x9xf32>
    %cst_52 = arith.constant 5.000000e-01 : f32
    %811 = vector.broadcast %cst_52 : f32 to vector<2x9xf32>
    %812 = arith.mulf %811, %810 : vector<2x9xf32>
    %cst_53 = arith.constant 5.000000e-01 : f32
    %813 = vector.broadcast %cst_53 : f32 to vector<2x9xf32>
    %814 = arith.addf %812, %813 : vector<2x9xf32>
    %815 = vector.extract_strided_slice %809 {offsets = [0, 9], sizes = [2, 3], strides = [1, 1]} : vector<2x24xf32> to vector<2x3xf32>
    %816 = vector.extract_strided_slice %814 {offsets = [0, 3], sizes = [2, 3], strides = [1, 1]} : vector<2x9xf32> to vector<2x3xf32>
    %817 = arith.mulf %816, %793 : vector<2x3xf32>
    %818 = vector.extract_strided_slice %814 {offsets = [0, 0], sizes = [2, 3], strides = [1, 1]} : vector<2x9xf32> to vector<2x3xf32>
    %819 = arith.mulf %818, %815 : vector<2x3xf32>
    %820 = arith.addf %817, %819 : vector<2x3xf32>
    %821 = vector.extract_strided_slice %814 {offsets = [0, 6], sizes = [2, 3], strides = [1, 1]} : vector<2x9xf32> to vector<2x3xf32>
    %822 = math.tanh %820 : vector<2x3xf32>
    %823 = arith.mulf %821, %822 : vector<2x3xf32>
    %824 = vector.extract_strided_slice %823 {offsets = [0, 0], sizes = [2, 1], strides = [1, 1]} : vector<2x3xf32> to vector<2x1xf32>
    %825 = vector.broadcast %824 : vector<2x1xf32> to vector<2x24xf32>
    %826 = arith.mulf %825, %62 : vector<2x24xf32>
    %827 = arith.addf %660, %826 : vector<2x24xf32>
    %828 = vector.extract_strided_slice %823 {offsets = [0, 1], sizes = [2, 1], strides = [1, 1]} : vector<2x3xf32> to vector<2x1xf32>
    %829 = vector.broadcast %828 : vector<2x1xf32> to vector<2x24xf32>
    %830 = arith.mulf %829, %65 : vector<2x24xf32>
    %831 = arith.addf %827, %830 : vector<2x24xf32>
    %832 = vector.extract_strided_slice %823 {offsets = [0, 2], sizes = [2, 1], strides = [1, 1]} : vector<2x3xf32> to vector<2x1xf32>
    %833 = vector.broadcast %832 : vector<2x1xf32> to vector<2x24xf32>
    %834 = arith.mulf %833, %68 : vector<2x24xf32>
    %835 = arith.addf %831, %834 : vector<2x24xf32>
    %836 = math.tanh %835 : vector<2x24xf32>
    %837 = vector.extract_strided_slice %836 {offsets = [0, 0], sizes = [2, 9], strides = [1, 1]} : vector<2x24xf32> to vector<2x9xf32>
    %cst_54 = arith.constant 5.000000e-01 : f32
    %838 = vector.broadcast %cst_54 : f32 to vector<2x9xf32>
    %839 = arith.mulf %838, %837 : vector<2x9xf32>
    %cst_55 = arith.constant 5.000000e-01 : f32
    %840 = vector.broadcast %cst_55 : f32 to vector<2x9xf32>
    %841 = arith.addf %839, %840 : vector<2x9xf32>
    %842 = vector.extract_strided_slice %836 {offsets = [0, 9], sizes = [2, 3], strides = [1, 1]} : vector<2x24xf32> to vector<2x3xf32>
    %843 = vector.extract_strided_slice %841 {offsets = [0, 3], sizes = [2, 3], strides = [1, 1]} : vector<2x9xf32> to vector<2x3xf32>
    %844 = arith.mulf %843, %820 : vector<2x3xf32>
    %845 = vector.extract_strided_slice %841 {offsets = [0, 0], sizes = [2, 3], strides = [1, 1]} : vector<2x9xf32> to vector<2x3xf32>
    %846 = arith.mulf %845, %842 : vector<2x3xf32>
    %847 = arith.addf %844, %846 : vector<2x3xf32>
    %848 = vector.extract_strided_slice %841 {offsets = [0, 6], sizes = [2, 3], strides = [1, 1]} : vector<2x9xf32> to vector<2x3xf32>
    %849 = math.tanh %847 : vector<2x3xf32>
    %850 = arith.mulf %848, %849 : vector<2x3xf32>
    %851 = vector.extract_strided_slice %850 {offsets = [0, 0], sizes = [2, 1], strides = [1, 1]} : vector<2x3xf32> to vector<2x1xf32>
    %852 = vector.broadcast %851 : vector<2x1xf32> to vector<2x24xf32>
    %853 = arith.mulf %852, %62 : vector<2x24xf32>
    %854 = arith.addf %684, %853 : vector<2x24xf32>
    %855 = vector.extract_strided_slice %850 {offsets = [0, 1], sizes = [2, 1], strides = [1, 1]} : vector<2x3xf32> to vector<2x1xf32>
    %856 = vector.broadcast %855 : vector<2x1xf32> to vector<2x24xf32>
    %857 = arith.mulf %856, %65 : vector<2x24xf32>
    %858 = arith.addf %854, %857 : vector<2x24xf32>
    %859 = vector.extract_strided_slice %850 {offsets = [0, 2], sizes = [2, 1], strides = [1, 1]} : vector<2x3xf32> to vector<2x1xf32>
    %860 = vector.broadcast %859 : vector<2x1xf32> to vector<2x24xf32>
    %861 = arith.mulf %860, %68 : vector<2x24xf32>
    %862 = arith.addf %858, %861 : vector<2x24xf32>
    %863 = math.tanh %862 : vector<2x24xf32>
    %864 = vector.extract_strided_slice %863 {offsets = [0, 0], sizes = [2, 9], strides = [1, 1]} : vector<2x24xf32> to vector<2x9xf32>
    %cst_56 = arith.constant 5.000000e-01 : f32
    %865 = vector.broadcast %cst_56 : f32 to vector<2x9xf32>
    %866 = arith.mulf %865, %864 : vector<2x9xf32>
    %cst_57 = arith.constant 5.000000e-01 : f32
    %867 = vector.broadcast %cst_57 : f32 to vector<2x9xf32>
    %868 = arith.addf %866, %867 : vector<2x9xf32>
    %869 = vector.extract_strided_slice %863 {offsets = [0, 9], sizes = [2, 3], strides = [1, 1]} : vector<2x24xf32> to vector<2x3xf32>
    %870 = vector.extract_strided_slice %868 {offsets = [0, 3], sizes = [2, 3], strides = [1, 1]} : vector<2x9xf32> to vector<2x3xf32>
    %871 = arith.mulf %870, %847 : vector<2x3xf32>
    %872 = vector.extract_strided_slice %868 {offsets = [0, 0], sizes = [2, 3], strides = [1, 1]} : vector<2x9xf32> to vector<2x3xf32>
    %873 = arith.mulf %872, %869 : vector<2x3xf32>
    %874 = arith.addf %871, %873 : vector<2x3xf32>
    %875 = vector.extract_strided_slice %868 {offsets = [0, 6], sizes = [2, 3], strides = [1, 1]} : vector<2x9xf32> to vector<2x3xf32>
    %876 = math.tanh %874 : vector<2x3xf32>
    %877 = arith.mulf %875, %876 : vector<2x3xf32>
    %878 = vector.extract_strided_slice %877 {offsets = [0, 0], sizes = [2, 1], strides = [1, 1]} : vector<2x3xf32> to vector<2x1xf32>
    %879 = vector.broadcast %878 : vector<2x1xf32> to vector<2x24xf32>
    %880 = arith.mulf %879, %62 : vector<2x24xf32>
    %881 = arith.addf %708, %880 : vector<2x24xf32>
    %882 = vector.extract_strided_slice %877 {offsets = [0, 1], sizes = [2, 1], strides = [1, 1]} : vector<2x3xf32> to vector<2x1xf32>
    %883 = vector.broadcast %882 : vector<2x1xf32> to vector<2x24xf32>
    %884 = arith.mulf %883, %65 : vector<2x24xf32>
    %885 = arith.addf %881, %884 : vector<2x24xf32>
    %886 = vector.extract_strided_slice %877 {offsets = [0, 2], sizes = [2, 1], strides = [1, 1]} : vector<2x3xf32> to vector<2x1xf32>
    %887 = vector.broadcast %886 : vector<2x1xf32> to vector<2x24xf32>
    %888 = arith.mulf %887, %68 : vector<2x24xf32>
    %889 = arith.addf %885, %888 : vector<2x24xf32>
    %890 = math.tanh %889 : vector<2x24xf32>
    %891 = vector.extract_strided_slice %890 {offsets = [0, 0], sizes = [2, 9], strides = [1, 1]} : vector<2x24xf32> to vector<2x9xf32>
    %cst_58 = arith.constant 5.000000e-01 : f32
    %892 = vector.broadcast %cst_58 : f32 to vector<2x9xf32>
    %893 = arith.mulf %892, %891 : vector<2x9xf32>
    %cst_59 = arith.constant 5.000000e-01 : f32
    %894 = vector.broadcast %cst_59 : f32 to vector<2x9xf32>
    %895 = arith.addf %893, %894 : vector<2x9xf32>
    %896 = vector.extract_strided_slice %890 {offsets = [0, 9], sizes = [2, 3], strides = [1, 1]} : vector<2x24xf32> to vector<2x3xf32>
    %897 = vector.extract_strided_slice %895 {offsets = [0, 3], sizes = [2, 3], strides = [1, 1]} : vector<2x9xf32> to vector<2x3xf32>
    %898 = arith.mulf %897, %874 : vector<2x3xf32>
    %899 = vector.extract_strided_slice %895 {offsets = [0, 0], sizes = [2, 3], strides = [1, 1]} : vector<2x9xf32> to vector<2x3xf32>
    %900 = arith.mulf %899, %896 : vector<2x3xf32>
    %901 = arith.addf %898, %900 : vector<2x3xf32>
    %902 = vector.extract_strided_slice %895 {offsets = [0, 6], sizes = [2, 3], strides = [1, 1]} : vector<2x9xf32> to vector<2x3xf32>
    %903 = math.tanh %901 : vector<2x3xf32>
    %904 = arith.mulf %902, %903 : vector<2x3xf32>
    %905 = vector.extract_strided_slice %904 {offsets = [0, 0], sizes = [2, 1], strides = [1, 1]} : vector<2x3xf32> to vector<2x1xf32>
    %906 = vector.broadcast %905 : vector<2x1xf32> to vector<2x24xf32>
    %907 = arith.mulf %906, %62 : vector<2x24xf32>
    %908 = arith.addf %732, %907 : vector<2x24xf32>
    %909 = vector.extract_strided_slice %904 {offsets = [0, 1], sizes = [2, 1], strides = [1, 1]} : vector<2x3xf32> to vector<2x1xf32>
    %910 = vector.broadcast %909 : vector<2x1xf32> to vector<2x24xf32>
    %911 = arith.mulf %910, %65 : vector<2x24xf32>
    %912 = arith.addf %908, %911 : vector<2x24xf32>
    %913 = vector.extract_strided_slice %904 {offsets = [0, 2], sizes = [2, 1], strides = [1, 1]} : vector<2x3xf32> to vector<2x1xf32>
    %914 = vector.broadcast %913 : vector<2x1xf32> to vector<2x24xf32>
    %915 = arith.mulf %914, %68 : vector<2x24xf32>
    %916 = arith.addf %912, %915 : vector<2x24xf32>
    %917 = math.tanh %916 : vector<2x24xf32>
    %918 = vector.extract_strided_slice %917 {offsets = [0, 0], sizes = [2, 9], strides = [1, 1]} : vector<2x24xf32> to vector<2x9xf32>
    %cst_60 = arith.constant 5.000000e-01 : f32
    %919 = vector.broadcast %cst_60 : f32 to vector<2x9xf32>
    %920 = arith.mulf %919, %918 : vector<2x9xf32>
    %cst_61 = arith.constant 5.000000e-01 : f32
    %921 = vector.broadcast %cst_61 : f32 to vector<2x9xf32>
    %922 = arith.addf %920, %921 : vector<2x9xf32>
    %923 = vector.extract_strided_slice %917 {offsets = [0, 9], sizes = [2, 3], strides = [1, 1]} : vector<2x24xf32> to vector<2x3xf32>
    %924 = vector.extract_strided_slice %922 {offsets = [0, 3], sizes = [2, 3], strides = [1, 1]} : vector<2x9xf32> to vector<2x3xf32>
    %925 = arith.mulf %924, %901 : vector<2x3xf32>
    %926 = vector.extract_strided_slice %922 {offsets = [0, 0], sizes = [2, 3], strides = [1, 1]} : vector<2x9xf32> to vector<2x3xf32>
    %927 = arith.mulf %926, %923 : vector<2x3xf32>
    %928 = arith.addf %925, %927 : vector<2x3xf32>
    %929 = vector.extract_strided_slice %922 {offsets = [0, 6], sizes = [2, 3], strides = [1, 1]} : vector<2x9xf32> to vector<2x3xf32>
    %930 = math.tanh %928 : vector<2x3xf32>
    %931 = arith.mulf %929, %930 : vector<2x3xf32>
    %932 = vector.extract_strided_slice %931 {offsets = [0, 0], sizes = [2, 1], strides = [1, 1]} : vector<2x3xf32> to vector<2x1xf32>
    %933 = vector.broadcast %932 : vector<2x1xf32> to vector<2x24xf32>
    %934 = arith.mulf %933, %62 : vector<2x24xf32>
    %935 = arith.addf %756, %934 : vector<2x24xf32>
    %936 = vector.extract_strided_slice %931 {offsets = [0, 1], sizes = [2, 1], strides = [1, 1]} : vector<2x3xf32> to vector<2x1xf32>
    %937 = vector.broadcast %936 : vector<2x1xf32> to vector<2x24xf32>
    %938 = arith.mulf %937, %65 : vector<2x24xf32>
    %939 = arith.addf %935, %938 : vector<2x24xf32>
    %940 = vector.extract_strided_slice %931 {offsets = [0, 2], sizes = [2, 1], strides = [1, 1]} : vector<2x3xf32> to vector<2x1xf32>
    %941 = vector.broadcast %940 : vector<2x1xf32> to vector<2x24xf32>
    %942 = arith.mulf %941, %68 : vector<2x24xf32>
    %943 = arith.addf %939, %942 : vector<2x24xf32>
    %944 = math.tanh %943 : vector<2x24xf32>
    %945 = vector.extract_strided_slice %944 {offsets = [0, 0], sizes = [2, 9], strides = [1, 1]} : vector<2x24xf32> to vector<2x9xf32>
    %cst_62 = arith.constant 5.000000e-01 : f32
    %946 = vector.broadcast %cst_62 : f32 to vector<2x9xf32>
    %947 = arith.mulf %946, %945 : vector<2x9xf32>
    %cst_63 = arith.constant 5.000000e-01 : f32
    %948 = vector.broadcast %cst_63 : f32 to vector<2x9xf32>
    %949 = arith.addf %947, %948 : vector<2x9xf32>
    %950 = vector.extract_strided_slice %944 {offsets = [0, 9], sizes = [2, 3], strides = [1, 1]} : vector<2x24xf32> to vector<2x3xf32>
    %951 = vector.extract_strided_slice %949 {offsets = [0, 3], sizes = [2, 3], strides = [1, 1]} : vector<2x9xf32> to vector<2x3xf32>
    %952 = arith.mulf %951, %928 : vector<2x3xf32>
    %953 = vector.extract_strided_slice %949 {offsets = [0, 0], sizes = [2, 3], strides = [1, 1]} : vector<2x9xf32> to vector<2x3xf32>
    %954 = arith.mulf %953, %950 : vector<2x3xf32>
    %955 = arith.addf %952, %954 : vector<2x3xf32>
    %956 = vector.extract_strided_slice %949 {offsets = [0, 6], sizes = [2, 3], strides = [1, 1]} : vector<2x9xf32> to vector<2x3xf32>
    %957 = math.tanh %955 : vector<2x3xf32>
    %958 = arith.mulf %956, %957 : vector<2x3xf32>
    %959 = vector.extract_strided_slice %958 {offsets = [0, 0], sizes = [2, 1], strides = [1, 1]} : vector<2x3xf32> to vector<2x1xf32>
    %960 = vector.broadcast %959 : vector<2x1xf32> to vector<2x24xf32>
    %961 = arith.mulf %960, %62 : vector<2x24xf32>
    %962 = arith.addf %780, %961 : vector<2x24xf32>
    %963 = vector.extract_strided_slice %958 {offsets = [0, 1], sizes = [2, 1], strides = [1, 1]} : vector<2x3xf32> to vector<2x1xf32>
    %964 = vector.broadcast %963 : vector<2x1xf32> to vector<2x24xf32>
    %965 = arith.mulf %964, %65 : vector<2x24xf32>
    %966 = arith.addf %962, %965 : vector<2x24xf32>
    %967 = vector.extract_strided_slice %958 {offsets = [0, 2], sizes = [2, 1], strides = [1, 1]} : vector<2x3xf32> to vector<2x1xf32>
    %968 = vector.broadcast %967 : vector<2x1xf32> to vector<2x24xf32>
    %969 = arith.mulf %968, %68 : vector<2x24xf32>
    %970 = arith.addf %966, %969 : vector<2x24xf32>
    %971 = math.tanh %970 : vector<2x24xf32>
    %972 = vector.extract_strided_slice %971 {offsets = [0, 0], sizes = [2, 9], strides = [1, 1]} : vector<2x24xf32> to vector<2x9xf32>
    %cst_64 = arith.constant 5.000000e-01 : f32
    %973 = vector.broadcast %cst_64 : f32 to vector<2x9xf32>
    %974 = arith.mulf %973, %972 : vector<2x9xf32>
    %cst_65 = arith.constant 5.000000e-01 : f32
    %975 = vector.broadcast %cst_65 : f32 to vector<2x9xf32>
    %976 = arith.addf %974, %975 : vector<2x9xf32>
    %977 = vector.extract_strided_slice %971 {offsets = [0, 9], sizes = [2, 3], strides = [1, 1]} : vector<2x24xf32> to vector<2x3xf32>
    %978 = vector.extract_strided_slice %976 {offsets = [0, 3], sizes = [2, 3], strides = [1, 1]} : vector<2x9xf32> to vector<2x3xf32>
    %979 = arith.mulf %978, %955 : vector<2x3xf32>
    %980 = vector.extract_strided_slice %976 {offsets = [0, 0], sizes = [2, 3], strides = [1, 1]} : vector<2x9xf32> to vector<2x3xf32>
    %981 = arith.mulf %980, %977 : vector<2x3xf32>
    %982 = arith.addf %979, %981 : vector<2x3xf32>
    %983 = vector.extract_strided_slice %976 {offsets = [0, 6], sizes = [2, 3], strides = [1, 1]} : vector<2x9xf32> to vector<2x3xf32>
    %984 = math.tanh %982 : vector<2x3xf32>
    %985 = arith.mulf %983, %984 : vector<2x3xf32>
    %986 = vector.extract_strided_slice %587 {offsets = [0, 0], sizes = [2, 1], strides = [1, 1]} : vector<2x3xf32> to vector<2x1xf32>
    %987 = vector.broadcast %986 : vector<2x1xf32> to vector<2x24xf32>
    %988 = arith.mulf %987, %74 : vector<2x24xf32>
    %989 = arith.addf %71, %988 : vector<2x24xf32>
    %990 = vector.extract_strided_slice %133 {offsets = [0, 0], sizes = [2, 1], strides = [1, 1]} : vector<2x3xf32> to vector<2x1xf32>
    %991 = vector.broadcast %990 : vector<2x1xf32> to vector<2x24xf32>
    %992 = arith.mulf %991, %83 : vector<2x24xf32>
    %993 = arith.addf %989, %992 : vector<2x24xf32>
    %994 = vector.extract_strided_slice %587 {offsets = [0, 1], sizes = [2, 1], strides = [1, 1]} : vector<2x3xf32> to vector<2x1xf32>
    %995 = vector.broadcast %994 : vector<2x1xf32> to vector<2x24xf32>
    %996 = arith.mulf %995, %77 : vector<2x24xf32>
    %997 = arith.addf %993, %996 : vector<2x24xf32>
    %998 = vector.extract_strided_slice %133 {offsets = [0, 1], sizes = [2, 1], strides = [1, 1]} : vector<2x3xf32> to vector<2x1xf32>
    %999 = vector.broadcast %998 : vector<2x1xf32> to vector<2x24xf32>
    %1000 = arith.mulf %999, %86 : vector<2x24xf32>
    %1001 = arith.addf %997, %1000 : vector<2x24xf32>
    %1002 = vector.extract_strided_slice %587 {offsets = [0, 2], sizes = [2, 1], strides = [1, 1]} : vector<2x3xf32> to vector<2x1xf32>
    %1003 = vector.broadcast %1002 : vector<2x1xf32> to vector<2x24xf32>
    %1004 = arith.mulf %1003, %80 : vector<2x24xf32>
    %1005 = arith.addf %1001, %1004 : vector<2x24xf32>
    %1006 = vector.extract_strided_slice %133 {offsets = [0, 2], sizes = [2, 1], strides = [1, 1]} : vector<2x3xf32> to vector<2x1xf32>
    %1007 = vector.broadcast %1006 : vector<2x1xf32> to vector<2x24xf32>
    %1008 = arith.mulf %1007, %89 : vector<2x24xf32>
    %1009 = arith.addf %1005, %1008 : vector<2x24xf32>
    %1010 = math.tanh %1009 : vector<2x24xf32>
    %1011 = vector.extract_strided_slice %1010 {offsets = [0, 0], sizes = [2, 9], strides = [1, 1]} : vector<2x24xf32> to vector<2x9xf32>
    %cst_66 = arith.constant 5.000000e-01 : f32
    %1012 = vector.broadcast %cst_66 : f32 to vector<2x9xf32>
    %1013 = arith.mulf %1012, %1011 : vector<2x9xf32>
    %cst_67 = arith.constant 5.000000e-01 : f32
    %1014 = vector.broadcast %cst_67 : f32 to vector<2x9xf32>
    %1015 = arith.addf %1013, %1014 : vector<2x9xf32>
    %1016 = vector.extract_strided_slice %1010 {offsets = [0, 9], sizes = [2, 3], strides = [1, 1]} : vector<2x24xf32> to vector<2x3xf32>
    %1017 = vector.extract_strided_slice %1015 {offsets = [0, 3], sizes = [2, 3], strides = [1, 1]} : vector<2x9xf32> to vector<2x3xf32>
    %1018 = arith.mulf %1017, %781 : vector<2x3xf32>
    %1019 = vector.extract_strided_slice %1015 {offsets = [0, 0], sizes = [2, 3], strides = [1, 1]} : vector<2x9xf32> to vector<2x3xf32>
    %1020 = arith.mulf %1019, %1016 : vector<2x3xf32>
    %1021 = arith.addf %1018, %1020 : vector<2x3xf32>
    %1022 = vector.extract_strided_slice %1015 {offsets = [0, 6], sizes = [2, 3], strides = [1, 1]} : vector<2x9xf32> to vector<2x3xf32>
    %1023 = math.tanh %1021 : vector<2x3xf32>
    %1024 = arith.mulf %1022, %1023 : vector<2x3xf32>
    %1025 = vector.extract_strided_slice %90 {offsets = [0, 0], sizes = [1, 3], strides = [1, 1]} : vector<1x24xf32> to vector<1x3xf32>
    %1026 = vector.broadcast %1025 : vector<1x3xf32> to vector<2x3xf32>
    %1027 = arith.mulf %985, %1026 : vector<2x3xf32>
    %cst_68 = arith.constant dense<0.000000e+00> : vector<2xf32>
    %1028 = vector.multi_reduction <add>, %1027, %cst_68 [1] : vector<2x3xf32> to vector<2xf32>
    %1029 = vector.shape_cast %1028 : vector<2xf32> to vector<2x1xf32>
    %1030 = vector.extract_strided_slice %90 {offsets = [0, 3], sizes = [1, 3], strides = [1, 1]} : vector<1x24xf32> to vector<1x3xf32>
    %1031 = vector.broadcast %1030 : vector<1x3xf32> to vector<2x3xf32>
    %1032 = arith.mulf %1024, %1031 : vector<2x3xf32>
    %cst_69 = arith.constant dense<0.000000e+00> : vector<2xf32>
    %1033 = vector.multi_reduction <add>, %1032, %cst_69 [1] : vector<2x3xf32> to vector<2xf32>
    %1034 = vector.shape_cast %1033 : vector<2xf32> to vector<2x1xf32>
    %1035 = arith.addf %1029, %1034 : vector<2x1xf32>
    %1036 = vector.extract_strided_slice %90 {offsets = [0, 6], sizes = [1, 1], strides = [1, 1]} : vector<1x24xf32> to vector<1x1xf32>
    %1037 = vector.broadcast %1036 : vector<1x1xf32> to vector<2x1xf32>
    %1038 = arith.addf %1035, %1037 : vector<2x1xf32>
    %1039 = math.tanh %1038 : vector<2x1xf32>
    %cst_70 = arith.constant 5.000000e-01 : f32
    %1040 = vector.broadcast %cst_70 : f32 to vector<2x1xf32>
    %1041 = arith.mulf %1040, %1039 : vector<2x1xf32>
    %cst_71 = arith.constant 5.000000e-01 : f32
    %1042 = vector.broadcast %cst_71 : f32 to vector<2x1xf32>
    %1043 = arith.addf %1041, %1042 : vector<2x1xf32>
    %c0_72 = arith.constant 0 : index
    %c0_73 = arith.constant 0 : index
    %1044 = vector.load %arg2[%c0_72, %c0_73] : memref<2x1xf32, #tpu.memory_space<vmem>>, vector<2x1xf32>
    tpu.vector_store %arg2[%c0_72, %c0_73], %1043 {strides = array<i32>} : memref<2x1xf32, #tpu.memory_space<vmem>>, vector<2x1xf32>,
    return
  }
}

</mosaic_0001>

<bundles_post_ra>
// kernel: model_forward.1
= control target key start
LH: loop header
LB: loop body
LE: loop exit
PB: predicated region body
PF: predicated region fallthrough
CT: control target
= control target key end

     0   :  { %v1488_v0 = vmov 0   ;;  %v1489_v1 = vmov 1   ;;  %v1490_v3 = vmov 21   ;;  %v1491_v4 = vmov 22   ;;  %s1494_s24 = smov 110   ;;  %s1495_s25 = smov 6   ;;  %s2277_s0 = inlined_call_operand.vmem [shape: f32[2,24], index: 0, kind: input, shape index: {}]   ;;  %s2278_s1 = inlined_call_operand.vmem [shape: f32[32,24], index: 1, kind: input, shape index: {}]   ;;  %s2279_s2 = inlined_call_operand.vmem [shape: f32[2,1], index: 2, kind: output, shape index: {}]  }
   0x1   :  { %1324 = vset.pattern.permute.xlu0 %v1488_v0  ;;  %1326 = vset.pattern.permute.xlu1 %v1489_v1  ;;  %v1535_v2 = vld [vmem:[%s2277_s0] sm:$0x3]  ;;  %v1492_v5 = vmov 2   ;;  %v1493_v6 = vmov 23   ;;  %v1562_v12 = vld [vmem:[%s2278_s1 + $0x4] ss:$0 sm:$0xff] }
   0x2   :  { %165 = vperm.xlu0 %1324, %v1535_v2   ;;  %177 = vperm.xlu1 %1326, %v1535_v2   ;;  %v1546_v7 = vld [vmem:[%s2278_s1 + $0x1] ss:$0 sm:$0xff]  ;;  %v1557_v11 = vld [vmem:[%s2278_s1] ss:$0 sm:$0xff]  ;;  %v1567_v13 = vld [vmem:[%s2278_s1 + $0x2] ss:$0 sm:$0xff] }
   0x3   :  { %v1581_v20 = vld [vmem:[%s2278_s1 + $0x3] ss:$0 sm:$0xff]  ;;  %v1586_v21 = vld [vmem:[%s2278_s1 + $0x5] ss:$0 sm:$0xff]  ;;  %v1597_v26 = vld [vmem:[%s2278_s1 + $0x6] ss:$0 sm:$0xff] }
   0x4   :  { %v1496_v37 = vmov 3   ;;  %v1497_v38 = vmov 18   ;;  %v1498_v39 = vmov 4   ;;  %v1499_v40 = vmov 19   ;;  %s1514_s23 = smov 119   ;;  %s1516_s19 = smov 122  }
   0x5   :  { %v1500_v41 = vmov 20   ;;  %v2286_v45 = vmov 12   ;;  %v1502_v47 = vmov 5   ;;  %v2290_v48 = vmov 13  }
   0x6   :  { %1325 = vset.pattern.permute.xlu0 %v1490_v3  ;;  %1327 = vset.pattern.permute.xlu1 %v1491_v4  ;;  %v2292_v51 = vmov 16   ;;  %v2296_v52 = vmov 14   ;;  %v2294_v53 = vmov 15   ;;  %v2288_v54 = vmov 17  }
   0x7   :  { %171 = vperm.xlu0 %1325, %v1535_v2   ;;  %183 = vperm.xlu1 %1327, %v1535_v2   ;;  %vm1234_vm0 = vcmask 17408   ;;  %vm1258_vm1 = vcmask 1024  }
   0xb   :  { %1328 = vset.pattern.permute.xlu1 %v1492_v5  ;;  %1329 = vset.pattern.permute.xlu0 %v1493_v6 }
   0xc   :  { %189 = vperm.xlu1 %1328, %v1535_v2   ;;  %195 = vperm.xlu0 %1329, %v1535_v2  }
  0x10   :  { %1330 = vset.pattern.permute.xlu1 %v1496_v37  ;;  %1331 = vset.pattern.permute.xlu0 %v1497_v38 }
  0x7d   :  { %v1548_v8 = vpop.permute.xlu0 %165  ;;  %v1550_v9 = vpop.permute.xlu1 %177 }
  0x7e   :  { %v168_v10 = vmul.f32 %v1546_v7, %v1548_v8  ;;  %v180_v18 = vmul.f32 %v1567_v13, %v1550_v9 }
  0x80   :  { %v169_v16 = vadd.f32 %v1557_v11, %v168_v10 }
  0x82   :  { %v1569_v14 = vpop.permute.xlu0 %171  ;;  %v1571_v15 = vpop.permute.xlu1 %183 }
  0x83   :  { %v174_v17 = vmul.f32 %v1562_v12, %v1569_v14  ;;  %v186_v23 = vmul.f32 %v1586_v21, %v1571_v15 }
  0x85   :  { %v175_v19 = vadd.f32 %v174_v17, %v169_v16  ;;  %v1650_v17 = vld [vmem:[%s2278_s1 + $0x7] ss:$0 sm:$0xff] }
  0x87   :  { %v181_v22 = vadd.f32 %v180_v18, %v175_v19  ;;  %v1590_v24 = vpop.permute.xlu1 %189  ;;  %v1592_v25 = vpop.permute.xlu0 %195 }
  0x88   :  { %v192_v27 = vmul.f32 %v1581_v20, %v1590_v24  ;;  %v198_v29 = vmul.f32 %v1597_v26, %v1592_v25 }
  0x89   :  { %v187_v28 = vadd.f32 %v186_v23, %v181_v22  ;;  %v1659_v23 = vld [vmem:[%s2278_s1 + $0x8] ss:$0 sm:$0xff] }
  0x8b   :  { %v193_v30 = vadd.f32 %v192_v27, %v187_v28 }
  0x8d   :  { %v199_v31 = vadd.f32 %v198_v29, %v193_v30  ;;  %v1666_v29 = vld [vmem:[%s2278_s1 + $0x9] ss:$0 sm:$0xff] }
  0x8f   :  { %1418 = vtanh.f32 %v199_v31 }
  0x9c   :  { %v1419_v32 = vpop.eup %1418 }
  0x9d   :  { %205 = vrot.lane.b32.xlu1 %v1419_v32, %s1494_s24  ;;  %v201_v33 = vmul.f32 0.5, %v1419_v32 }
  0x9f   :  { %v202_v34 = vadd.f32 0.5, %v201_v33 }
  0xa1   :  { %v203_v42 = vmul.f32 0.0, %v202_v34 }
 0x10f   :  { %v206_v35 = vpop.permute.xlu1 %205 }
 0x110   :  { %v208_v36 = vmul.f32 %v206_v35, %v202_v34  ;;  %v1682_v35 = vld [vmem:[%s2278_s1 + $0xb] ss:$0 sm:$0xff] }
 0x112   :  { %210 = vrot.lane.b32.xlu1 %v208_v36, %s1495_s25 }
 0x116   :  { %221 = vperm.xlu1 %1330, %v1535_v2  }
 0x11a   :  { %1332 = vset.pattern.permute.xlu1 %v1498_v39 }
 0x11b   :  { %233 = vperm.xlu1 %1332, %v1535_v2  }
 0x11f   :  { %1333 = vset.pattern.permute.xlu1 %v1499_v40 }
 0x120   :  { %239 = vperm.xlu1 %1333, %v1535_v2  }
 0x124   :  { %1335 = vset.pattern.permute.xlu1 %v1500_v41 }
 0x125   :  { %251 = vperm.xlu1 %1335, %v1535_v2  }
 0x129   :  { %1336 = vset.pattern.permute.xlu1 %v2286_v45 }
 0x184   :  { %v211_v43 = vpop.permute.xlu1 %210 }
 0x185   :  { %v1609_v44 = vadd.f32 %v211_v43, %v203_v42  ;;  %v1695_v42 = vld [vmem:[%s2278_s1 + $0xc] ss:$0 sm:$0xff] }
 0x187   :  { %1420 = vtanh.f32 %v1609_v44 }
 0x191   :  { %v1622_v55 = vpop.permute.xlu1 %221 }
 0x192   :  { %v224_v56 = vmul.f32 %v1546_v7, %v1622_v55 }
 0x194   :  { %v1421_v46 = vpop.eup %1420  ;;  %v225_v58 = vadd.f32 %v1557_v11, %v224_v56 }
 0x195   :  { %216 = vrot.lane.b32.xlu0 %v1421_v46, %s1495_s25 }
 0x196   :  { %v1631_v60 = vpop.permute.xlu1 %233 }
 0x197   :  { %v236_v61 = vmul.f32 %v1567_v13, %v1631_v60 }
 0x199   :  { %227 = vperm.xlu0 %1331, %v1535_v2  }
 0x19b   :  { %v1635_v63 = vpop.permute.xlu1 %239 }
 0x19c   :  { %v242_v1 = vmul.f32 %v1586_v21, %v1635_v63 }
 0x19d   :  { %1334 = vset.pattern.permute.xlu0 %v1502_v47 }
 0x19e   :  { %245 = vperm.xlu0 %1334, %v1535_v2  }
 0x1a0   :  { %v1643_v6 = vpop.permute.xlu1 %251 }
 0x1a1   :  { %v254_v10 = vmul.f32 %v1597_v26, %v1643_v6 }
 0x1a2   :  { %1337 = vset.pattern.permute.xlu0 %v2290_v48 }
 0x207   :  { %v217_v49 = vpop.permute.xlu0 %216 }
 0x208   :  { %v219_v50 = vmul.f32 %v217_v49, %v202_v34  ;;  %v1677_v34 = vld [vmem:[%s2278_s1 + $0xa] ss:$0 sm:$0xff] }
 0x20a   :  { %264 = vperm.xlu0 %1337, %v219_v50   ;;  %258 = vperm.xlu1 %1336, %v219_v50  }
 0x20e   :  { %1340 = vset.pattern.permute.xlu0 %v2292_v51  ;;  %1338 = vset.pattern.permute.xlu1 %v2296_v52 }
 0x20f   :  { %282 = vperm.xlu0 %1340, %v219_v50   ;;  %270 = vperm.xlu1 %1338, %v219_v50  }
 0x213   :  { %1339 = vset.pattern.permute.xlu1 %v2294_v53 }
 0x214   :  { %276 = vperm.xlu1 %1339, %v219_v50   ;;  %v1626_v57 = vpop.permute.xlu0 %227 }
 0x215   :  { %v230_v59 = vmul.f32 %v1562_v12, %v1626_v57 }
 0x217   :  { %v231_v62 = vadd.f32 %v230_v59, %v225_v58 }
 0x218   :  { %1341 = vset.pattern.permute.xlu1 %v2288_v54 }
 0x219   :  { %288 = vperm.xlu1 %1341, %v219_v50   ;;  %v237_v0 = vadd.f32 %v236_v61, %v231_v62  ;;  %v1639_v3 = vpop.permute.xlu0 %245  ;;  %v2282_v62 = vmov 6  }
 0x21a   :  { %v248_v5 = vmul.f32 %v1581_v20, %v1639_v3  ;;  %1342 = vset.pattern.permute.xlu0 %v2282_v62 }
 0x21b   :  { %v243_v4 = vadd.f32 %v242_v1, %v237_v0 }
 0x21d   :  { %1343 = vset.pattern.permute.xlu1 %v2294_v53  ;;  %v249_v16 = vadd.f32 %v248_v5, %v243_v4 }
 0x21f   :  { %v255_v19 = vadd.f32 %v254_v10, %v249_v16  ;;  %v2284_v10 = vmov 7   ;;  %v2280_v16 = vmov 8  }
 0x285   :  { %v1652_v18 = vpop.permute.xlu1 %258  ;;  %v1661_v27 = vpop.permute.xlu0 %264 }
 0x286   :  { %v261_v22 = vmul.f32 %v1650_v17, %v1652_v18  ;;  %v267_v30 = vmul.f32 %v1659_v23, %v1661_v27 }
 0x288   :  { %v262_v28 = vadd.f32 %v261_v22, %v255_v19 }
 0x28a   :  { %v1670_v31 = vpop.permute.xlu1 %270  ;;  %v268_v32 = vadd.f32 %v267_v30, %v262_v28  ;;  %v1684_v36 = vpop.permute.xlu0 %282 }
 0x28b   :  { %2317 = vst [vmem:[#allocation2_spill] sm:$0xff] %v1670_v31  ;;  %v273_v33 = vmul.f32 %v1666_v29, %v1670_v31  ;;  %2318 = vst [vmem:[#allocation3_spill] sm:$0xff] %v1684_v36  ;;  %v285_v40 = vmul.f32 %v1682_v35, %v1684_v36 }
 0x28d   :  { %v274_v38 = vadd.f32 %v273_v33, %v268_v32 }
 0x28f   :  { %v1686_v37 = vpop.permute.xlu1 %276 }
 0x290   :  { %2319 = vst [vmem:[#allocation4_spill] sm:$0xff] %v1686_v37  ;;  %v279_v39 = vmul.f32 %v1677_v34, %v1686_v37 }
 0x292   :  { %v280_v41 = vadd.f32 %v279_v39, %v274_v38 }
 0x294   :  { %v1697_v43 = vpop.permute.xlu1 %288  ;;  %v286_v46 = vadd.f32 %v285_v40, %v280_v41 }
 0x295   :  { %2320 = vst [vmem:[#allocation5_spill] sm:$0xff] %v1697_v43  ;;  %v291_v47 = vmul.f32 %v1695_v42, %v1697_v43 }
 0x297   :  { %v292_v49 = vadd.f32 %v291_v47, %v286_v46 }
 0x299   :  { %1422 = vtanh.f32 %v292_v49 }
 0x2a6   :  { %v1423_v50 = vpop.eup %1422 }
 0x2a7   :  { %298 = vrot.lane.b32.xlu1 %v1423_v50, %s1494_s24  ;;  %v294_v56 = vmul.f32 0.5, %v1423_v50 }
 0x2a9   :  { %v295_v58 = vadd.f32 0.5, %v294_v56 }
 0x2ab   :  { %v296_v0 = vmul.f32 %v295_v58, %v1609_v44 }
 0x319   :  { %v299_v59 = vpop.permute.xlu1 %298 }
 0x31a   :  { %v301_v61 = vmul.f32 %v299_v59, %v295_v58 }
 0x31c   :  { %303 = vrot.lane.b32.xlu0 %v301_v61, %s1495_s25 }
 0x320   :  { %314 = vperm.xlu0 %1342, %v1535_v2  }
 0x324   :  { %1345 = vset.pattern.permute.xlu0 %v2292_v51 }
 0x325   :  { %332 = vperm.xlu0 %1345, %v1535_v2  }
 0x329   :  { %1348 = vset.pattern.permute.xlu0 %v2286_v45 }
 0x38e   :  { %v304_v1 = vpop.permute.xlu0 %303 }
 0x38f   :  { %v1709_v4 = vadd.f32 %v304_v1, %v296_v0 }
 0x391   :  { %1424 = vtanh.f32 %v1709_v4 }
 0x39b   :  { %v1726_v22 = vpop.permute.xlu0 %314 }
 0x39c   :  { %v317_v30 = vmul.f32 %v1546_v7, %v1726_v22 }
 0x39e   :  { %v1425_v5 = vpop.eup %1424  ;;  %v318_v33 = vadd.f32 %v1557_v11, %v317_v30 }
 0x39f   :  { %309 = vrot.lane.b32.xlu1 %v1425_v5, %s1495_s25 }
 0x3a0   :  { %v1739_v41 = vpop.permute.xlu0 %332 }
 0x3a1   :  { %v335_v49 = vmul.f32 %v1586_v21, %v1739_v41 }
 0x3a3   :  { %320 = vperm.xlu1 %1343, %v1535_v2  }
 0x3a7   :  { %1344 = vset.pattern.permute.xlu1 %v2284_v10 }
 0x3a8   :  { %326 = vperm.xlu1 %1344, %v1535_v2  }
 0x3ac   :  { %1346 = vset.pattern.permute.xlu1 %v2280_v16 }
 0x3ad   :  { %338 = vperm.xlu1 %1346, %v1535_v2  }
 0x3b1   :  { %1347 = vset.pattern.permute.xlu1 %v2288_v54 }
 0x3b2   :  { %344 = vperm.xlu1 %1347, %v1535_v2  }
 0x3b6   :  { %1349 = vset.pattern.permute.xlu1 %v2290_v48 }
 0x411   :  { %v310_v44 = vpop.permute.xlu1 %309 }
 0x412   :  { %v312_v19 = vmul.f32 %v310_v44, %v295_v58 }
 0x414   :  { %357 = vperm.xlu1 %1349, %v312_v19   ;;  %351 = vperm.xlu0 %1348, %v312_v19  }
 0x418   :  { %1350 = vset.pattern.permute.xlu1 %v2296_v52  ;;  %1351 = vset.pattern.permute.xlu0 %v2294_v53 }
 0x419   :  { %363 = vperm.xlu1 %1350, %v312_v19   ;;  %369 = vperm.xlu0 %1351, %v312_v19  }
 0x41d   :  { %1352 = vset.pattern.permute.xlu1 %v2292_v51  ;;  %1355 = vset.pattern.permute.xlu0 %v2286_v45 }
 0x41e   :  { %375 = vperm.xlu1 %1352, %v312_v19   ;;  %v1728_v28 = vpop.permute.xlu1 %320 }
 0x41f   :  { %v323_v32 = vmul.f32 %v1562_v12, %v1728_v28 }
 0x421   :  { %v324_v39 = vadd.f32 %v323_v32, %v318_v33 }
 0x422   :  { %1353 = vset.pattern.permute.xlu1 %v2288_v54 }
 0x423   :  { %381 = vperm.xlu1 %1353, %v312_v19   ;;  %v1735_v38 = vpop.permute.xlu1 %326 }
 0x424   :  { %v329_v40 = vmul.f32 %v1567_v13, %v1735_v38 }
 0x426   :  { %v330_v47 = vadd.f32 %v329_v40, %v324_v39 }
 0x428   :  { %v1741_v46 = vpop.permute.xlu1 %338  ;;  %v336_v50 = vadd.f32 %v335_v49, %v330_v47 }
 0x429   :  { %v341_v56 = vmul.f32 %v1581_v20, %v1741_v46 }
 0x42b   :  { %v342_v59 = vadd.f32 %v341_v56, %v336_v50 }
 0x42d   :  { %v1747_v58 = vpop.permute.xlu1 %344 }
 0x42e   :  { %v347_v61 = vmul.f32 %v1597_v26, %v1747_v58 }
 0x430   :  { %v348_v5 = vadd.f32 %v347_v61, %v342_v59 }
 0x48f   :  { %v1751_v0 = vpop.permute.xlu0 %351  ;;  %v1753_v1 = vpop.permute.xlu1 %357 }
 0x490   :  { %2321 = vst [vmem:[#allocation6_spill] sm:$0xff] %v1751_v0  ;;  %2322 = vst [vmem:[#allocation7_spill] sm:$0xff] %v1753_v1  ;;  %v354_v44 = vmul.f32 %v1650_v17, %v1751_v0  ;;  %v360_v30 = vmul.f32 %v1659_v23, %v1753_v1 }
 0x492   :  { %v355_v19 = vadd.f32 %v354_v44, %v348_v5 }
 0x494   :  { %v361_v32 = vadd.f32 %v360_v30, %v355_v19  ;;  %v1759_v33 = vpop.permute.xlu1 %363  ;;  %v1763_v40 = vpop.permute.xlu0 %369 }
 0x495   :  { %2323 = vst [vmem:[#allocation8_spill] sm:$0xff] %v1759_v33  ;;  %v366_v39 = vmul.f32 %v1666_v29, %v1759_v33  ;;  %v372_v49 = vmul.f32 %v1677_v34, %v1763_v40 }
 0x497   :  { %v367_v47 = vadd.f32 %v366_v39, %v361_v32 }
 0x499   :  { %v1767_v50 = vpop.permute.xlu1 %375  ;;  %v373_v56 = vadd.f32 %v372_v49, %v367_v47  ;;  %v1511_v47 = vmov 9   ;;  %v1512_v49 = vmov 10  }
 0x49a   :  { %v378_v59 = vmul.f32 %v1682_v35, %v1767_v50  ;;  %1354 = vset.pattern.permute.xlu1 %v1511_v47 }
 0x49c   :  { %v379_v5 = vadd.f32 %v378_v59, %v373_v56 }
 0x49e   :  { %v1771_v61 = vpop.permute.xlu1 %381 }
 0x49f   :  { %2324 = vst [vmem:[#allocation9_spill] sm:$0xff] %v1771_v61  ;;  %v384_v44 = vmul.f32 %v1695_v42, %v1771_v61 }
 0x4a1   :  { %v385_v19 = vadd.f32 %v384_v44, %v379_v5  ;;  %v1513_v5 = vmov 11  }
 0x4a3   :  { %1426 = vtanh.f32 %v385_v19 }
 0x4b0   :  { %v1427_v30 = vpop.eup %1426 }
 0x4b1   :  { %391 = vrot.lane.b32.xlu0 %v1427_v30, %s1494_s24  ;;  %v387_v32 = vmul.f32 0.5, %v1427_v30 }
 0x4b3   :  { %v388_v39 = vadd.f32 0.5, %v387_v32 }
 0x523   :  { %v392_v16 = vpop.permute.xlu0 %391 }
 0x524   :  { %v394_v62 = vmul.f32 %v392_v16, %v388_v39 }
 0x526   :  { %396 = vrot.lane.b32.xlu1 %v394_v62, %s1495_s25  ;;  %v389_v62 = vmul.f32 %v388_v39, %v1709_v4 }
 0x52a   :  { %407 = vperm.xlu1 %1354, %v1535_v2  }
 0x52e   :  { %1356 = vset.pattern.permute.xlu1 %v1512_v49 }
 0x52f   :  { %419 = vperm.xlu1 %1356, %v1535_v2  }
 0x533   :  { %1357 = vset.pattern.permute.xlu1 %v2290_v48 }
 0x534   :  { %425 = vperm.xlu1 %1357, %v1535_v2  }
 0x538   :  { %1359 = vset.pattern.permute.xlu1 %v2296_v52 }
 0x539   :  { %437 = vperm.xlu1 %1359, %v1535_v2  }
 0x53d   :  { %1360 = vset.pattern.permute.xlu1 %v2286_v45 }
 0x598   :  { %v397_v16 = vpop.permute.xlu1 %396 }
 0x599   :  { %v1785_v56 = vadd.f32 %v397_v16, %v389_v62 }
 0x59b   :  { %1428 = vtanh.f32 %v1785_v56 }
 0x5a8   :  { %v1429_v59 = vpop.eup %1428 }
 0x5a9   :  { %402 = vrot.lane.b32.xlu0 %v1429_v59, %s1495_s25 }
 0x5ad   :  { %413 = vperm.xlu0 %1355, %v1535_v2  }
 0x5b1   :  { %1358 = vset.pattern.permute.xlu0 %v1513_v5 }
 0x5b2   :  { %431 = vperm.xlu0 %1358, %v1535_v2   ;;  %v1798_v2 = vpop.permute.xlu1 %407 }
 0x5b3   :  { %v410_v4 = vmul.f32 %v1546_v7, %v1798_v2 }
 0x5b5   :  { %v411_v32 = vadd.f32 %v1557_v11, %v410_v4 }
 0x5b6   :  { %1361 = vset.pattern.permute.xlu0 %v2290_v48  ;;  %v1804_v47 = vpop.permute.xlu1 %419 }
 0x5b7   :  { %v422_v49 = vmul.f32 %v1567_v13, %v1804_v47 }
 0x5ba   :  { %v426_v16 = vpop.permute.xlu1 %425 }
 0x5bb   :  { %v428_v5 = vmul.f32 %v1586_v21, %v426_v16 }
 0x61b   :  { %v403_v44 = vpop.permute.xlu0 %402 }
 0x61c   :  { %v405_v19 = vmul.f32 %v403_v44, %v388_v39 }
 0x61e   :  { %450 = vperm.xlu0 %1361, %v405_v19   ;;  %444 = vperm.xlu1 %1360, %v405_v19  }
 0x622   :  { %1364 = vset.pattern.permute.xlu0 %v2292_v51  ;;  %1362 = vset.pattern.permute.xlu1 %v2296_v52 }
 0x623   :  { %468 = vperm.xlu0 %1364, %v405_v19   ;;  %456 = vperm.xlu1 %1362, %v405_v19  }
 0x627   :  { %1363 = vset.pattern.permute.xlu1 %v2294_v53  ;;  %1366 = vset.pattern.permute.xlu0 %v2286_v45  ;;  %v438_v45 = vpop.permute.xlu1 %437 }
 0x628   :  { %462 = vperm.xlu1 %1363, %v405_v19   ;;  %v414_v30 = vpop.permute.xlu0 %413  ;;  %v440_v4 = vmul.f32 %v1597_v26, %v438_v45  ;;  %v507_v1 = vmul.f32 %v1581_v20, %v438_v45 }
 0x629   :  { %v416_v39 = vmul.f32 %v1562_v12, %v414_v30 }
 0x62b   :  { %v417_v62 = vadd.f32 %v416_v39, %v411_v32 }
 0x62c   :  { %1365 = vset.pattern.permute.xlu1 %v2288_v54 }
 0x62d   :  { %474 = vperm.xlu1 %1365, %v405_v19   ;;  %v423_v59 = vadd.f32 %v422_v49, %v417_v62  ;;  %v1809_v44 = vpop.permute.xlu0 %431 }
 0x62e   :  { %v434_v10 = vmul.f32 %v1581_v20, %v1809_v44  ;;  %v509_v0 = vmul.f32 %v1597_v26, %v1809_v44 }
 0x62f   :  { %v429_v19 = vadd.f32 %v428_v5, %v423_v59 }
 0x631   :  { %1367 = vset.pattern.permute.xlu1 %v2290_v48  ;;  %v435_v54 = vadd.f32 %v434_v10, %v429_v19 }
 0x633   :  { %v441_v51 = vadd.f32 %v440_v4, %v435_v54 }
 0x699   :  { %v1814_v48 = vpop.permute.xlu1 %444  ;;  %v1818_v39 = vpop.permute.xlu0 %450 }
 0x69a   :  { %v447_v32 = vmul.f32 %v1650_v17, %v1814_v48  ;;  %v453_v62 = vmul.f32 %v1659_v23, %v1818_v39 }
 0x69c   :  { %v448_v49 = vadd.f32 %v447_v32, %v441_v51 }
 0x69e   :  { %v1822_v59 = vpop.permute.xlu1 %456  ;;  %v454_v5 = vadd.f32 %v453_v62, %v448_v49  ;;  %v1826_v52 = vpop.permute.xlu0 %468 }
 0x69f   :  { %2325 = vst [vmem:[#allocation10_spill] sm:$0xff] %v1822_v59  ;;  %v459_v53 = vmul.f32 %v1666_v29, %v1822_v59  ;;  %v471_v51 = vmul.f32 %v1682_v35, %v1826_v52 }
 0x6a1   :  { %v460_v54 = vadd.f32 %v459_v53, %v454_v5 }
 0x6a3   :  { %v1828_v10 = vpop.permute.xlu1 %462 }
 0x6a4   :  { %v465_v19 = vmul.f32 %v1677_v34, %v1828_v10 }
 0x6a6   :  { %v466_v4 = vadd.f32 %v465_v19, %v460_v54 }
 0x6a8   :  { %v1834_v32 = vpop.permute.xlu1 %474  ;;  %v472_v43 = vadd.f32 %v471_v51, %v466_v4 }
 0x6a9   :  { %2326 = vst [vmem:[#allocation11_spill] sm:$0xff] %v1834_v32  ;;  %v477_v49 = vmul.f32 %v1695_v42, %v1834_v32 }
 0x6ab   :  { %v478_v62 = vadd.f32 %v477_v49, %v472_v43  ;;  %v2327_v49 = vmov 14  }
 0x6ad   :  { %1430 = vtanh.f32 %v478_v62  ;;  %v499_v62 = vmul.f32 %v1546_v7, %v414_v30 }
 0x6ba   :  { %v1431_v36 = vpop.eup %1430 }
 0x6bb   :  { %484 = vrot.lane.b32.xlu1 %v1431_v36, %s1494_s24  ;;  %v480_v37 = vmul.f32 0.5, %v1431_v36  ;;  %v2328_v36 = vmov 15  }
 0x6bd   :  { %v481_v53 = vadd.f32 0.5, %v480_v37  ;;  %v2329_v37 = vmov 16  }
 0x6bf   :  { %v482_v59 = vmul.f32 %v481_v53, %v1785_v56  ;;  %v2331_v56 = vmov 17  }
 0x72d   :  { %v485_v5 = vpop.permute.xlu1 %484 }
 0x72e   :  { %v487_v61 = vmul.f32 %v485_v5, %v481_v53  ;;  %v500_v5 = vadd.f32 %v1557_v11, %v499_v62 }
 0x730   :  { %489 = vrot.lane.b32.xlu0 %v487_v61, %s1495_s25  ;;  %v2330_v61 = vmov 13  }
 0x7a2   :  { %v490_v54 = vpop.permute.xlu0 %489 }
 0x7a3   :  { %v492_v19 = vadd.f32 %v490_v54, %v482_v59  ;;  %v2332_v59 = vmov 12  }
 0x7a5   :  { %1432 = vtanh.f32 %v492_v19 }
 0x7b2   :  { %v1433_v51 = vpop.eup %1432 }
 0x7b3   :  { %495 = vrot.lane.b32.xlu1 %v1433_v51, %s1495_s25  ;;  %v503_v51 = vmul.f32 %v1567_v13, %v426_v16 }
 0x825   :  { %v496_v4 = vpop.permute.xlu1 %495 }
 0x826   :  { %v498_v43 = vmul.f32 %v496_v4, %v481_v53  ;;  %v501_v53 = vmul.f32 %v1562_v12, %v1798_v2  ;;  %v505_v4 = vmul.f32 %v1586_v21, %v1804_v47 }
 0x828   :  { %519 = vperm.xlu1 %1367, %v498_v43   ;;  %513 = vperm.xlu0 %1366, %v498_v43   ;;  %v502_v54 = vadd.f32 %v501_v53, %v500_v5 }
 0x82a   :  { %v504_v32 = vadd.f32 %v503_v51, %v502_v54 }
 0x82c   :  { %1368 = vset.pattern.permute.xlu1 %v2327_v49  ;;  %1369 = vset.pattern.permute.xlu0 %v2328_v36  ;;  %v506_v33 = vadd.f32 %v505_v4, %v504_v32 }
 0x82d   :  { %525 = vperm.xlu1 %1368, %v498_v43   ;;  %531 = vperm.xlu0 %1369, %v498_v43  }
 0x831   :  { %1370 = vset.pattern.permute.xlu1 %v2329_v37  ;;  %1373 = vset.pattern.permute.xlu0 %v2330_v61 }
 0x832   :  { %537 = vperm.xlu1 %1370, %v498_v43  }
 0x836   :  { %1371 = vset.pattern.permute.xlu1 %v2331_v56 }
 0x837   :  { %543 = vperm.xlu1 %1371, %v498_v43   ;;  %v508_v43 = vadd.f32 %v507_v1, %v506_v33 }
 0x839   :  { %v510_v2 = vadd.f32 %v509_v0, %v508_v43 }
 0x83b   :  { %1372 = vset.pattern.permute.xlu1 %v2332_v59 }
 0x8a3   :  { %v1858_v30 = vpop.permute.xlu1 %519  ;;  %v1860_v31 = vpop.permute.xlu0 %513 }
 0x8a4   :  { %v516_v62 = vmul.f32 %v1650_v17, %v1860_v31  ;;  %v522_v16 = vmul.f32 %v1659_v23, %v1858_v30 }
 0x8a6   :  { %v517_v47 = vadd.f32 %v516_v62, %v510_v2 }
 0x8a8   :  { %v523_v53 = vadd.f32 %v522_v16, %v517_v47  ;;  %v1866_v32 = vpop.permute.xlu1 %525  ;;  %v1870_v1 = vpop.permute.xlu0 %531 }
 0x8a9   :  { %v528_v45 = vmul.f32 %v1666_v29, %v1866_v32  ;;  %v534_v44 = vmul.f32 %v1677_v34, %v1870_v1 }
 0x8ab   :  { %v529_v33 = vadd.f32 %v528_v45, %v523_v53 }
 0x8ad   :  { %v1874_v0 = vpop.permute.xlu1 %537  ;;  %v535_v5 = vadd.f32 %v534_v44, %v529_v33 }
 0x8ae   :  { %2333 = vst [vmem:[#allocation12_spill] sm:$0xff] %v1874_v0  ;;  %v540_v54 = vmul.f32 %v1682_v35, %v1874_v0 }
 0x8b0   :  { %v541_v4 = vadd.f32 %v540_v54, %v535_v5 }
 0x8b2   :  { %v1878_v51 = vpop.permute.xlu1 %543 }
 0x8b3   :  { %2334 = vst [vmem:[#allocation13_spill] sm:$0xff] %v1878_v51  ;;  %v546_v43 = vmul.f32 %v1695_v42, %v1878_v51 }
 0x8b5   :  { %v547_v2 = vadd.f32 %v546_v43, %v541_v4 }
 0x8b7   :  { %1434 = vtanh.f32 %v547_v2  ;;  %v570_v2 = vmul.f32 %v1562_v12, %v1726_v22 }
 0x8c4   :  { %v1435_v62 = vpop.eup %1434 }
 0x8c5   :  { %553 = vrot.lane.b32.xlu0 %v1435_v62, %s1494_s24  ;;  %v549_v16 = vmul.f32 0.5, %v1435_v62 }
 0x8c7   :  { %v550_v47 = vadd.f32 0.5, %v549_v16  ;;  %v572_v16 = vmul.f32 %v1567_v13, %v1739_v41 }
 0x8c9   :  { %v551_v33 = vmul.f32 %v550_v47, %v492_v19  ;;  %v568_v19 = vmul.f32 %v1546_v7, %v1728_v28  ;;  %v578_v28 = vmul.f32 %v1597_v26, %v1741_v46 }
 0x8cb   :  { %v569_v43 = vadd.f32 %v1557_v11, %v568_v19 }
 0x8cd   :  { %v571_v62 = vadd.f32 %v570_v2, %v569_v43 }
 0x937   :  { %v554_v53 = vpop.permute.xlu0 %553 }
 0x938   :  { %v556_v45 = vmul.f32 %v554_v53, %v550_v47  ;;  %v573_v53 = vadd.f32 %v572_v16, %v571_v62  ;;  %v1929_v62 = vld [vmem:[%s2278_s1 + $0x11] ss:$0 sm:$0xff]  ;;  %v1934_v16 = vld [vmem:[%s2278_s1 + $0xd] ss:$0 sm:$0xff] }
 0x93a   :  { %558 = vrot.lane.b32.xlu1 %v556_v45, %s1495_s25 }
 0x9ac   :  { %v559_v44 = vpop.permute.xlu1 %558 }
 0x9ad   :  { %v1884_v0 = vadd.f32 %v559_v44, %v551_v33  ;;  %v576_v33 = vmul.f32 %v1581_v20, %v1747_v58  ;;  %v1920_v58 = vld [vmem:[%s2278_s1 + $0xe] ss:$0 sm:$0xff] }
 0x9ae   :  { %v824_v46 = vmul.f32 %v1920_v58, %v1860_v31 }
 0x9af   :  { %1436 = vtanh.f32 %v1884_v0 }
 0x9bc   :  { %v1437_v5 = vpop.eup %1436 }
 0x9bd   :  { %564 = vrot.lane.b32.xlu0 %v1437_v5, %s1495_s25 }
 0xa2f   :  { %v565_v54 = vpop.permute.xlu0 %564 }
 0xa30   :  { %v567_v4 = vmul.f32 %v565_v54, %v550_v47  ;;  %v574_v47 = vmul.f32 %v1586_v21, %v1735_v38 }
 0xa32   :  { %588 = vperm.xlu0 %1373, %v567_v4   ;;  %582 = vperm.xlu1 %1372, %v567_v4   ;;  %v575_v45 = vadd.f32 %v574_v47, %v573_v53 }
 0xa34   :  { %v577_v44 = vadd.f32 %v576_v33, %v575_v45  ;;  %v825_v45 = vadd.f32 %v1934_v16, %v824_v46 }
 0xa36   :  { %1376 = vset.pattern.permute.xlu0 %v2329_v37  ;;  %1374 = vset.pattern.permute.xlu1 %v2327_v49  ;;  %v579_v54 = vadd.f32 %v578_v28, %v577_v44 }
 0xa37   :  { %606 = vperm.xlu0 %1376, %v567_v4   ;;  %594 = vperm.xlu1 %1374, %v567_v4  }
 0xa3b   :  { %1375 = vset.pattern.permute.xlu1 %v2328_v36  ;;  %1378 = vset.pattern.permute.xlu0 %v2332_v59 }
 0xa3c   :  { %600 = vperm.xlu1 %1375, %v567_v4  }
 0xa40   :  { %1377 = vset.pattern.permute.xlu1 %v2331_v56 }
 0xa41   :  { %612 = vperm.xlu1 %1377, %v567_v4  }
 0xa45   :  { %1379 = vset.pattern.permute.xlu1 %v2330_v61 }
 0xaad   :  { %v1907_v5 = vpop.permute.xlu1 %582  ;;  %v1911_v4 = vpop.permute.xlu0 %588 }
 0xaae   :  { %v585_v22 = vmul.f32 %v1650_v17, %v1907_v5  ;;  %2335 = vst [vmem:[#allocation14_spill] sm:$0xff] %v1911_v4  ;;  %v591_v38 = vmul.f32 %v1659_v23, %v1911_v4 }
 0xab0   :  { %v586_v41 = vadd.f32 %v585_v22, %v579_v54 }
 0xab2   :  { %v1915_v19 = vpop.permute.xlu1 %594  ;;  %v592_v43 = vadd.f32 %v591_v38, %v586_v41  ;;  %v1936_v47 = vpop.permute.xlu0 %606 }
 0xab3   :  { %2336 = vst [vmem:[#allocation15_spill] sm:$0xff] %v1915_v19  ;;  %v597_v2 = vmul.f32 %v1666_v29, %v1915_v19  ;;  %v609_v44 = vmul.f32 %v1682_v35, %v1936_v47 }
 0xab5   :  { %v598_v31 = vadd.f32 %v597_v2, %v592_v43 }
 0xab7   :  { %v601_v53 = vpop.permute.xlu1 %600 }
 0xab8   :  { %v603_v33 = vmul.f32 %v1677_v34, %v601_v53  ;;  %v826_v28 = vmul.f32 %v1929_v62, %v601_v53 }
 0xaba   :  { %v604_v54 = vadd.f32 %v603_v33, %v598_v31  ;;  %v1943_v22 = vadd.f32 %v826_v28, %v825_v45 }
 0xabc   :  { %v610_v41 = vadd.f32 %v609_v44, %v604_v54  ;;  %v1945_v38 = vpop.permute.xlu1 %612 }
 0xabd   :  { %v615_v51 = vmul.f32 %v1695_v42, %v1945_v38 }
 0xabf   :  { %v616_v19 = vadd.f32 %v615_v51, %v610_v41  ;;  %v641_v41 = vmul.f32 %v1567_v13, %v1635_v63  ;;  %v812_v63 = vmul.f32 %v1920_v58, %v1814_v48  ;;  %v1992_v48 = vld [vmem:[%s2278_s1 + $0x12] ss:$0 sm:$0xff] }
 0xac1   :  { %1438 = vtanh.f32 %v616_v19 }
 0xace   :  { %v1439_v46 = vpop.eup %1438 }
 0xacf   :  { %622 = vrot.lane.b32.xlu1 %v1439_v46, %s1494_s24  ;;  %v618_v43 = vmul.f32 0.5, %v1439_v46  ;;  %v643_v46 = vmul.f32 %v1586_v21, %v1631_v60  ;;  %v850_v60 = vmul.f32 %v1929_v62, %v1828_v10  ;;  %v813_v10 = vadd.f32 %v1934_v16, %v812_v63 }
 0xad1   :  { %v619_v2 = vadd.f32 0.5, %v618_v43 }
 0xad3   :  { %v620_v45 = vmul.f32 %v619_v2, %v1884_v0  ;;  %v637_v0 = vmul.f32 %v1546_v7, %v1626_v57  ;;  %v647_v57 = vmul.f32 %v1597_v26, %v1639_v3  ;;  %v1986_v3 = vld [vmem:[%s2278_s1 + $0xf] ss:$0 sm:$0xff] }
 0xad5   :  { %v638_v44 = vadd.f32 %v1557_v11, %v637_v0 }
 0xb41   :  { %v623_v53 = vpop.permute.xlu1 %622 }
 0xb42   :  { %v625_v4 = vmul.f32 %v623_v53, %v619_v2  ;;  %v645_v53 = vmul.f32 %v1581_v20, %v1643_v6 }
 0xb44   :  { %627 = vrot.lane.b32.xlu0 %v625_v4, %s1495_s25  ;;  %v639_v4 = vmul.f32 %v1562_v12, %v1622_v55 }
 0xb46   :  { %v640_v54 = vadd.f32 %v639_v4, %v638_v44 }
 0xb48   :  { %v642_v43 = vadd.f32 %v641_v41, %v640_v54 }
 0xbb6   :  { %v628_v31 = vpop.permute.xlu0 %627 }
 0xbb7   :  { %v1952_v33 = vadd.f32 %v628_v31, %v620_v45 }
 0xbb9   :  { %1440 = vtanh.f32 %v1952_v33 }
 0xbc6   :  { %v1441_v28 = vpop.eup %1440 }
 0xbc7   :  { %633 = vrot.lane.b32.xlu1 %v1441_v28, %s1495_s25 }
 0xc39   :  { %v634_v51 = vpop.permute.xlu1 %633 }
 0xc3a   :  { %v636_v19 = vmul.f32 %v634_v51, %v619_v2  ;;  %v644_v2 = vadd.f32 %v643_v46, %v642_v43 }
 0xc3c   :  { %657 = vperm.xlu1 %1379, %v636_v19   ;;  %651 = vperm.xlu0 %1378, %v636_v19   ;;  %v646_v45 = vadd.f32 %v645_v53, %v644_v2 }
 0xc3e   :  { %v648_v28 = vadd.f32 %v647_v57, %v646_v45  ;;  %v854_v45 = vmul.f32 %v1992_v48, %v1826_v52 }
 0xc40   :  { %1380 = vset.pattern.permute.xlu1 %v2327_v49  ;;  %1381 = vset.pattern.permute.xlu0 %v2328_v36 }
 0xc41   :  { %663 = vperm.xlu1 %1380, %v636_v19   ;;  %669 = vperm.xlu0 %1381, %v636_v19  }
 0xc45   :  { %1382 = vset.pattern.permute.xlu1 %v2329_v37  ;;  %1385 = vset.pattern.permute.xlu0 %v2330_v61 }
 0xc46   :  { %675 = vperm.xlu1 %1382, %v636_v19  }
 0xc4a   :  { %1383 = vset.pattern.permute.xlu1 %v2331_v56 }
 0xc4b   :  { %681 = vperm.xlu1 %1383, %v636_v19  }
 0xc4f   :  { %1384 = vset.pattern.permute.xlu1 %v2332_v59 }
 0xcb7   :  { %v658_v31 = vpop.permute.xlu1 %657  ;;  %v652_v55 = vpop.permute.xlu0 %651 }
 0xcb8   :  { %v654_v51 = vmul.f32 %v1650_v17, %v652_v55  ;;  %v848_v19 = vmul.f32 %v1920_v58, %v652_v55  ;;  %v660_v0 = vmul.f32 %v1659_v23, %v658_v31  ;;  %v852_v44 = vmul.f32 %v1986_v3, %v658_v31  ;;  %v2002_v31 = vld [vmem:[%s2278_s1 + $0x10] ss:$0 sm:$0xff] }
 0xcb9   :  { %v816_v55 = vmul.f32 %v1986_v3, %v1818_v39 }
 0xcba   :  { %v655_v6 = vadd.f32 %v654_v51, %v648_v28  ;;  %v849_v4 = vadd.f32 %v1934_v16, %v848_v19 }
 0xcbc   :  { %v851_v54 = vadd.f32 %v850_v60, %v849_v4  ;;  %v664_v41 = vpop.permute.xlu1 %663  ;;  %v661_v46 = vadd.f32 %v660_v0, %v655_v6  ;;  %v670_v43 = vpop.permute.xlu0 %669 }
 0xcbd   :  { %v666_v2 = vmul.f32 %v1666_v29, %v664_v41  ;;  %v814_v53 = vmul.f32 %v1929_v62, %v670_v43  ;;  %v856_v63 = vmul.f32 %v2002_v31, %v664_v41  ;;  %v672_v60 = vmul.f32 %v1677_v34, %v670_v43 }
 0xcbe   :  { %v853_v57 = vadd.f32 %v852_v44, %v851_v54 }
 0xcbf   :  { %v667_v28 = vadd.f32 %v666_v2, %v661_v46  ;;  %v815_v51 = vadd.f32 %v814_v53, %v813_v10 }
 0xcc0   :  { %v855_v19 = vadd.f32 %v854_v45, %v853_v57 }
 0xcc1   :  { %v676_v0 = vpop.permute.xlu1 %675  ;;  %v817_v6 = vadd.f32 %v816_v55, %v815_v51  ;;  %v673_v44 = vadd.f32 %v672_v60, %v667_v28 }
 0xcc2   :  { %v2008_v4 = vadd.f32 %v856_v63, %v855_v19  ;;  %v818_v52 = vmul.f32 %v1992_v48, %v676_v0  ;;  %v678_v54 = vmul.f32 %v1682_v35, %v676_v0  ;;  %v708_v0 = vmul.f32 %v1562_v12, %v1548_v8 }
 0xcc4   :  { %v2012_v59 = vadd.f32 %v818_v52, %v817_v6  ;;  %v679_v39 = vadd.f32 %v678_v54, %v673_v44  ;;  %v710_v52 = vmul.f32 %v1567_v13, %v1571_v15  ;;  %v862_v13 = vmul.f32 %v1929_v62, %v1763_v40 }
 0xcc6   :  { %v2014_v61 = vpop.permute.xlu1 %681 }
 0xcc7   :  { %v684_v46 = vmul.f32 %v1695_v42, %v2014_v61 }
 0xcc9   :  { %v685_v41 = vadd.f32 %v684_v46, %v679_v39 }
 0xccb   :  { %1442 = vtanh.f32 %v685_v41 }
 0xcd8   :  { %v1443_v43 = vpop.eup %1442 }
 0xcd9   :  { %691 = vrot.lane.b32.xlu0 %v1443_v43, %s1494_s24  ;;  %v687_v10 = vmul.f32 0.5, %v1443_v43 }
 0xcdb   :  { %v688_v2 = vadd.f32 0.5, %v687_v10 }
 0xcdd   :  { %v689_v57 = vmul.f32 %v688_v2, %v1952_v33  ;;  %v706_v33 = vmul.f32 %v1546_v7, %v1569_v14  ;;  %v716_v7 = vmul.f32 %v1597_v26, %v1590_v24  ;;  %v866_v24 = vmul.f32 %v1992_v48, %v1767_v50 }
 0xcdf   :  { %v707_v60 = vadd.f32 %v1557_v11, %v706_v33 }
 0xce1   :  { %v709_v6 = vadd.f32 %v708_v0, %v707_v60 }
 0xce3   :  { %v711_v44 = vadd.f32 %v710_v52, %v709_v6 }
 0xd4b   :  { %v692_v53 = vpop.permute.xlu0 %691 }
 0xd4c   :  { %v694_v45 = vmul.f32 %v692_v53, %v688_v2 }
 0xd4e   :  { %696 = vrot.lane.b32.xlu1 %v694_v45, %s1495_s25 }
 0xdc0   :  { %v697_v55 = vpop.permute.xlu1 %696 }
 0xdc1   :  { %v2021_v28 = vadd.f32 %v697_v55, %v689_v57 }
 0xdc3   :  { %1444 = vtanh.f32 %v2021_v28 }
 0xdd0   :  { %v1445_v51 = vpop.eup %1444 }
 0xdd1   :  { %702 = vrot.lane.b32.xlu0 %v1445_v51, %s1495_s25 }
 0xe43   :  { %v703_v19 = vpop.permute.xlu0 %702 }
 0xe44   :  { %v705_v63 = vmul.f32 %v703_v19, %v688_v2 }
 0xe46   :  { %726 = vperm.xlu0 %1385, %v705_v63   ;;  %720 = vperm.xlu1 %1384, %v705_v63  }
 0xe4a   :  { %1388 = vset.pattern.permute.xlu0 %v2329_v37  ;;  %1386 = vset.pattern.permute.xlu1 %v2327_v49 }
 0xe4b   :  { %744 = vperm.xlu0 %1388, %v705_v63   ;;  %732 = vperm.xlu1 %1386, %v705_v63  }
 0xe4f   :  { %1387 = vset.pattern.permute.xlu1 %v2328_v36  ;;  %1390 = vset.pattern.permute.xlu0 %v2328_v36  ;;  %v712_v36 = vmul.f32 %v1586_v21, %v1550_v9 }
 0xe50   :  { %738 = vperm.xlu1 %1387, %v705_v63  }
 0xe51   :  { %v713_v54 = vadd.f32 %v712_v36, %v711_v44 }
 0xe54   :  { %1389 = vset.pattern.permute.xlu1 %v2331_v56 }
 0xe55   :  { %750 = vperm.xlu1 %1389, %v705_v63  }
 0xe59   :  { %1391 = vset.pattern.permute.xlu1 %v2329_v37  ;;  %v714_v37 = vmul.f32 %v1581_v20, %v1592_v25 }
 0xe5b   :  { %v715_v39 = vadd.f32 %v714_v37, %v713_v54  ;;  %v2337_v37 = vmov 7  }
 0xe5d   :  { %v717_v14 = vadd.f32 %v716_v7, %v715_v39  ;;  %v775_v39 = vmul.f32 %v1920_v58, %v1652_v18  ;;  %v2093_v18 = vld [vmem:[%s2278_s1 + $0x13] ss:$0 sm:$0xff] }
 0xec1   :  { %v721_v11 = vpop.permute.xlu1 %720  ;;  %v727_v46 = vpop.permute.xlu0 %726 }
 0xec2   :  { %v723_v8 = vmul.f32 %v1650_v17, %v721_v11  ;;  %v860_v12 = vmul.f32 %v1920_v58, %v721_v11  ;;  %v729_v21 = vmul.f32 %v1659_v23, %v727_v46  ;;  %v864_v20 = vmul.f32 %v1986_v3, %v727_v46 }
 0xec4   :  { %v724_v15 = vadd.f32 %v723_v8, %v717_v14  ;;  %v861_v9 = vadd.f32 %v1934_v16, %v860_v12  ;;  %v776_v14 = vadd.f32 %v1934_v16, %v775_v39  ;;  %v784_v12 = vmul.f32 %v1986_v3, %v1661_v27 }
 0xec6   :  { %v863_v25 = vadd.f32 %v862_v13, %v861_v9  ;;  %v733_v41 = vpop.permute.xlu1 %732  ;;  %v730_v26 = vadd.f32 %v729_v21, %v724_v15  ;;  %v2055_v40 = vpop.permute.xlu0 %744  ;;  %v2339_v9 = vld [vmem:[#allocation2_spill] sm:$0xff] }
 0xec7   :  { %v735_v43 = vmul.f32 %v1666_v29, %v733_v41  ;;  %v868_v2 = vmul.f32 %v2002_v31, %v733_v41  ;;  %v747_v50 = vmul.f32 %v1682_v35, %v2055_v40  ;;  %v792_v21 = vmul.f32 %v2002_v31, %v2339_v9 }
 0xec8   :  { %v865_v17 = vadd.f32 %v864_v20, %v863_v25 }
 0xec9   :  { %v736_v45 = vadd.f32 %v735_v43, %v730_v26 }
 0xeca   :  { %v867_v10 = vadd.f32 %v866_v24, %v865_v17 }
 0xecb   :  { %v2057_v53 = vpop.permute.xlu1 %738 }
 0xecc   :  { %v2059_v23 = vadd.f32 %v868_v2, %v867_v10  ;;  %v741_v57 = vmul.f32 %v1677_v34, %v2057_v53 }
 0xece   :  { %v742_v55 = vadd.f32 %v741_v57, %v736_v45 }
 0xed0   :  { %v748_v51 = vadd.f32 %v747_v50, %v742_v55  ;;  %v2065_v19 = vpop.permute.xlu1 %750 }
 0xed1   :  { %v753_v29 = vmul.f32 %v1695_v42, %v2065_v19 }
 0xed3   :  { %v754_v63 = vadd.f32 %v753_v29, %v748_v51  ;;  %v2340_v29 = vmov 8  }
 0xed5   :  { %1446 = vtanh.f32 %v754_v63  ;;  %v2341_v63 = vld [vmem:[#allocation6_spill] sm:$0xff] }
 0xee2   :  { %v1447_v33 = vpop.eup %1446 }
 0xee3   :  { %760 = vrot.lane.b32.xlu1 %v1447_v33, %s1494_s24  ;;  %v756_v60 = vmul.f32 0.5, %v1447_v33  ;;  %s1515_s24 = smov 3   ;;  %v800_v33 = vmul.f32 %v1920_v58, %v2341_v63  ;;  %v822_v63 = vmul.f32 %v2093_v18, %v2014_v61 }
 0xee5   :  { %v757_v0 = vadd.f32 0.5, %v756_v60  ;;  %v802_v60 = vmul.f32 %v1929_v62, %v2057_v53  ;;  %v810_v53 = vmul.f32 %v2093_v18, %v2065_v19 }
 0xee7   :  { %v758_v34 = vmul.f32 %v757_v0, %v2021_v28  ;;  %v2338_v28 = vmov 6  }
 0xf55   :  { %v761_v6 = vpop.permute.xlu1 %760 }
 0xf56   :  { %v763_v52 = vmul.f32 %v761_v6, %v757_v0 }
 0xf58   :  { %765 = vrot.lane.b32.xlu0 %v763_v52, %s1495_s25  ;;  %v2342_v52 = vld [vmem:[#allocation7_spill] sm:$0xff] }
 0xfca   :  { %v766_v35 = vpop.permute.xlu0 %765 }
 0xfcb   :  { %v768_v44 = vadd.f32 %v766_v35, %v758_v34  ;;  %v804_v34 = vmul.f32 %v1986_v3, %v2342_v52 }
 0xfcd   :  { %1448 = vtanh.f32 %v768_v44  ;;  %v806_v44 = vmul.f32 %v1992_v48, %v2055_v40 }
 0xfda   :  { %v1449_v36 = vpop.eup %1448 }
 0xfdb   :  { %771 = vrot.lane.b32.xlu1 %v1449_v36, %s1495_s25 }
0x104d   :  { %v772_v42 = vpop.permute.xlu1 %771 }
0x104e   :  { %v2073_v54 = vmul.f32 %v772_v42, %v757_v0  ;;  %v801_v0 = vadd.f32 %v1934_v16, %v800_v33  ;;  %v2343_v42 = vld [vmem:[#allocation8_spill] sm:$0xff] }
0x104f   :  { %v808_v39 = vmul.f32 %v2002_v31, %v2343_v42 }
0x1050   :  { %787 = vperm.xlu1 %1391, %v2073_v54   ;;  %779 = vperm.xlu0 %1390, %v2073_v54   ;;  %v803_v6 = vadd.f32 %v802_v60, %v801_v0 }
0x1052   :  { %v805_v35 = vadd.f32 %v804_v34, %v803_v6 }
0x1054   :  { %1392 = vset.pattern.permute.xlu1 %v2331_v56  ;;  %1394 = vset.pattern.permute.xlu0 %v2337_v37  ;;  %v807_v36 = vadd.f32 %v806_v44, %v805_v35 }
0x1055   :  { %795 = vperm.xlu1 %1392, %v2073_v54  }
0x1059   :  { %1393 = vset.pattern.permute.xlu1 %v2338_v28 }
0x10cb   :  { %v788_v7 = vpop.permute.xlu1 %787  ;;  %v780_v11 = vpop.permute.xlu0 %779 }
0x10cc   :  { %v782_v8 = vmul.f32 %v1929_v62, %v780_v11  ;;  %v790_v56 = vmul.f32 %v1992_v48, %v788_v7  ;;  %v809_v7 = vadd.f32 %v808_v39, %v807_v36  ;;  %v2116_v11 = vld [vmem:[%s2278_s1 + $0x14] ss:$0 sm:$0xff] }
0x10ce   :  { %v783_v46 = vadd.f32 %v782_v8, %v776_v14  ;;  %v2123_v14 = vld [vmem:[%s2278_s1 + $0x15] ss:$0 sm:$0xff] }
0x10d0   :  { %v785_v13 = vadd.f32 %v784_v12, %v783_v46  ;;  %v796_v15 = vpop.permute.xlu1 %795  ;;  %v811_v12 = vadd.f32 %v810_v53, %v809_v7 }
0x10d1   :  { %v798_v41 = vmul.f32 %v2093_v18, %v796_v15  ;;  %v2130_v15 = vld [vmem:[%s2278_s1 + $0x16] ss:$0 sm:$0xff] }
0x10d2   :  { %v791_v20 = vadd.f32 %v790_v56, %v785_v13 }
0x10d4   :  { %v793_v25 = vadd.f32 %v792_v21, %v791_v20 }
0x10d6   :  { %v799_v24 = vadd.f32 %v798_v41, %v793_v25 }
0x10d8   :  { %1450 = vtanh.f32 %v799_v24 }
0x10e5   :  { %v1451_v27 = vpop.eup %1450 }
0x10e6   :  { %901 = vrot.lane.b32.xlu0 %v1451_v27, %s1514_s23  ;;  %v897_v26 = vmul.f32 0.5, %v1451_v27 }
0x10e8   :  { %v898_v17 = vadd.f32 0.5, %v897_v26 }
0x10ea   :  { %v899_v2 = vmul.f32 0.0, %v898_v17 }
0x1158   :  { %v902_v43 = vpop.permute.xlu0 %901 }
0x1159   :  { %v904_v10 = vmul.f32 %v902_v43, %v898_v17 }
0x115b   :  { %906 = vrot.lane.b32.xlu1 %v904_v10, %s1515_s24 }
0x11cd   :  { %v907_v45 = vpop.permute.xlu1 %906 }
0x11ce   :  { %v909_v57 = vadd.f32 %v907_v45, %v899_v2 }
0x11d0   :  { %1452 = vtanh.f32 %v909_v57 }
0x11dd   :  { %v1453_v50 = vpop.eup %1452 }
0x11de   :  { %912 = vrot.lane.b32.xlu0 %v1453_v50, %s1515_s24 }
0x1250   :  { %v913_v55 = vpop.permute.xlu0 %912 }
0x1251   :  { %v915_v51 = vmul.f32 %v913_v55, %v898_v17  ;;  %v2344_v55 = vld [vmem:[#allocation10_spill] sm:$0xff] }
0x1253   :  { %924 = vperm.xlu0 %1394, %v915_v51   ;;  %918 = vperm.xlu1 %1393, %v915_v51  }
0x1257   :  { %1395 = vset.pattern.permute.xlu1 %v2340_v29  ;;  %1396 = vset.pattern.permute.xlu0 %v2338_v28 }
0x1258   :  { %930 = vperm.xlu1 %1395, %v915_v51  }
0x125c   :  { %1397 = vset.pattern.permute.xlu1 %v2337_v37 }
0x12ce   :  { %v925_v8 = vpop.permute.xlu0 %924  ;;  %v919_v40 = vpop.permute.xlu1 %918 }
0x12cf   :  { %v921_v46 = vmul.f32 %v2116_v11, %v919_v40  ;;  %v927_v56 = vmul.f32 %v2123_v14, %v925_v8 }
0x12d1   :  { %v922_v13 = vadd.f32 %v921_v46, %v811_v12 }
0x12d3   :  { %v928_v9 = vadd.f32 %v927_v56, %v922_v13  ;;  %v931_v19 = vpop.permute.xlu1 %930 }
0x12d4   :  { %v933_v21 = vmul.f32 %v2130_v15, %v931_v19 }
0x12d6   :  { %v934_v20 = vadd.f32 %v933_v21, %v928_v9  ;;  %v828_v9 = vmul.f32 %v1986_v3, %v1858_v30  ;;  %v830_v21 = vmul.f32 %v1992_v48, %v1936_v47 }
0x12d8   :  { %1454 = vtanh.f32 %v934_v20  ;;  %v829_v19 = vadd.f32 %v828_v9, %v1943_v22 }
0x12da   :  { %v831_v20 = vadd.f32 %v830_v21, %v829_v19 }
0x12e5   :  { %v1455_v25 = vpop.eup %1454 }
0x12e6   :  { %940 = vrot.lane.b32.xlu1 %v1455_v25, %s1514_s23  ;;  %v936_v41 = vmul.f32 0.5, %v1455_v25  ;;  %v832_v25 = vmul.f32 %v2002_v31, %v1866_v32 }
0x12e8   :  { %v937_v24 = vadd.f32 0.5, %v936_v41  ;;  %v833_v41 = vadd.f32 %v832_v25, %v831_v20 }
0x12ea   :  { %v938_v17 = vmul.f32 %v937_v24, %v909_v57  ;;  %v820_v57 = vmul.f32 %v2002_v31, %v2344_v55 }
0x12ec   :  { %v821_v51 = vadd.f32 %v820_v57, %v2012_v59 }
0x12ee   :  { %v823_v0 = vadd.f32 %v822_v63, %v821_v51 }
0x1358   :  { %v941_v27 = vpop.permute.xlu1 %940 }
0x1359   :  { %v943_v26 = vmul.f32 %v941_v27, %v937_v24 }
0x135b   :  { %945 = vrot.lane.b32.xlu0 %v943_v26, %s1515_s24 }
0x13cd   :  { %v946_v43 = vpop.permute.xlu0 %945 }
0x13ce   :  { %v948_v10 = vadd.f32 %v946_v43, %v938_v17 }
0x13d0   :  { %1456 = vtanh.f32 %v948_v10 }
0x13dd   :  { %v1457_v2 = vpop.eup %1456 }
0x13de   :  { %951 = vrot.lane.b32.xlu1 %v1457_v2, %s1515_s24 }
0x1450   :  { %v952_v45 = vpop.permute.xlu1 %951 }
0x1451   :  { %v954_v50 = vmul.f32 %v952_v45, %v937_v24  ;;  %v834_v24 = vmul.f32 %v2093_v18, %v1945_v38 }
0x1453   :  { %963 = vperm.xlu1 %1397, %v954_v50   ;;  %957 = vperm.xlu0 %1396, %v954_v50   ;;  %v835_v17 = vadd.f32 %v834_v24, %v833_v41 }
0x1457   :  { %1398 = vset.pattern.permute.xlu1 %v2340_v29  ;;  %1400 = vset.pattern.permute.xlu0 %v2337_v37 }
0x1458   :  { %969 = vperm.xlu1 %1398, %v954_v50  }
0x145c   :  { %1399 = vset.pattern.permute.xlu1 %v2338_v28 }
0x14ce   :  { %v964_v33 = vpop.permute.xlu1 %963  ;;  %v958_v60 = vpop.permute.xlu0 %957 }
0x14cf   :  { %v960_v6 = vmul.f32 %v2116_v11, %v958_v60  ;;  %v966_v52 = vmul.f32 %v2123_v14, %v964_v33 }
0x14d1   :  { %v961_v34 = vadd.f32 %v960_v6, %v823_v0 }
0x14d3   :  { %v970_v35 = vpop.permute.xlu1 %969  ;;  %v967_v44 = vadd.f32 %v966_v52, %v961_v34  ;;  %v836_v52 = vmul.f32 %v1920_v58, %v1907_v5 }
0x14d4   :  { %v972_v36 = vmul.f32 %v2130_v15, %v970_v35  ;;  %v838_v35 = vmul.f32 %v1929_v62, %v1870_v1 }
0x14d5   :  { %v837_v34 = vadd.f32 %v1934_v16, %v836_v52 }
0x14d6   :  { %v973_v42 = vadd.f32 %v972_v36, %v967_v44  ;;  %v2345_v36 = vld [vmem:[#allocation14_spill] sm:$0xff] }
0x14d7   :  { %v839_v44 = vadd.f32 %v838_v35, %v837_v34 }
0x14d8   :  { %1458 = vtanh.f32 %v973_v42  ;;  %v840_v42 = vmul.f32 %v1986_v3, %v2345_v36 }
0x14e5   :  { %v1459_v39 = vpop.eup %1458 }
0x14e6   :  { %979 = vrot.lane.b32.xlu0 %v1459_v39, %s1514_s23  ;;  %v975_v59 = vmul.f32 0.5, %v1459_v39  ;;  %v841_v39 = vadd.f32 %v840_v42, %v839_v44 }
0x14e8   :  { %v976_v7 = vadd.f32 0.5, %v975_v59  ;;  %v2346_v59 = vld [vmem:[#allocation12_spill] sm:$0xff] }
0x14ea   :  { %v977_v8 = vmul.f32 %v976_v7, %v948_v10 }
0x1558   :  { %v980_v61 = vpop.permute.xlu0 %979 }
0x1559   :  { %v982_v53 = vmul.f32 %v980_v61, %v976_v7 }
0x155b   :  { %984 = vrot.lane.b32.xlu1 %v982_v53, %s1515_s24  ;;  %v2347_v53 = vld [vmem:[#allocation15_spill] sm:$0xff] }
0x15cd   :  { %v985_v40 = vpop.permute.xlu1 %984 }
0x15ce   :  { %v987_v12 = vadd.f32 %v985_v40, %v977_v8  ;;  %v844_v8 = vmul.f32 %v2002_v31, %v2347_v53 }
0x15d0   :  { %1460 = vtanh.f32 %v987_v12 }
0x15dd   :  { %v1461_v46 = vpop.eup %1460 }
0x15de   :  { %990 = vrot.lane.b32.xlu0 %v1461_v46, %s1515_s24 }
0x1650   :  { %v991_v56 = vpop.permute.xlu0 %990 }
0x1651   :  { %v993_v13 = vmul.f32 %v991_v56, %v976_v7  ;;  %v842_v7 = vmul.f32 %v1992_v48, %v2346_v59 }
0x1653   :  { %1002 = vperm.xlu0 %1400, %v993_v13   ;;  %996 = vperm.xlu1 %1399, %v993_v13   ;;  %v843_v61 = vadd.f32 %v842_v7, %v841_v39 }
0x1655   :  { %v845_v40 = vadd.f32 %v844_v8, %v843_v61  ;;  %v2350_v8 = vmov 13  }
0x1657   :  { %1401 = vset.pattern.permute.xlu1 %v2340_v29  ;;  %1402 = vset.pattern.permute.xlu0 %v2338_v28 }
0x1658   :  { %1008 = vperm.xlu1 %1401, %v993_v13  }
0x165c   :  { %1403 = vset.pattern.permute.xlu1 %v2337_v37 }
0x16ce   :  { %v1003_v27 = vpop.permute.xlu0 %1002  ;;  %v997_v26 = vpop.permute.xlu1 %996 }
0x16cf   :  { %v999_v43 = vmul.f32 %v2116_v11, %v997_v26  ;;  %v1005_v30 = vmul.f32 %v2123_v14, %v1003_v27 }
0x16d1   :  { %v1000_v10 = vadd.f32 %v999_v43, %v835_v17 }
0x16d3   :  { %v1006_v22 = vadd.f32 %v1005_v30, %v1000_v10  ;;  %v1009_v2 = vpop.permute.xlu1 %1008 }
0x16d4   :  { %v1011_v47 = vmul.f32 %v2130_v15, %v1009_v2 }
0x16d6   :  { %v1012_v45 = vadd.f32 %v1011_v47, %v1006_v22 }
0x16d8   :  { %1462 = vtanh.f32 %v1012_v45 }
0x16e5   :  { %v1463_v50 = vpop.eup %1462 }
0x16e6   :  { %1018 = vrot.lane.b32.xlu1 %v1463_v50, %s1514_s23  ;;  %v1014_v32 = vmul.f32 0.5, %v1463_v50  ;;  %v2349_v50 = vld [vmem:[#allocation11_spill] sm:$0xff] }
0x16e8   :  { %v1015_v55 = vadd.f32 0.5, %v1014_v32  ;;  %v858_v32 = vmul.f32 %v2093_v18, %v2349_v50  ;;  %v1287_v50 = vld [vmem:[%s2278_s1 + $0x17] ss:$0 sm:$0xff] }
0x16ea   :  { %v1016_v51 = vmul.f32 %v1015_v55, %v987_v12  ;;  %v2348_v12 = vld [vmem:[#allocation13_spill] sm:$0xff] }
0x16eb   :  { %v846_v5 = vmul.f32 %v2093_v18, %v2348_v12  ;;  %v2352_v12 = vld [vmem:[#allocation9_spill] sm:$0xff] }
0x16ed   :  { %v847_v13 = vadd.f32 %v846_v5, %v845_v40  ;;  %v2351_v40 = vmov 12   ;;  %v870_v5 = vmul.f32 %v2093_v18, %v2352_v12 }
0x1758   :  { %v1019_v38 = vpop.permute.xlu1 %1018 }
0x1759   :  { %v1021_v57 = vmul.f32 %v1019_v38, %v1015_v55 }
0x175b   :  { %1023 = vrot.lane.b32.xlu0 %v1021_v57, %s1515_s24  ;;  %v859_v57 = vadd.f32 %v858_v32, %v2008_v4  ;;  %v1289_v32 = vld [vmem:[%s2278_s1 + $0x19] ss:$0 sm:$0xff] }
0x17cd   :  { %v1024_v63 = vpop.permute.xlu0 %1023 }
0x17ce   :  { %v1026_v33 = vadd.f32 %v1024_v63, %v1016_v51 }
0x17d0   :  { %1464 = vtanh.f32 %v1026_v33 }
0x17dd   :  { %v1465_v60 = vpop.eup %1464 }
0x17de   :  { %1029 = vrot.lane.b32.xlu1 %v1465_v60, %s1515_s24 }
0x1850   :  { %v1030_v0 = vpop.permute.xlu1 %1029 }
0x1851   :  { %v1032_v6 = vmul.f32 %v1030_v0, %v1015_v55 }
0x1853   :  { %1041 = vperm.xlu1 %1403, %v1032_v6   ;;  %1035 = vperm.xlu0 %1402, %v1032_v6  }
0x1857   :  { %1404 = vset.pattern.permute.xlu1 %v2340_v29  ;;  %1406 = vset.pattern.permute.xlu0 %v2337_v37 }
0x1858   :  { %1047 = vperm.xlu1 %1404, %v1032_v6  }
0x185c   :  { %1405 = vset.pattern.permute.xlu1 %v2338_v28 }
0x18ce   :  { %v1042_v46 = vpop.permute.xlu1 %1041  ;;  %v1036_v56 = vpop.permute.xlu0 %1035 }
0x18cf   :  { %v1038_v1 = vmul.f32 %v2116_v11, %v1036_v56  ;;  %v1044_v9 = vmul.f32 %v2123_v14, %v1042_v46 }
0x18d1   :  { %v1039_v19 = vadd.f32 %v1038_v1, %v847_v13  ;;  %v871_v13 = vadd.f32 %v870_v5, %v2059_v23 }
0x18d3   :  { %v1048_v21 = vpop.permute.xlu1 %1047  ;;  %v1045_v20 = vadd.f32 %v1044_v9, %v1039_v19 }
0x18d4   :  { %v1050_v25 = vmul.f32 %v2130_v15, %v1048_v21 }
0x18d6   :  { %v1051_v41 = vadd.f32 %v1050_v25, %v1045_v20 }
0x18d8   :  { %1466 = vtanh.f32 %v1051_v41 }
0x18e5   :  { %v1467_v24 = vpop.eup %1466 }
0x18e6   :  { %1057 = vrot.lane.b32.xlu0 %v1467_v24, %s1514_s23  ;;  %v1053_v27 = vmul.f32 0.5, %v1467_v24 }
0x18e8   :  { %v1054_v26 = vadd.f32 0.5, %v1053_v27 }
0x18ea   :  { %v1055_v30 = vmul.f32 %v1054_v26, %v1026_v33 }
0x1958   :  { %v1058_v17 = vpop.permute.xlu0 %1057 }
0x1959   :  { %v1060_v43 = vmul.f32 %v1058_v17, %v1054_v26 }
0x195b   :  { %1062 = vrot.lane.b32.xlu1 %v1060_v43, %s1515_s24 }
0x19cd   :  { %v1063_v10 = vpop.permute.xlu1 %1062 }
0x19ce   :  { %v1065_v22 = vadd.f32 %v1063_v10, %v1055_v30 }
0x19d0   :  { %1468 = vtanh.f32 %v1065_v22 }
0x19dd   :  { %v1469_v2 = vpop.eup %1468 }
0x19de   :  { %1068 = vrot.lane.b32.xlu0 %v1469_v2, %s1515_s24 }
0x1a50   :  { %v1069_v47 = vpop.permute.xlu0 %1068 }
0x1a51   :  { %v1071_v45 = vmul.f32 %v1069_v47, %v1054_v26 }
0x1a53   :  { %1080 = vperm.xlu0 %1406, %v1071_v45   ;;  %1074 = vperm.xlu1 %1405, %v1071_v45  }
0x1a57   :  { %1407 = vset.pattern.permute.xlu1 %v2340_v29  ;;  %1408 = vset.pattern.permute.xlu0 %v2338_v28 }
0x1a58   :  { %1086 = vperm.xlu1 %1407, %v1071_v45  }
0x1a5c   :  { %1409 = vset.pattern.permute.xlu1 %v2337_v37 }
0x1ace   :  { %v1081_v55 = vpop.permute.xlu0 %1080  ;;  %v1075_v38 = vpop.permute.xlu1 %1074 }
0x1acf   :  { %v1077_v51 = vmul.f32 %v2116_v11, %v1075_v38  ;;  %v1083_v63 = vmul.f32 %v2123_v14, %v1081_v55  ;;  %v2353_v55 = vld [vmem:[#allocation4_spill] sm:$0xff] }
0x1ad1   :  { %v1078_v33 = vadd.f32 %v1077_v51, %v859_v57  ;;  %v1292_v57 = vld [vmem:[%s2278_s1 + $0x1c] ss:$0 sm:$0xff] }
0x1ad3   :  { %v1084_v60 = vadd.f32 %v1083_v63, %v1078_v33  ;;  %v1087_v0 = vpop.permute.xlu1 %1086 }
0x1ad4   :  { %v1089_v6 = vmul.f32 %v2130_v15, %v1087_v0  ;;  %v2354_v0 = vld [vmem:[#allocation3_spill] sm:$0xff] }
0x1ad5   :  { %v886_v5 = vmul.f32 %v1992_v48, %v2354_v0 }
0x1ad6   :  { %v1090_v52 = vadd.f32 %v1089_v6, %v1084_v60  ;;  %v1195_v6 = vmul.f32 %v1292_v57, %v2354_v0 }
0x1ad8   :  { %1470 = vtanh.f32 %v1090_v52 }
0x1ae5   :  { %v1471_v34 = vpop.eup %1470 }
0x1ae6   :  { %1096 = vrot.lane.b32.xlu1 %v1471_v34, %s1514_s23  ;;  %v1092_v35 = vmul.f32 0.5, %v1471_v34  ;;  %v1293_v34 = vld [vmem:[%s2278_s1 + $0x1d] ss:$0 sm:$0xff] }
0x1ae8   :  { %v1093_v44 = vadd.f32 0.5, %v1092_v35 }
0x1aea   :  { %v1094_v4 = vmul.f32 %v1093_v44, %v1065_v22 }
0x1b58   :  { %v1097_v36 = vpop.permute.xlu1 %1096 }
0x1b59   :  { %v1099_v42 = vmul.f32 %v1097_v36, %v1093_v44  ;;  %v2355_v36 = vld [vmem:[#allocation5_spill] sm:$0xff] }
0x1b5b   :  { %1101 = vrot.lane.b32.xlu0 %v1099_v42, %s1515_s24  ;;  %v1199_v42 = vmul.f32 %v1293_v34, %v2355_v36 }
0x1bcd   :  { %v1102_v39 = vpop.permute.xlu0 %1101 }
0x1bce   :  { %v1104_v59 = vadd.f32 %v1102_v39, %v1094_v4 }
0x1bd0   :  { %1472 = vtanh.f32 %v1104_v59 }
0x1bdd   :  { %v1473_v7 = vpop.eup %1472 }
0x1bde   :  { %1107 = vrot.lane.b32.xlu1 %v1473_v7, %s1515_s24 }
0x1c50   :  { %v1108_v61 = vpop.permute.xlu1 %1107 }
0x1c51   :  { %v1110_v53 = vmul.f32 %v1108_v61, %v1093_v44 }
0x1c53   :  { %1119 = vperm.xlu1 %1409, %v1110_v53   ;;  %1113 = vperm.xlu0 %1408, %v1110_v53  }
0x1c57   :  { %1410 = vset.pattern.permute.xlu1 %v2340_v29  ;;  %1412 = vset.pattern.permute.xlu0 %v2350_v8 }
0x1c58   :  { %1125 = vperm.xlu1 %1410, %v1110_v53   ;;  %v878_v53 = vmul.f32 %v1929_v62, %v2353_v55 }
0x1c5c   :  { %1411 = vset.pattern.permute.xlu1 %v2351_v40 }
0x1cce   :  { %v1120_v46 = vpop.permute.xlu1 %1119  ;;  %v1114_v56 = vpop.permute.xlu0 %1113 }
0x1ccf   :  { %v1116_v1 = vmul.f32 %v2116_v11, %v1114_v56  ;;  %v1122_v9 = vmul.f32 %v2123_v14, %v1120_v46 }
0x1cd1   :  { %v1117_v19 = vadd.f32 %v1116_v1, %v871_v13  ;;  %v894_v1 = vmul.f32 %v2093_v18, %v2355_v36 }
0x1cd3   :  { %v1126_v21 = vpop.permute.xlu1 %1125  ;;  %v1123_v20 = vadd.f32 %v1122_v9, %v1117_v19 }
0x1cd4   :  { %v1128_v25 = vmul.f32 %v2130_v15, %v1126_v21 }
0x1cd6   :  { %v1129_v41 = vadd.f32 %v1128_v25, %v1123_v20 }
0x1cd8   :  { %1474 = vtanh.f32 %v1129_v41 }
0x1ce5   :  { %v1475_v24 = vpop.eup %1474 }
0x1ce6   :  { %1135 = vrot.lane.b32.xlu0 %v1475_v24, %s1514_s23  ;;  %v1131_v27 = vmul.f32 0.5, %v1475_v24 }
0x1ce8   :  { %v1132_v26 = vadd.f32 0.5, %v1131_v27 }
0x1cea   :  { %v1133_v23 = vmul.f32 %v1132_v26, %v1104_v59 }
0x1d58   :  { %v1136_v17 = vpop.permute.xlu0 %1135 }
0x1d59   :  { %v1138_v43 = vmul.f32 %v1136_v17, %v1132_v26 }
0x1d5b   :  { %1140 = vrot.lane.b32.xlu1 %v1138_v43, %s1515_s24 }
0x1d5f   :  { %873 = vperm.xlu1 %1411, %v2073_v54  }
0x1d63   :  { %1413 = vset.pattern.permute.xlu1 %v2327_v49  ;;  %v1288_v49 = vld [vmem:[%s2278_s1 + $0x18] ss:$0 sm:$0xff] }
0x1d64   :  { %889 = vperm.xlu1 %1413, %v2073_v54  }
0x1d68   :  { %1414 = vset.pattern.permute.xlu1 %v2338_v28 }
0x1dcd   :  { %v1141_v30 = vpop.permute.xlu1 %1140 }
0x1dce   :  { %v2217_v10 = vadd.f32 %v1141_v30, %v1133_v23 }
0x1dd0   :  { %1476 = vtanh.f32 %v2217_v10 }
0x1dda   :  { %v874_v28 = vpop.permute.xlu1 %873 }
0x1ddb   :  { %v1189_v45 = vmul.f32 %v1288_v49, %v874_v28  ;;  %v876_v7 = vmul.f32 %v1920_v58, %v874_v28 }
0x1ddd   :  { %v1477_v22 = vpop.eup %1476  ;;  %v877_v61 = vadd.f32 %v1934_v16, %v876_v7 }
0x1dde   :  { %1146 = vrot.lane.b32.xlu0 %v1477_v22, %s1515_s24  ;;  %v1294_v22 = vld [vmem:[%s2278_s1 + $0x1e] ss:$0 sm:$0xff] }
0x1ddf   :  { %v890_v60 = vpop.permute.xlu1 %889  ;;  %v879_v40 = vadd.f32 %v878_v53, %v877_v61 }
0x1de0   :  { %v892_v56 = vmul.f32 %v2002_v31, %v890_v60 }
0x1de2   :  { %881 = vperm.xlu0 %1412, %v2073_v54   ;;  %v1291_v54 = vld [vmem:[%s2278_s1 + $0x1b] ss:$0 sm:$0xff] }
0x1de3   :  { %v1191_v38 = vmul.f32 %v1291_v54, %v2353_v55 }
0x1de6   :  { %1415 = vset.pattern.permute.xlu0 %v2337_v37  ;;  %v1190_v37 = vadd.f32 %v1287_v50, %v1189_v45 }
0x1de8   :  { %v1192_v63 = vadd.f32 %v1191_v38, %v1190_v37 }
0x1e50   :  { %v1147_v2 = vpop.permute.xlu0 %1146 }
0x1e51   :  { %v1149_v47 = vmul.f32 %v1147_v2, %v1132_v26 }
0x1e53   :  { %1158 = vperm.xlu0 %1415, %v1149_v47   ;;  %1152 = vperm.xlu1 %1414, %v1149_v47  }
0x1e57   :  { %1416 = vset.pattern.permute.xlu1 %v2340_v29  ;;  %1417 = vset.pattern.permute.xlu0 %v2340_v29  ;;  %v1290_v29 = vld [vmem:[%s2278_s1 + $0x1a] ss:$0 sm:$0xff] }
0x1e58   :  { %1164 = vperm.xlu1 %1416, %v1149_v47   ;;  %v1197_v35 = vmul.f32 %v1290_v29, %v890_v60 }
0x1e5d   :  { %v882_v51 = vpop.permute.xlu0 %881 }
0x1e5e   :  { %v1193_v33 = vmul.f32 %v1289_v32, %v882_v51  ;;  %v884_v8 = vmul.f32 %v1986_v3, %v882_v51 }
0x1e60   :  { %v1194_v52 = vadd.f32 %v1193_v33, %v1192_v63  ;;  %v885_v12 = vadd.f32 %v884_v8, %v879_v40 }
0x1e62   :  { %v1196_v44 = vadd.f32 %v1195_v6, %v1194_v52  ;;  %v887_v46 = vadd.f32 %v886_v5, %v885_v12 }
0x1e64   :  { %v1198_v4 = vadd.f32 %v1197_v35, %v1196_v44  ;;  %v893_v13 = vadd.f32 %v892_v56, %v887_v46 }
0x1e66   :  { %v1200_v39 = vadd.f32 %v1199_v42, %v1198_v4  ;;  %v895_v16 = vadd.f32 %v894_v1, %v893_v13 }
0x1e68   :  { %1478 = vtanh.f32 %v1200_v39 }
0x1e75   :  { %v1479_v59 = vpop.eup %1478 }
0x1e76   :  { %1206 = vrot.lane.b32.xlu0 %v1479_v59, %s1514_s23  ;;  %v1202_v41 = vmul.f32 0.5, %v1479_v59 }
0x1e78   :  { %v1203_v24 = vadd.f32 0.5, %v1202_v41 }
0x1ece   :  { %v1153_v58 = vpop.permute.xlu1 %1152  ;;  %v1159_v9 = vpop.permute.xlu0 %1158 }
0x1ecf   :  { %v1155_v19 = vmul.f32 %v2116_v11, %v1153_v58  ;;  %v1161_v3 = vmul.f32 %v2123_v14, %v1159_v9  ;;  %v1204_v14 = vmul.f32 0.0, %v1203_v24 }
0x1ed1   :  { %v1156_v62 = vadd.f32 %v1155_v19, %v895_v16 }
0x1ed3   :  { %v1162_v21 = vadd.f32 %v1161_v3, %v1156_v62  ;;  %v1165_v20 = vpop.permute.xlu1 %1164 }
0x1ed4   :  { %v1167_v25 = vmul.f32 %v2130_v15, %v1165_v20 }
0x1ed6   :  { %v1168_v48 = vadd.f32 %v1167_v25, %v1162_v21 }
0x1ed8   :  { %1480 = vtanh.f32 %v1168_v48 }
0x1ee5   :  { %v1481_v31 = vpop.eup %1480 }
0x1ee6   :  { %1174 = vrot.lane.b32.xlu1 %v1481_v31, %s1514_s23  ;;  %v1170_v26 = vmul.f32 0.5, %v1481_v31 }
0x1ee8   :  { %v1207_v18 = vpop.permute.xlu0 %1206  ;;  %v1171_v11 = vadd.f32 0.5, %v1170_v26 }
0x1ee9   :  { %v1209_v27 = vmul.f32 %v1207_v18, %v1203_v24 }
0x1eea   :  { %v1172_v2 = vmul.f32 %v1171_v11, %v2217_v10 }
0x1eeb   :  { %1211 = vrot.lane.b32.xlu0 %v1209_v27, %s1515_s24 }
0x1f58   :  { %v1175_v17 = vpop.permute.xlu1 %1174 }
0x1f59   :  { %v1177_v43 = vmul.f32 %v1175_v17, %v1171_v11 }
0x1f5b   :  { %1179 = vrot.lane.b32.xlu1 %v1177_v43, %s1515_s24 }
0x1f5d   :  { %v1212_v23 = vpop.permute.xlu0 %1211 }
0x1f5e   :  { %v1214_v15 = vadd.f32 %v1212_v23, %v1204_v14 }
0x1f60   :  { %1482 = vtanh.f32 %v1214_v15 }
0x1f6d   :  { %v1483_v30 = vpop.eup %1482 }
0x1f6e   :  { %1217 = vrot.lane.b32.xlu0 %v1483_v30, %s1515_s24 }
0x1f72   :  { %1238 = vrot.lane.b32.xlu0 %v1294_v22, %s1515_s24 }
0x1fcd   :  { %v1180_v47 = vpop.permute.xlu1 %1179 }
0x1fce   :  { %v1182_v49 = vadd.f32 %v1180_v47, %v1172_v2 }
0x1fd0   :  { %1484 = vtanh.f32 %v1182_v49 }
0x1fdd   :  { %v1485_v28 = vpop.eup %1484 }
0x1fde   :  { %1185 = vrot.lane.b32.xlu1 %v1485_v28, %s1515_s24 }
0x1fe0   :  { %v1218_v45 = vpop.permute.xlu0 %1217 }
0x1fe1   :  { %v1220_v50 = vmul.f32 %v1218_v45, %v1203_v24 }
0x1fe2   :  { %1226 = vrot.lane.b32.xlu1 %v1294_v22, %s1495_s25 }
0x1fe4   :  { %v1239_v54 = vpop.permute.xlu0 %1238 }
0x1fe5   :  { %v1241_v37 = vmul.f32 %v1239_v54, %v1220_v50 }
0x1fe7   :  { %1243 = vrot.lane.b32.xlu0 %v1241_v37, %s1516_s19 }
0x2050   :  { %v1186_v32 = vpop.permute.xlu1 %1185 }
0x2051   :  { %v1188_v55 = vmul.f32 %v1186_v32, %v1171_v11 }
0x2054   :  { %v1227_v38 = vpop.permute.xlu1 %1226 }
0x2055   :  { %v1229_v57 = vmul.f32 %v1227_v38, %v1188_v55 }
0x2057   :  { %1231 = vrot.lane.b32.xlu1 %v1229_v57, %s1516_s19 }
0x2059   :  { %v1244_v10 = vpop.permute.xlu0 %1243 }
0x205a   :  { %v1246_v51 = vsel %vm1234_vm0, %v1244_v10, 0.0 }
0x205b   :  { %1247 = vadd.xlane.f32.xlu0 %v1246_v51 }
0x20c9   :  { %v1232_v63 = vpop.permute.xlu1 %1231 }
0x20ca   :  { %v1235_v33 = vsel %vm1234_vm0, %v1232_v63, 0.0 }
0x20cb   :  { %1236 = vadd.xlane.f32.xlu1 %v1235_v33 }
0x20e4   :  { %v1248_v29 = vpop.xlane.xlu0 %1247 }
0x2154   :  { %v1237_v60 = vpop.xlane.xlu1 %1236 }
0x2155   :  { %v1249_v0 = vadd.f32 %v1248_v29, %v1237_v60 }
0x2157   :  { %v1250_v6 = vadd.f32 %v1294_v22, %v1249_v0 }
0x2159   :  { %1486 = vtanh.f32 %v1250_v6 }
0x2166   :  { %v1487_v52 = vpop.eup %1486 }
0x2167   :  { %v1252_v34 = vmul.f32 0.5, %v1487_v52 }
0x2169   :  { %v1253_v35 = vadd.f32 0.5, %v1252_v34 }
0x216b   :  { %1255 = vrot.lane.b32.xlu0 %v1253_v35, %s1516_s19 }
0x21dd   :  { %v1256_v44 = vpop.permute.xlu0 %1255 }
0x21de   :  { %1259 = vst.msk [vmem:[%s2279_s2] sm:$0x3] %vm1258_vm1, %v1256_v44 }

</bundles_post_ra>
